<compile_context>
chip_gen: v7x
topology: tpu7x:2x2x1
jax: 0.10.0
libtpu: 0.0.40
codegen_flags: <defaults>
</compile_context>

<pallas_src>
import functools

import jax
import jax.numpy as jnp
import numpy as np
from jax.experimental import pallas as pl
from jax.experimental.pallas import tpu as pltpu


def wave_block_kernel(x_ref, w1_ref, b1_ref,
                      bn1s_ref, bn1o_ref,
                      wd_ref,
                      bn2s_ref, bn2o_ref,
                      wp_ref, bp_ref,
                      out_ref,
                      *, num_layers, kernel_size, dilations):
    bt, cin, L = x_ref.shape
    F = w1_ref.shape[0]                      # w1 is flipped: (F, Cin)
    R = bt * L
    K = kernel_size

    # ---- input gather: (bt, Cin, L) -> (Cin, bt*L) -----------------------
    # Channels are already on sublanes / time on lanes, so no XLU transpose;
    # the lane-axis concat is contiguous vreg placement when L % 128 == 0.
    if bt == 1:
        x_cat = x_ref[0]
    else:
        x_cat = jnp.concatenate([x_ref[b] for b in range(bt)], axis=1)

    # first_conv (kernel_size=1) == channel matmul: (F, Cin) @ (Cin, R)
    h = jnp.dot(w1_ref[...], x_cat,
                preferred_element_type=jnp.float32) + b1_ref[...]
    res = h

    # ---- precompute the num_layers*(K-1) distinct boundary masks once ----
    # Within-batch lane position; masks are lane-dense (1, R) 0/1 vectors.
    lpos = jax.lax.broadcasted_iota(jnp.int32, (1, R), 1) % L
    masks = {}
    for d in dilations:
        pad = d * (K - 1) // 2
        for j in range(K):
            off = j * d - pad                        # static python int
            if off != 0 and off not in masks:
                masks[off] = ((lpos + off >= 0) &
                              (lpos + off < L)).astype(jnp.float32)

    for i in range(num_layers):
        d = dilations[i]
        pad = d * (K - 1) // 2

        # BatchNorm1d (eval, folded affine) + ReLU -- lane-dense VPU math,
        # per-channel params broadcast from an (F, 1) column.
        t = jnp.maximum(h * bn1s_ref[i] + bn1o_ref[i], 0.0)

        # Dilated 'same' Conv1d: K lane-rolled copies of t stacked along
        # SUBLANES (free placement) -> one (F, K*F) @ (K*F, R) MXU matmul.
        taps = []
        for j in range(K):
            off = j * d - pad
            if off == 0:
                taps.append(t)
            else:
                rolled = pltpu.roll(t, shift=(-off) % R, axis=1)   # lane rotate
                taps.append(rolled * masks[off])                   # batch-safe
        t_cat = taps[0] if K == 1 else jnp.concatenate(taps, axis=0)  # (K*F, R)
        u = jnp.dot(wd_ref[i], t_cat, preferred_element_type=jnp.float32)

        # BatchNorm1d + ReLU (dilated-conv bias pre-folded into bn2 offset)
        t2 = jnp.maximum(u * bn2s_ref[i] + bn2o_ref[i], 0.0)

        # pointwise Conv1d
        v = jnp.dot(wp_ref[i], t2,
                    preferred_element_type=jnp.float32) + bp_ref[i]

        h = v
        res = res + v

    # ---- scatter back: (F, bt*L) -> (bt, F, L): pure lane slices ----------
    for b in range(bt):
        out_ref[b] = res[:, b * L:(b + 1) * L].astype(out_ref.dtype)


def prepare_params(params, *, num_layers, kernel_size,
                   compute_dtype=jnp.float32):
    """Host-side precompute: weight flips for the (F, R) layout, tap fusion,
    BN folding.  compute_dtype=jnp.bfloat16 is allowed if lower precision is
    acceptable; default keeps f32 for parity with the PyTorch module."""
    K, NL = kernel_size, num_layers
    F = params["wp"].shape[-1]

    w1 = jnp.transpose(params["w1"])                      # (F, Cin)
    b1 = params["b1"].reshape(F, 1)
    # wd stored as (NL*K, Cin=F, Cout=F); flip to (NL, F_out, K*F_in) so the
    # sublane-stacked taps (row = k*F + c) contract in a single matmul.
    wd = params["wd"].reshape(NL, K, F, F)
    wd = jnp.transpose(wd, (0, 3, 1, 2)).reshape(NL, F, K * F)
    wp = jnp.transpose(params["wp"], (0, 2, 1))           # (NL, F_out, F_in)
    bp = params["bp"].reshape(NL, F, 1)
    # fold dilated-conv bias into the 2nd BN affine:
    #   relu((conv + bd) * s2 + o2) == relu(conv * s2 + (bd * s2 + o2))
    bn2_off = params["bd"] * params["bn2_scale"] + params["bn2_offset"]

    col = lambda a: a.reshape(NL, F, 1).astype(jnp.float32)
    return dict(
        w1=w1.astype(compute_dtype), b1=b1.astype(jnp.float32),
        bn1_scale=col(params["bn1_scale"]), bn1_offset=col(params["bn1_offset"]),
        wd=wd.astype(compute_dtype),
        bn2_scale=col(params["bn2_scale"]), bn2_offset=col(bn2_off),
        wp=wp.astype(compute_dtype), bp=bp.astype(jnp.float32),
    )


def _tpu_topology():
    """Best-effort query of VMEM capacity and TensorCore count."""
    vmem_cap, num_cores = 64 << 20, 1
    try:
        info = pltpu.get_tpu_info()
        vmem_cap = int(getattr(info, "vmem_capacity_bytes", vmem_cap))
        for attr in ("num_tensorcores", "tensorcore_count", "num_cores",
                     "cores_per_chip", "core_count"):
            v = getattr(info, attr, None)
            if isinstance(v, int) and v > 0:
                num_cores = v
                break
    except Exception:
        pass
    return vmem_cap, num_cores


def _pick_batch_tile(B, L, Cin, F, K, num_cores, vmem_cap):
    """Largest batch tile that fits the VMEM budget.  Single-TC chips
    (v5e/v6e) use one grid step; multi-TC chips (v7x) prefer >= 2 steps per
    core so BlockSpec double-buffering actually overlaps DMA with compute."""
    budget = int(0.45 * vmem_cap)             # headroom for weights/io buffers
    per_row = (K + 6) * F * 4 + 4 * (Cin + F) * 4   # live acts + 2x-buffered io
    max_rows = max(L, budget // max(per_row, 1))
    cands = [d for d in range(1, B + 1) if B % d == 0 and d * L <= max_rows]
    if not cands:
        cands = [1]
    if num_cores > 1:
        for want_steps in (2 * num_cores, num_cores):
            good = [d for d in cands if B // d >= want_steps]
            if good:
                return max(good)
    return max(cands)


def _vmem_estimate(bt, Cin, F, L, K, weights):
    R = bt * L
    act = (K + 6) * F * R * 4                          # live f32 activation slabs
    io = 2 * 2 * bt * L * (Cin + F) * 4                # double-buffered in/out
    w = 2 * sum(int(np.prod(a.shape)) * a.dtype.itemsize for a in weights)
    return act + io + w + (1 << 20)                    # + slack (padding, misc)


def simplified_wave_block(x_ncl, params, *, num_layers, kernel_size, dilations,
                          batch_tile=None, compute_dtype=jnp.float32,
                          out_dtype=jnp.float32):
    """x_ncl: (B, Cin, L) like PyTorch; returns (B, F, L). No HBM transposes."""
    assert kernel_size % 2 == 1, "'same' padding decomposition assumes odd K"
    B, Cin, L = x_ncl.shape
    prepped = prepare_params(params, num_layers=num_layers,
                             kernel_size=kernel_size,
                             compute_dtype=compute_dtype)
    F = prepped["wp"].shape[1]

    vmem_cap, num_cores = _tpu_topology()
    bt = (batch_tile if batch_tile is not None
          else _pick_batch_tile(B, L, Cin, F, kernel_size, num_cores, vmem_cap))
    assert B % bt == 0, "batch_tile must divide B"

    kern = functools.partial(wave_block_kernel, num_layers=num_layers,
                             kernel_size=kernel_size,
                             dilations=tuple(dilations))

    weight_order = ["w1", "b1", "bn1_scale", "bn1_offset", "wd",
                    "bn2_scale", "bn2_offset", "wp", "bp"]
    weights = [prepped[k] for k in weight_order]

    def full_spec(arr):
        # grid-invariant weights stay resident (constant index_map); single-
        # buffer them only when large enough to matter for the VMEM budget.
        nd = arr.ndim
        idx = lambda g, _nd=nd: (0,) * _nd
        if int(np.prod(arr.shape)) * arr.dtype.itemsize >= (1 << 20):
            return pl.BlockSpec(arr.shape, idx, pipeline_mode=pl.Buffered(1))
        return pl.BlockSpec(arr.shape, idx)

    in_specs = [pl.BlockSpec((bt, Cin, L), lambda g: (g, 0, 0))]
    in_specs += [full_spec(w) for w in weights]

    est = _vmem_estimate(bt, Cin, F, L, kernel_size, weights)
    vmem_limit = int(min(int(0.9 * vmem_cap), max(2 * est, 16 << 20)))

    return pl.pallas_call(
        kern,
        out_shape=jax.ShapeDtypeStruct((B, F, L), out_dtype),
        grid=(B // bt,),
        in_specs=in_specs,
        out_specs=pl.BlockSpec((bt, F, L), lambda g: (g, 0, 0)),
        compiler_params=pltpu.CompilerParams(
            dimension_semantics=("parallel",),
            vmem_limit_bytes=vmem_limit),
    )(x_ncl, *weights)


def init_params(key, in_channels, num_filters, num_layers, kernel_size):
    F, NL, K = num_filters, num_layers, kernel_size
    eps = 1e-5
    std = 0.1
    keys = jax.random.split(key, 12)
    w1 = std * jax.random.normal(keys[0], (in_channels, F), jnp.float32)
    b1 = std * jax.random.normal(keys[1], (1, F), jnp.float32)
    wd = std * jax.random.normal(keys[2], (NL * K, F, F), jnp.float32)
    bd = std * jax.random.normal(keys[3], (NL, F), jnp.float32)
    wp = std * jax.random.normal(keys[4], (NL, F, F), jnp.float32)
    bp = std * jax.random.normal(keys[5], (NL, F), jnp.float32)

    def make_bn(kg, kb, km, kv):
        gamma = 1.0 + 0.1 * jax.random.normal(kg, (NL, F), jnp.float32)
        beta = 0.1 * jax.random.normal(kb, (NL, F), jnp.float32)
        mean = 0.1 * jax.random.normal(km, (NL, F), jnp.float32)
        var = jax.random.uniform(kv, (NL, F), jnp.float32, minval=0.5, maxval=1.5)
        scale = gamma * jax.lax.rsqrt(var + eps)
        offset = beta - mean * scale
        return scale, offset

    bn1_scale, bn1_offset = make_bn(keys[6], keys[7], keys[8], keys[9])
    k2 = jax.random.split(keys[10], 4)
    bn2_scale, bn2_offset = make_bn(k2[0], k2[1], k2[2], k2[3])
    return dict(w1=w1, b1=b1, bn1_scale=bn1_scale, bn1_offset=bn1_offset,
                wd=wd, bd=bd, bn2_scale=bn2_scale, bn2_offset=bn2_offset,
                wp=wp, bp=bp)


def ref_forward(x_ncl, params, *, num_layers, kernel_size, dilations):
    """Pure-JAX reference using lax.conv_general_dilated (NCL, like PyTorch)."""
    def conv(x, w, b, dilation):
        wt = jnp.transpose(w, (2, 1, 0))        # (k, cin, cout) -> (cout, cin, k)
        y = jax.lax.conv_general_dilated(
            x, wt, window_strides=(1,), padding="SAME",
            rhs_dilation=(dilation,),
            dimension_numbers=("NCH", "OIH", "NCH"),
            precision=jax.lax.Precision.HIGHEST)
        return y + b[None, :, None]

    h = conv(x_ncl, params["w1"][None], params["b1"][0], 1)
    res = h
    K = kernel_size
    for i in range(num_layers):
        s1 = params["bn1_scale"][i][None, :, None]
        o1 = params["bn1_offset"][i][None, :, None]
        t = jnp.maximum(h * s1 + o1, 0.0)
        u = conv(t, params["wd"][i * K:(i + 1) * K], params["bd"][i], dilations[i])
        s2 = params["bn2_scale"][i][None, :, None]
        o2 = params["bn2_offset"][i][None, :, None]
        t2 = jnp.maximum(u * s2 + o2, 0.0)
        v = conv(t2, params["wp"][i][None], params["bp"][i], 1)
        h = v
        res = res + v
    return res


if __name__ == "__main__":
    num_layers, in_channels, num_filters, kernel_size = 3, 4, 32, 3
    dilations = tuple(2 ** i for i in range(num_layers))   # (1, 2, 4)
    # L = 128 keeps the output block's last dim lane-dense (unmasked stores).
    B, L = 4, 128

    key = jax.random.PRNGKey(0)
    kx, kp = jax.random.split(key)
    x = jax.random.normal(kx, (B, in_channels, L), jnp.float32)   # NCL like PyTorch
    params = init_params(kp, in_channels, num_filters, num_layers, kernel_size)

    out = simplified_wave_block(x, params, num_layers=num_layers,
                                kernel_size=kernel_size, dilations=dilations)
    out = jax.block_until_ready(out)
    assert out.shape == (B, num_filters, L)

    ref = ref_forward(x, params, num_layers=num_layers,
                      kernel_size=kernel_size, dilations=dilations)
    # MXU default-precision matmuls vs HIGHEST-precision f32 reference.
    np.testing.assert_allclose(np.asarray(out), np.asarray(ref),
                               atol=3e-2, rtol=3e-2)
    print("KERNEL_OK")
</pallas_src>

<mosaic_0001>
module attributes {stable_mosaic.version = 11 : i64} {
  func.func @wave_block_kernel(%arg0: i32, %arg1: memref<4x4x128xf32, #tpu.memory_space<vmem>>, %arg2: memref<32x4xf32, #tpu.memory_space<vmem>>, %arg3: memref<32x1xf32, #tpu.memory_space<vmem>>, %arg4: memref<3x32x1xf32, #tpu.memory_space<vmem>>, %arg5: memref<3x32x1xf32, #tpu.memory_space<vmem>>, %arg6: memref<3x32x96xf32, #tpu.memory_space<vmem>>, %arg7: memref<3x32x1xf32, #tpu.memory_space<vmem>>, %arg8: memref<3x32x1xf32, #tpu.memory_space<vmem>>, %arg9: memref<3x32x32xf32, #tpu.memory_space<vmem>>, %arg10: memref<3x32x1xf32, #tpu.memory_space<vmem>>, %arg11: memref<4x32x128xf32, #tpu.memory_space<vmem>>) attributes {dimension_semantics = [#tpu.dimension_semantics<parallel>], iteration_bounds = array<i64: 1>, scalar_prefetch = 0 : i64, scratch_operands = 0 : i64, tpu.core_type = #tpu.core_type<tc>, window_params = [{transform_indices = @transform_0, window_bounds = array<i64: 4, 4, 128>}, {pipeline_mode = #tpu.pipeline_mode<synchronous>, transform_indices = @transform_1, window_bounds = array<i64: 32, 4>}, {pipeline_mode = #tpu.pipeline_mode<synchronous>, transform_indices = @transform_2, window_bounds = array<i64: 32, 1>}, {pipeline_mode = #tpu.pipeline_mode<synchronous>, transform_indices = @transform_3, window_bounds = array<i64: 3, 32, 1>}, {pipeline_mode = #tpu.pipeline_mode<synchronous>, transform_indices = @transform_4, window_bounds = array<i64: 3, 32, 1>}, {pipeline_mode = #tpu.pipeline_mode<synchronous>, transform_indices = @transform_5, window_bounds = array<i64: 3, 32, 96>}, {pipeline_mode = #tpu.pipeline_mode<synchronous>, transform_indices = @transform_6, window_bounds = array<i64: 3, 32, 1>}, {pipeline_mode = #tpu.pipeline_mode<synchronous>, transform_indices = @transform_7, window_bounds = array<i64: 3, 32, 1>}, {pipeline_mode = #tpu.pipeline_mode<synchronous>, transform_indices = @transform_8, window_bounds = array<i64: 3, 32, 32>}, {pipeline_mode = #tpu.pipeline_mode<synchronous>, transform_indices = @transform_9, window_bounds = array<i64: 3, 32, 1>}, {transform_indices = @transform_10, window_bounds = array<i64: 4, 32, 128>}]} {
    %c0 = arith.constant 0 : index
    %c0_0 = arith.constant 0 : index
    %c0_1 = arith.constant 0 : index
    %0 = vector.load %arg1[%c0, %c0_0, %c0_1] : memref<4x4x128xf32, #tpu.memory_space<vmem>>, vector<1x4x128xf32>
    %1 = vector.shape_cast %0 : vector<1x4x128xf32> to vector<4x128xf32>
    %c1 = arith.constant 1 : index
    %c0_2 = arith.constant 0 : index
    %c0_3 = arith.constant 0 : index
    %2 = vector.load %arg1[%c1, %c0_2, %c0_3] : memref<4x4x128xf32, #tpu.memory_space<vmem>>, vector<1x4x128xf32>
    %3 = vector.shape_cast %2 : vector<1x4x128xf32> to vector<4x128xf32>
    %c2 = arith.constant 2 : index
    %c0_4 = arith.constant 0 : index
    %c0_5 = arith.constant 0 : index
    %4 = vector.load %arg1[%c2, %c0_4, %c0_5] : memref<4x4x128xf32, #tpu.memory_space<vmem>>, vector<1x4x128xf32>
    %5 = vector.shape_cast %4 : vector<1x4x128xf32> to vector<4x128xf32>
    %c3 = arith.constant 3 : index
    %c0_6 = arith.constant 0 : index
    %c0_7 = arith.constant 0 : index
    %6 = vector.load %arg1[%c3, %c0_6, %c0_7] : memref<4x4x128xf32, #tpu.memory_space<vmem>>, vector<1x4x128xf32>
    %7 = vector.shape_cast %6 : vector<1x4x128xf32> to vector<4x128xf32>
    %8 = tpu.concatenate %1, %3, %5, %7 in 1 : vector<4x128xf32>, vector<4x128xf32>, vector<4x128xf32>, vector<4x128xf32> -> vector<4x512xf32>
    %c0_8 = arith.constant 0 : index
    %c0_9 = arith.constant 0 : index
    %9 = vector.load %arg2[%c0_8, %c0_9] : memref<32x4xf32, #tpu.memory_space<vmem>>, vector<32x4xf32>
    %cst = arith.constant dense<0.000000e+00> : vector<32x512xf32>
    %10 = tpu.matmul %9, %8, %cst {dimension_numbers = #tpu.dot_dimension_numbers<[1], [0], [0], [1], [0, 0, 1, 1], [], []>} : vector<32x4xf32>, vector<4x512xf32>, vector<32x512xf32> -> vector<32x512xf32>
    %c0_10 = arith.constant 0 : index
    %c0_11 = arith.constant 0 : index
    %11 = vector.load %arg3[%c0_10, %c0_11] : memref<32x1xf32, #tpu.memory_space<vmem>>, vector<32x1xf32>
    %12 = vector.broadcast %11 : vector<32x1xf32> to vector<32x512xf32>
    %13 = arith.addf %10, %12 : vector<32x512xf32>
    %14 = tpu.iota {dimensions = array<i32: 1>} : vector<1x512xi32>
    %c128_i32 = arith.constant 128 : i32
    %c0_i32 = arith.constant 0 : i32
    %15 = arith.cmpi eq, %c128_i32, %c0_i32 : i32
    %c1_i32 = arith.constant 1 : i32
    %16 = arith.select %15, %c1_i32, %c128_i32 : i32
    %17 = vector.broadcast %16 : i32 to vector<1x512xi32>
    %18 = arith.remsi %14, %17 : vector<1x512xi32>
    %c0_i32_12 = arith.constant 0 : i32
    %19 = vector.broadcast %c0_i32_12 : i32 to vector<1x512xi32>
    %20 = arith.cmpi ne, %18, %19 : vector<1x512xi32>
    %c0_i32_13 = arith.constant 0 : i32
    %21 = vector.broadcast %c0_i32_13 : i32 to vector<1x512xi32>
    %22 = arith.cmpi slt, %18, %21 : vector<1x512xi32>
    %c0_i32_14 = arith.constant 0 : i32
    %23 = arith.cmpi slt, %16, %c0_i32_14 : i32
    %24 = vector.broadcast %23 : i1 to vector<1x512xi1>
    %25 = vector.broadcast %24 : vector<1x512xi1> to vector<1x512xi1>
    %26 = arith.xori %22, %25 : vector<1x512xi1>
    %27 = arith.andi %26, %20 : vector<1x512xi1>
    %28 = vector.broadcast %16 : i32 to vector<1x512xi32>
    %29 = arith.addi %18, %28 : vector<1x512xi32>
    %30 = arith.select %27, %29, %18 : vector<1x512xi1>, vector<1x512xi32>
    %c-1_i32 = arith.constant -1 : i32
    %31 = vector.broadcast %c-1_i32 : i32 to vector<1x512xi32>
    %32 = arith.addi %30, %31 : vector<1x512xi32>
    %c0_i32_15 = arith.constant 0 : i32
    %33 = vector.broadcast %c0_i32_15 : i32 to vector<1x512xi32>
    %34 = arith.cmpi sge, %32, %33 : vector<1x512xi32>
    %c-1_i32_16 = arith.constant -1 : i32
    %35 = vector.broadcast %c-1_i32_16 : i32 to vector<1x512xi32>
    %36 = arith.addi %30, %35 : vector<1x512xi32>
    %c128_i32_17 = arith.constant 128 : i32
    %37 = vector.broadcast %c128_i32_17 : i32 to vector<1x512xi32>
    %38 = arith.cmpi slt, %36, %37 : vector<1x512xi32>
    %39 = arith.andi %34, %38 : vector<1x512xi1>
    %40 = arith.extui %39 : vector<1x512xi1> to vector<1x512xi32>
    %41 = arith.sitofp %40 : vector<1x512xi32> to vector<1x512xf32>
    %c1_i32_18 = arith.constant 1 : i32
    %42 = vector.broadcast %c1_i32_18 : i32 to vector<1x512xi32>
    %43 = arith.addi %30, %42 : vector<1x512xi32>
    %c0_i32_19 = arith.constant 0 : i32
    %44 = vector.broadcast %c0_i32_19 : i32 to vector<1x512xi32>
    %45 = arith.cmpi sge, %43, %44 : vector<1x512xi32>
    %c1_i32_20 = arith.constant 1 : i32
    %46 = vector.broadcast %c1_i32_20 : i32 to vector<1x512xi32>
    %47 = arith.addi %30, %46 : vector<1x512xi32>
    %c128_i32_21 = arith.constant 128 : i32
    %48 = vector.broadcast %c128_i32_21 : i32 to vector<1x512xi32>
    %49 = arith.cmpi slt, %47, %48 : vector<1x512xi32>
    %50 = arith.andi %45, %49 : vector<1x512xi1>
    %51 = arith.extui %50 : vector<1x512xi1> to vector<1x512xi32>
    %52 = arith.sitofp %51 : vector<1x512xi32> to vector<1x512xf32>
    %c-2_i32 = arith.constant -2 : i32
    %53 = vector.broadcast %c-2_i32 : i32 to vector<1x512xi32>
    %54 = arith.addi %30, %53 : vector<1x512xi32>
    %c0_i32_22 = arith.constant 0 : i32
    %55 = vector.broadcast %c0_i32_22 : i32 to vector<1x512xi32>
    %56 = arith.cmpi sge, %54, %55 : vector<1x512xi32>
    %c-2_i32_23 = arith.constant -2 : i32
    %57 = vector.broadcast %c-2_i32_23 : i32 to vector<1x512xi32>
    %58 = arith.addi %30, %57 : vector<1x512xi32>
    %c128_i32_24 = arith.constant 128 : i32
    %59 = vector.broadcast %c128_i32_24 : i32 to vector<1x512xi32>
    %60 = arith.cmpi slt, %58, %59 : vector<1x512xi32>
    %61 = arith.andi %56, %60 : vector<1x512xi1>
    %62 = arith.extui %61 : vector<1x512xi1> to vector<1x512xi32>
    %63 = arith.sitofp %62 : vector<1x512xi32> to vector<1x512xf32>
    %c2_i32 = arith.constant 2 : i32
    %64 = vector.broadcast %c2_i32 : i32 to vector<1x512xi32>
    %65 = arith.addi %30, %64 : vector<1x512xi32>
    %c0_i32_25 = arith.constant 0 : i32
    %66 = vector.broadcast %c0_i32_25 : i32 to vector<1x512xi32>
    %67 = arith.cmpi sge, %65, %66 : vector<1x512xi32>
    %c2_i32_26 = arith.constant 2 : i32
    %68 = vector.broadcast %c2_i32_26 : i32 to vector<1x512xi32>
    %69 = arith.addi %30, %68 : vector<1x512xi32>
    %c128_i32_27 = arith.constant 128 : i32
    %70 = vector.broadcast %c128_i32_27 : i32 to vector<1x512xi32>
    %71 = arith.cmpi slt, %69, %70 : vector<1x512xi32>
    %72 = arith.andi %67, %71 : vector<1x512xi1>
    %73 = arith.extui %72 : vector<1x512xi1> to vector<1x512xi32>
    %74 = arith.sitofp %73 : vector<1x512xi32> to vector<1x512xf32>
    %c-4_i32 = arith.constant -4 : i32
    %75 = vector.broadcast %c-4_i32 : i32 to vector<1x512xi32>
    %76 = arith.addi %30, %75 : vector<1x512xi32>
    %c0_i32_28 = arith.constant 0 : i32
    %77 = vector.broadcast %c0_i32_28 : i32 to vector<1x512xi32>
    %78 = arith.cmpi sge, %76, %77 : vector<1x512xi32>
    %c-4_i32_29 = arith.constant -4 : i32
    %79 = vector.broadcast %c-4_i32_29 : i32 to vector<1x512xi32>
    %80 = arith.addi %30, %79 : vector<1x512xi32>
    %c128_i32_30 = arith.constant 128 : i32
    %81 = vector.broadcast %c128_i32_30 : i32 to vector<1x512xi32>
    %82 = arith.cmpi slt, %80, %81 : vector<1x512xi32>
    %83 = arith.andi %78, %82 : vector<1x512xi1>
    %84 = arith.extui %83 : vector<1x512xi1> to vector<1x512xi32>
    %85 = arith.sitofp %84 : vector<1x512xi32> to vector<1x512xf32>
    %c4_i32 = arith.constant 4 : i32
    %86 = vector.broadcast %c4_i32 : i32 to vector<1x512xi32>
    %87 = arith.addi %30, %86 : vector<1x512xi32>
    %c0_i32_31 = arith.constant 0 : i32
    %88 = vector.broadcast %c0_i32_31 : i32 to vector<1x512xi32>
    %89 = arith.cmpi sge, %87, %88 : vector<1x512xi32>
    %c4_i32_32 = arith.constant 4 : i32
    %90 = vector.broadcast %c4_i32_32 : i32 to vector<1x512xi32>
    %91 = arith.addi %30, %90 : vector<1x512xi32>
    %c128_i32_33 = arith.constant 128 : i32
    %92 = vector.broadcast %c128_i32_33 : i32 to vector<1x512xi32>
    %93 = arith.cmpi slt, %91, %92 : vector<1x512xi32>
    %94 = arith.andi %89, %93 : vector<1x512xi1>
    %95 = arith.extui %94 : vector<1x512xi1> to vector<1x512xi32>
    %96 = arith.sitofp %95 : vector<1x512xi32> to vector<1x512xf32>
    %c0_34 = arith.constant 0 : index
    %c0_35 = arith.constant 0 : index
    %c0_36 = arith.constant 0 : index
    %97 = vector.load %arg4[%c0_34, %c0_35, %c0_36] : memref<3x32x1xf32, #tpu.memory_space<vmem>>, vector<1x32x1xf32>
    %98 = vector.shape_cast %97 : vector<1x32x1xf32> to vector<32x1xf32>
    %99 = vector.broadcast %98 : vector<32x1xf32> to vector<32x512xf32>
    %100 = arith.mulf %13, %99 : vector<32x512xf32>
    %c0_37 = arith.constant 0 : index
    %c0_38 = arith.constant 0 : index
    %c0_39 = arith.constant 0 : index
    %101 = vector.load %arg5[%c0_37, %c0_38, %c0_39] : memref<3x32x1xf32, #tpu.memory_space<vmem>>, vector<1x32x1xf32>
    %102 = vector.shape_cast %101 : vector<1x32x1xf32> to vector<32x1xf32>
    %103 = vector.broadcast %102 : vector<32x1xf32> to vector<32x512xf32>
    %104 = arith.addf %100, %103 : vector<32x512xf32>
    %cst_40 = arith.constant 0.000000e+00 : f32
    %105 = vector.broadcast %cst_40 : f32 to vector<32x512xf32>
    %106 = arith.maximumf %104, %105 : vector<32x512xf32>
    %c1_i32_41 = arith.constant 1 : i32
    %107 = tpu.dynamic_rotate %106 by %c1_i32_41 dim 1 : vector<32x512xf32>, i32 -> vector<32x512xf32>
    %108 = vector.broadcast %41 : vector<1x512xf32> to vector<32x512xf32>
    %109 = arith.mulf %107, %108 : vector<32x512xf32>
    %c511_i32 = arith.constant 511 : i32
    %110 = tpu.dynamic_rotate %106 by %c511_i32 dim 1 : vector<32x512xf32>, i32 -> vector<32x512xf32>
    %111 = vector.broadcast %52 : vector<1x512xf32> to vector<32x512xf32>
    %112 = arith.mulf %110, %111 : vector<32x512xf32>
    %113 = tpu.concatenate %109, %106, %112 in 0 : vector<32x512xf32>, vector<32x512xf32>, vector<32x512xf32> -> vector<96x512xf32>
    %c0_42 = arith.constant 0 : index
    %c0_43 = arith.constant 0 : index
    %c0_44 = arith.constant 0 : index
    %114 = vector.load %arg6[%c0_42, %c0_43, %c0_44] : memref<3x32x96xf32, #tpu.memory_space<vmem>>, vector<1x32x96xf32>
    %115 = vector.shape_cast %114 : vector<1x32x96xf32> to vector<32x96xf32>
    %cst_45 = arith.constant dense<0.000000e+00> : vector<32x512xf32>
    %116 = tpu.matmul %115, %113, %cst_45 {dimension_numbers = #tpu.dot_dimension_numbers<[1], [0], [0], [1], [0, 0, 1, 1], [], []>} : vector<32x96xf32>, vector<96x512xf32>, vector<32x512xf32> -> vector<32x512xf32>
    %c0_46 = arith.constant 0 : index
    %c0_47 = arith.constant 0 : index
    %c0_48 = arith.constant 0 : index
    %117 = vector.load %arg7[%c0_46, %c0_47, %c0_48] : memref<3x32x1xf32, #tpu.memory_space<vmem>>, vector<1x32x1xf32>
    %118 = vector.shape_cast %117 : vector<1x32x1xf32> to vector<32x1xf32>
    %119 = vector.broadcast %118 : vector<32x1xf32> to vector<32x512xf32>
    %120 = arith.mulf %116, %119 : vector<32x512xf32>
    %c0_49 = arith.constant 0 : index
    %c0_50 = arith.constant 0 : index
    %c0_51 = arith.constant 0 : index
    %121 = vector.load %arg8[%c0_49, %c0_50, %c0_51] : memref<3x32x1xf32, #tpu.memory_space<vmem>>, vector<1x32x1xf32>
    %122 = vector.shape_cast %121 : vector<1x32x1xf32> to vector<32x1xf32>
    %123 = vector.broadcast %122 : vector<32x1xf32> to vector<32x512xf32>
    %124 = arith.addf %120, %123 : vector<32x512xf32>
    %cst_52 = arith.constant 0.000000e+00 : f32
    %125 = vector.broadcast %cst_52 : f32 to vector<32x512xf32>
    %126 = arith.maximumf %124, %125 : vector<32x512xf32>
    %c0_53 = arith.constant 0 : index
    %c0_54 = arith.constant 0 : index
    %c0_55 = arith.constant 0 : index
    %127 = vector.load %arg9[%c0_53, %c0_54, %c0_55] : memref<3x32x32xf32, #tpu.memory_space<vmem>>, vector<1x32x32xf32>
    %128 = vector.shape_cast %127 : vector<1x32x32xf32> to vector<32x32xf32>
    %cst_56 = arith.constant dense<0.000000e+00> : vector<32x512xf32>
    %129 = tpu.matmul %128, %126, %cst_56 {dimension_numbers = #tpu.dot_dimension_numbers<[1], [0], [0], [1], [0, 0, 1, 1], [], []>} : vector<32x32xf32>, vector<32x512xf32>, vector<32x512xf32> -> vector<32x512xf32>
    %c0_57 = arith.constant 0 : index
    %c0_58 = arith.constant 0 : index
    %c0_59 = arith.constant 0 : index
    %130 = vector.load %arg10[%c0_57, %c0_58, %c0_59] : memref<3x32x1xf32, #tpu.memory_space<vmem>>, vector<1x32x1xf32>
    %131 = vector.shape_cast %130 : vector<1x32x1xf32> to vector<32x1xf32>
    %132 = vector.broadcast %131 : vector<32x1xf32> to vector<32x512xf32>
    %133 = arith.addf %129, %132 : vector<32x512xf32>
    %134 = arith.addf %13, %133 : vector<32x512xf32>
    %c1_60 = arith.constant 1 : index
    %c0_61 = arith.constant 0 : index
    %c0_62 = arith.constant 0 : index
    %135 = vector.load %arg4[%c1_60, %c0_61, %c0_62] : memref<3x32x1xf32, #tpu.memory_space<vmem>>, vector<1x32x1xf32>
    %136 = vector.shape_cast %135 : vector<1x32x1xf32> to vector<32x1xf32>
    %137 = vector.broadcast %136 : vector<32x1xf32> to vector<32x512xf32>
    %138 = arith.mulf %133, %137 : vector<32x512xf32>
    %c1_63 = arith.constant 1 : index
    %c0_64 = arith.constant 0 : index
    %c0_65 = arith.constant 0 : index
    %139 = vector.load %arg5[%c1_63, %c0_64, %c0_65] : memref<3x32x1xf32, #tpu.memory_space<vmem>>, vector<1x32x1xf32>
    %140 = vector.shape_cast %139 : vector<1x32x1xf32> to vector<32x1xf32>
    %141 = vector.broadcast %140 : vector<32x1xf32> to vector<32x512xf32>
    %142 = arith.addf %138, %141 : vector<32x512xf32>
    %cst_66 = arith.constant 0.000000e+00 : f32
    %143 = vector.broadcast %cst_66 : f32 to vector<32x512xf32>
    %144 = arith.maximumf %142, %143 : vector<32x512xf32>
    %c2_i32_67 = arith.constant 2 : i32
    %145 = tpu.dynamic_rotate %144 by %c2_i32_67 dim 1 : vector<32x512xf32>, i32 -> vector<32x512xf32>
    %146 = vector.broadcast %63 : vector<1x512xf32> to vector<32x512xf32>
    %147 = arith.mulf %145, %146 : vector<32x512xf32>
    %c510_i32 = arith.constant 510 : i32
    %148 = tpu.dynamic_rotate %144 by %c510_i32 dim 1 : vector<32x512xf32>, i32 -> vector<32x512xf32>
    %149 = vector.broadcast %74 : vector<1x512xf32> to vector<32x512xf32>
    %150 = arith.mulf %148, %149 : vector<32x512xf32>
    %151 = tpu.concatenate %147, %144, %150 in 0 : vector<32x512xf32>, vector<32x512xf32>, vector<32x512xf32> -> vector<96x512xf32>
    %c1_68 = arith.constant 1 : index
    %c0_69 = arith.constant 0 : index
    %c0_70 = arith.constant 0 : index
    %152 = vector.load %arg6[%c1_68, %c0_69, %c0_70] : memref<3x32x96xf32, #tpu.memory_space<vmem>>, vector<1x32x96xf32>
    %153 = vector.shape_cast %152 : vector<1x32x96xf32> to vector<32x96xf32>
    %cst_71 = arith.constant dense<0.000000e+00> : vector<32x512xf32>
    %154 = tpu.matmul %153, %151, %cst_71 {dimension_numbers = #tpu.dot_dimension_numbers<[1], [0], [0], [1], [0, 0, 1, 1], [], []>} : vector<32x96xf32>, vector<96x512xf32>, vector<32x512xf32> -> vector<32x512xf32>
    %c1_72 = arith.constant 1 : index
    %c0_73 = arith.constant 0 : index
    %c0_74 = arith.constant 0 : index
    %155 = vector.load %arg7[%c1_72, %c0_73, %c0_74] : memref<3x32x1xf32, #tpu.memory_space<vmem>>, vector<1x32x1xf32>
    %156 = vector.shape_cast %155 : vector<1x32x1xf32> to vector<32x1xf32>
    %157 = vector.broadcast %156 : vector<32x1xf32> to vector<32x512xf32>
    %158 = arith.mulf %154, %157 : vector<32x512xf32>
    %c1_75 = arith.constant 1 : index
    %c0_76 = arith.constant 0 : index
    %c0_77 = arith.constant 0 : index
    %159 = vector.load %arg8[%c1_75, %c0_76, %c0_77] : memref<3x32x1xf32, #tpu.memory_space<vmem>>, vector<1x32x1xf32>
    %160 = vector.shape_cast %159 : vector<1x32x1xf32> to vector<32x1xf32>
    %161 = vector.broadcast %160 : vector<32x1xf32> to vector<32x512xf32>
    %162 = arith.addf %158, %161 : vector<32x512xf32>
    %cst_78 = arith.constant 0.000000e+00 : f32
    %163 = vector.broadcast %cst_78 : f32 to vector<32x512xf32>
    %164 = arith.maximumf %162, %163 : vector<32x512xf32>
    %c1_79 = arith.constant 1 : index
    %c0_80 = arith.constant 0 : index
    %c0_81 = arith.constant 0 : index
    %165 = vector.load %arg9[%c1_79, %c0_80, %c0_81] : memref<3x32x32xf32, #tpu.memory_space<vmem>>, vector<1x32x32xf32>
    %166 = vector.shape_cast %165 : vector<1x32x32xf32> to vector<32x32xf32>
    %cst_82 = arith.constant dense<0.000000e+00> : vector<32x512xf32>
    %167 = tpu.matmul %166, %164, %cst_82 {dimension_numbers = #tpu.dot_dimension_numbers<[1], [0], [0], [1], [0, 0, 1, 1], [], []>} : vector<32x32xf32>, vector<32x512xf32>, vector<32x512xf32> -> vector<32x512xf32>
    %c1_83 = arith.constant 1 : index
    %c0_84 = arith.constant 0 : index
    %c0_85 = arith.constant 0 : index
    %168 = vector.load %arg10[%c1_83, %c0_84, %c0_85] : memref<3x32x1xf32, #tpu.memory_space<vmem>>, vector<1x32x1xf32>
    %169 = vector.shape_cast %168 : vector<1x32x1xf32> to vector<32x1xf32>
    %170 = vector.broadcast %169 : vector<32x1xf32> to vector<32x512xf32>
    %171 = arith.addf %167, %170 : vector<32x512xf32>
    %172 = arith.addf %134, %171 : vector<32x512xf32>
    %c2_86 = arith.constant 2 : index
    %c0_87 = arith.constant 0 : index
    %c0_88 = arith.constant 0 : index
    %173 = vector.load %arg4[%c2_86, %c0_87, %c0_88] : memref<3x32x1xf32, #tpu.memory_space<vmem>>, vector<1x32x1xf32>
    %174 = vector.shape_cast %173 : vector<1x32x1xf32> to vector<32x1xf32>
    %175 = vector.broadcast %174 : vector<32x1xf32> to vector<32x512xf32>
    %176 = arith.mulf %171, %175 : vector<32x512xf32>
    %c2_89 = arith.constant 2 : index
    %c0_90 = arith.constant 0 : index
    %c0_91 = arith.constant 0 : index
    %177 = vector.load %arg5[%c2_89, %c0_90, %c0_91] : memref<3x32x1xf32, #tpu.memory_space<vmem>>, vector<1x32x1xf32>
    %178 = vector.shape_cast %177 : vector<1x32x1xf32> to vector<32x1xf32>
    %179 = vector.broadcast %178 : vector<32x1xf32> to vector<32x512xf32>
    %180 = arith.addf %176, %179 : vector<32x512xf32>
    %cst_92 = arith.constant 0.000000e+00 : f32
    %181 = vector.broadcast %cst_92 : f32 to vector<32x512xf32>
    %182 = arith.maximumf %180, %181 : vector<32x512xf32>
    %c4_i32_93 = arith.constant 4 : i32
    %183 = tpu.dynamic_rotate %182 by %c4_i32_93 dim 1 : vector<32x512xf32>, i32 -> vector<32x512xf32>
    %184 = vector.broadcast %85 : vector<1x512xf32> to vector<32x512xf32>
    %185 = arith.mulf %183, %184 : vector<32x512xf32>
    %c508_i32 = arith.constant 508 : i32
    %186 = tpu.dynamic_rotate %182 by %c508_i32 dim 1 : vector<32x512xf32>, i32 -> vector<32x512xf32>
    %187 = vector.broadcast %96 : vector<1x512xf32> to vector<32x512xf32>
    %188 = arith.mulf %186, %187 : vector<32x512xf32>
    %189 = tpu.concatenate %185, %182, %188 in 0 : vector<32x512xf32>, vector<32x512xf32>, vector<32x512xf32> -> vector<96x512xf32>
    %c2_94 = arith.constant 2 : index
    %c0_95 = arith.constant 0 : index
    %c0_96 = arith.constant 0 : index
    %190 = vector.load %arg6[%c2_94, %c0_95, %c0_96] : memref<3x32x96xf32, #tpu.memory_space<vmem>>, vector<1x32x96xf32>
    %191 = vector.shape_cast %190 : vector<1x32x96xf32> to vector<32x96xf32>
    %cst_97 = arith.constant dense<0.000000e+00> : vector<32x512xf32>
    %192 = tpu.matmul %191, %189, %cst_97 {dimension_numbers = #tpu.dot_dimension_numbers<[1], [0], [0], [1], [0, 0, 1, 1], [], []>} : vector<32x96xf32>, vector<96x512xf32>, vector<32x512xf32> -> vector<32x512xf32>
    %c2_98 = arith.constant 2 : index
    %c0_99 = arith.constant 0 : index
    %c0_100 = arith.constant 0 : index
    %193 = vector.load %arg7[%c2_98, %c0_99, %c0_100] : memref<3x32x1xf32, #tpu.memory_space<vmem>>, vector<1x32x1xf32>
    %194 = vector.shape_cast %193 : vector<1x32x1xf32> to vector<32x1xf32>
    %195 = vector.broadcast %194 : vector<32x1xf32> to vector<32x512xf32>
    %196 = arith.mulf %192, %195 : vector<32x512xf32>
    %c2_101 = arith.constant 2 : index
    %c0_102 = arith.constant 0 : index
    %c0_103 = arith.constant 0 : index
    %197 = vector.load %arg8[%c2_101, %c0_102, %c0_103] : memref<3x32x1xf32, #tpu.memory_space<vmem>>, vector<1x32x1xf32>
    %198 = vector.shape_cast %197 : vector<1x32x1xf32> to vector<32x1xf32>
    %199 = vector.broadcast %198 : vector<32x1xf32> to vector<32x512xf32>
    %200 = arith.addf %196, %199 : vector<32x512xf32>
    %cst_104 = arith.constant 0.000000e+00 : f32
    %201 = vector.broadcast %cst_104 : f32 to vector<32x512xf32>
    %202 = arith.maximumf %200, %201 : vector<32x512xf32>
    %c2_105 = arith.constant 2 : index
    %c0_106 = arith.constant 0 : index
    %c0_107 = arith.constant 0 : index
    %203 = vector.load %arg9[%c2_105, %c0_106, %c0_107] : memref<3x32x32xf32, #tpu.memory_space<vmem>>, vector<1x32x32xf32>
    %204 = vector.shape_cast %203 : vector<1x32x32xf32> to vector<32x32xf32>
    %cst_108 = arith.constant dense<0.000000e+00> : vector<32x512xf32>
    %205 = tpu.matmul %204, %202, %cst_108 {dimension_numbers = #tpu.dot_dimension_numbers<[1], [0], [0], [1], [0, 0, 1, 1], [], []>} : vector<32x32xf32>, vector<32x512xf32>, vector<32x512xf32> -> vector<32x512xf32>
    %c2_109 = arith.constant 2 : index
    %c0_110 = arith.constant 0 : index
    %c0_111 = arith.constant 0 : index
    %206 = vector.load %arg10[%c2_109, %c0_110, %c0_111] : memref<3x32x1xf32, #tpu.memory_space<vmem>>, vector<1x32x1xf32>
    %207 = vector.shape_cast %206 : vector<1x32x1xf32> to vector<32x1xf32>
    %208 = vector.broadcast %207 : vector<32x1xf32> to vector<32x512xf32>
    %209 = arith.addf %205, %208 : vector<32x512xf32>
    %210 = arith.addf %172, %209 : vector<32x512xf32>
    %211 = vector.extract_strided_slice %210 {offsets = [0, 0], sizes = [32, 128], strides = [1, 1]} : vector<32x512xf32> to vector<32x128xf32>
    %c0_112 = arith.constant 0 : index
    %c0_113 = arith.constant 0 : index
    %c0_114 = arith.constant 0 : index
    %212 = vector.load %arg11[%c0_112, %c0_113, %c0_114] : memref<4x32x128xf32, #tpu.memory_space<vmem>>, vector<1x32x128xf32>
    %213 = vector.shape_cast %212 : vector<1x32x128xf32> to vector<32x128xf32>
    %214 = vector.shape_cast %211 : vector<32x128xf32> to vector<1x32x128xf32>
    tpu.vector_store %arg11[%c0_112, %c0_113, %c0_114], %214 {strides = array<i32>} : memref<4x32x128xf32, #tpu.memory_space<vmem>>, vector<1x32x128xf32>,
    %215 = vector.extract_strided_slice %210 {offsets = [0, 128], sizes = [32, 128], strides = [1, 1]} : vector<32x512xf32> to vector<32x128xf32>
    %c1_115 = arith.constant 1 : index
    %c0_116 = arith.constant 0 : index
    %c0_117 = arith.constant 0 : index
    %216 = vector.load %arg11[%c1_115, %c0_116, %c0_117] : memref<4x32x128xf32, #tpu.memory_space<vmem>>, vector<1x32x128xf32>
    %217 = vector.shape_cast %216 : vector<1x32x128xf32> to vector<32x128xf32>
    %218 = vector.shape_cast %215 : vector<32x128xf32> to vector<1x32x128xf32>
    tpu.vector_store %arg11[%c1_115, %c0_116, %c0_117], %218 {strides = array<i32>} : memref<4x32x128xf32, #tpu.memory_space<vmem>>, vector<1x32x128xf32>,
    %219 = vector.extract_strided_slice %210 {offsets = [0, 256], sizes = [32, 128], strides = [1, 1]} : vector<32x512xf32> to vector<32x128xf32>
    %c2_118 = arith.constant 2 : index
    %c0_119 = arith.constant 0 : index
    %c0_120 = arith.constant 0 : index
    %220 = vector.load %arg11[%c2_118, %c0_119, %c0_120] : memref<4x32x128xf32, #tpu.memory_space<vmem>>, vector<1x32x128xf32>
    %221 = vector.shape_cast %220 : vector<1x32x128xf32> to vector<32x128xf32>
    %222 = vector.shape_cast %219 : vector<32x128xf32> to vector<1x32x128xf32>
    tpu.vector_store %arg11[%c2_118, %c0_119, %c0_120], %222 {strides = array<i32>} : memref<4x32x128xf32, #tpu.memory_space<vmem>>, vector<1x32x128xf32>,
    %223 = vector.extract_strided_slice %210 {offsets = [0, 384], sizes = [32, 128], strides = [1, 1]} : vector<32x512xf32> to vector<32x128xf32>
    %c3_121 = arith.constant 3 : index
    %c0_122 = arith.constant 0 : index
    %c0_123 = arith.constant 0 : index
    %224 = vector.load %arg11[%c3_121, %c0_122, %c0_123] : memref<4x32x128xf32, #tpu.memory_space<vmem>>, vector<1x32x128xf32>
    %225 = vector.shape_cast %224 : vector<1x32x128xf32> to vector<32x128xf32>
    %226 = vector.shape_cast %223 : vector<32x128xf32> to vector<1x32x128xf32>
    tpu.vector_store %arg11[%c3_121, %c0_122, %c0_123], %226 {strides = array<i32>} : memref<4x32x128xf32, #tpu.memory_space<vmem>>, vector<1x32x128xf32>,
    return
  }
  func.func @transform_0(%arg0: i32) -> (i32, i32, i32) {
    %c0_i32 = arith.constant 0 : i32
    %c0_i32_0 = arith.constant 0 : i32
    %c0_i32_1 = arith.constant 0 : i32
    return %arg0, %c0_i32, %c0_i32_0 : i32, i32, i32
  }
  func.func @transform_1(%arg0: i32) -> (i32, i32) {
    %c0_i32 = arith.constant 0 : i32
    %c0_i32_0 = arith.constant 0 : i32
    %c0_i32_1 = arith.constant 0 : i32
    return %c0_i32, %c0_i32_0 : i32, i32
  }
  func.func @transform_2(%arg0: i32) -> (i32, i32) {
    %c0_i32 = arith.constant 0 : i32
    %c0_i32_0 = arith.constant 0 : i32
    %c0_i32_1 = arith.constant 0 : i32
    return %c0_i32, %c0_i32_0 : i32, i32
  }
  func.func @transform_3(%arg0: i32) -> (i32, i32, i32) {
    %c0_i32 = arith.constant 0 : i32
    %c0_i32_0 = arith.constant 0 : i32
    %c0_i32_1 = arith.constant 0 : i32
    %c0_i32_2 = arith.constant 0 : i32
    return %c0_i32, %c0_i32_0, %c0_i32_1 : i32, i32, i32
  }
  func.func @transform_4(%arg0: i32) -> (i32, i32, i32) {
    %c0_i32 = arith.constant 0 : i32
    %c0_i32_0 = arith.constant 0 : i32
    %c0_i32_1 = arith.constant 0 : i32
    %c0_i32_2 = arith.constant 0 : i32
    return %c0_i32, %c0_i32_0, %c0_i32_1 : i32, i32, i32
  }
  func.func @transform_5(%arg0: i32) -> (i32, i32, i32) {
    %c0_i32 = arith.constant 0 : i32
    %c0_i32_0 = arith.constant 0 : i32
    %c0_i32_1 = arith.constant 0 : i32
    %c0_i32_2 = arith.constant 0 : i32
    return %c0_i32, %c0_i32_0, %c0_i32_1 : i32, i32, i32
  }
  func.func @transform_6(%arg0: i32) -> (i32, i32, i32) {
    %c0_i32 = arith.constant 0 : i32
    %c0_i32_0 = arith.constant 0 : i32
    %c0_i32_1 = arith.constant 0 : i32
    %c0_i32_2 = arith.constant 0 : i32
    return %c0_i32, %c0_i32_0, %c0_i32_1 : i32, i32, i32
  }
  func.func @transform_7(%arg0: i32) -> (i32, i32, i32) {
    %c0_i32 = arith.constant 0 : i32
    %c0_i32_0 = arith.constant 0 : i32
    %c0_i32_1 = arith.constant 0 : i32
    %c0_i32_2 = arith.constant 0 : i32
    return %c0_i32, %c0_i32_0, %c0_i32_1 : i32, i32, i32
  }
  func.func @transform_8(%arg0: i32) -> (i32, i32, i32) {
    %c0_i32 = arith.constant 0 : i32
    %c0_i32_0 = arith.constant 0 : i32
    %c0_i32_1 = arith.constant 0 : i32
    %c0_i32_2 = arith.constant 0 : i32
    return %c0_i32, %c0_i32_0, %c0_i32_1 : i32, i32, i32
  }
  func.func @transform_9(%arg0: i32) -> (i32, i32, i32) {
    %c0_i32 = arith.constant 0 : i32
    %c0_i32_0 = arith.constant 0 : i32
    %c0_i32_1 = arith.constant 0 : i32
    %c0_i32_2 = arith.constant 0 : i32
    return %c0_i32, %c0_i32_0, %c0_i32_1 : i32, i32, i32
  }
  func.func @transform_10(%arg0: i32) -> (i32, i32, i32) {
    %c0_i32 = arith.constant 0 : i32
    %c0_i32_0 = arith.constant 0 : i32
    %c0_i32_1 = arith.constant 0 : i32
    return %arg0, %c0_i32, %c0_i32_0 : i32, i32, i32
  }
}

</mosaic_0001>

<bundles_post_ra>
// kernel: tpu_custom_call.1
= control target key start
LH: loop header
LB: loop body
LE: loop exit
PB: predicated region body
PF: predicated region fallthrough
CT: control target
= control target key end

     0   :  { %vm84_vm0 = vcmask 1043456   ;;  %vm71_vm1 = vcmask 31744   ;;  %v4633_v5 = vmov 0.0   ;;  %v3146_v9 = vmov 0   ;;  %s4620_s0 = inlined_call_operand.vmem [shape: f32[4,4,128], index: 0, kind: input, shape index: {}]   ;;  %s4621_s1 = inlined_call_operand.vmem [shape: f32[32,4], index: 1, kind: input, shape index: {}]   ;;  %s4622_s2 = inlined_call_operand.vmem [shape: f32[32,1], index: 2, kind: input, shape index: {}]   ;;  %s4623_s3 = inlined_call_operand.vmem [shape: f32[3,32,1], index: 3, kind: input, shape index: {}]   ;;  %s4624_s4 = inlined_call_operand.vmem [shape: f32[3,32,1], index: 4, kind: input, shape index: {}]   ;;  %s4625_s5 = inlined_call_operand.vmem [shape: f32[3,32,96], index: 5, kind: input, shape index: {}]   ;;  %s4626_s6 = inlined_call_operand.vmem [shape: f32[3,32,1], index: 6, kind: input, shape index: {}]   ;;  %s4627_s7 = inlined_call_operand.vmem [shape: f32[3,32,1], index: 7, kind: input, shape index: {}]   ;;  %s4628_s8 = inlined_call_operand.vmem [shape: f32[3,32,32], index: 8, kind: input, shape index: {}]   ;;  %s4629_s9 = inlined_call_operand.vmem [shape: f32[3,32,1], index: 9, kind: input, shape index: {}]   ;;  %s4630_s10 = inlined_call_operand.hbm [shape: f32[4,32,128], index: 10, kind: output, shape index: {}]  }
   0x1   :  { %v2773_v0 = vld [vmem:[%s4620_s0 + $0x4] sm:$0xf]  ;;  %v2775_v1 = vld [vmem:[%s4620_s0 + $0xc] sm:$0xf]  ;;  %v36_v2 = vld [vmem:[%s4620_s0] sm:$0xf]  ;;  %161 = vmatprep.mubr.f32.mxu0 %v4633_v5  ;;  %250 = vmatprep.mubr.f32.mxu1 %v4633_v5 }
   0x2   :  { %2776 = vmatprep.subr.msk.mxu0 %vm84_vm0, %v2773_v0  ;;  %2782 = vmatprep.subr.msk.mxu1 %vm84_vm0, %v2775_v1  ;;  %v2774_v3 = vld [vmem:[%s4620_s0 + $0x8] sm:$0xf]  ;;  %v43_v4 = vld [vmem:[%s4621_s1] sm:$0xff] }
   0x3   :  { %2777 = vmatpush1.msk.msra.mxu0 %vm84_vm0, %v36_v2  ;;  %2783 = vmatpush1.msk.msra.mxu1 %vm84_vm0, %v2774_v3  ;;  %v472_v6 = vld [vmem:[%s4623_s3] sm:$0xff]  ;;  %v44_v8 = vld [vmem:[%s4621_s1 + $0x8] sm:$0xff] }
   0x4   :  { %2778 = vmatmul.mubr.msk.f32.vlgmr.msra.gmra.mrb[0].mxu0 %vm71_vm1, %v43_v4  ;;  %2784 = vmatmul.mubr.msk.f32.vlgmr.msra.gmra.mrb[0].mxu1 %vm71_vm1, %v43_v4  ;;  %v47_v7 = vld [vmem:[%s4622_s2] sm:$0xff] }
   0x5   :  { %167 = vmatprep.mubr.f32.mxu0 %v4633_v5  ;;  %256 = vmatprep.mubr.f32.mxu1 %v4633_v5 }
   0x6   :  { %3120 = vset.pattern.permute.xlu1 %v3146_v9  ;;  %3119 = vset.pattern.permute.xlu0 %v3146_v9 }
   0x7   :  { %478 = vperm.xlu1 %3120, %v472_v6   ;;  %53 = vperm.xlu0 %3119, %v47_v7  }
   0x8   :  { %15 = vsyncpa [#allocation3], 0  ;;  %2779 = vmatmul.mubr.msk.f32.gmra.mrb[2].mxu0 %vm71_vm1, %v44_v8  ;;  %2785 = vmatmul.mubr.msk.f32.gmra.mrb[2].mxu1 %vm71_vm1, %v44_v8  ;;  %v473_v10 = vld [vmem:[%s4623_s3 + $0x8] sm:$0xff]  ;;  %v45_v12 = vld [vmem:[%s4621_s1 + $0x10] sm:$0xff]  ;;  %s3147_s29 = smov 1   ;;  %s3148_s30 = smov 127  }
   0x9   :  { %v48_v11 = vld [vmem:[%s4622_s2 + $0x8] sm:$0xff]  ;;  %173 = vmatprep.mubr.f32.mxu0 %v4633_v5  ;;  %262 = vmatprep.mubr.f32.mxu1 %v4633_v5  ;;  %v50_v13 = vld [vmem:[%s4622_s2 + $0x18] sm:$0xff]  ;;  %v49_v14 = vld [vmem:[%s4622_s2 + $0x10] sm:$0xff]  ;;  %vm702_vm12 = vcmask 785408   ;;  %vm1017_vm13 = vcmask 261120   ;;  %s3149_s21 = smov 2  }
   0xa   :  { %v46_v15 = vld [vmem:[%s4621_s1 + $0x18] sm:$0xff]  ;;  %v513_v16 = vld [vmem:[%s4624_s4 + $0x8] sm:$0xff]  ;;  %v512_v17 = vld [vmem:[%s4624_s4] sm:$0xff]  ;;  %s3150_s22 = smov 126   ;;  %s3151_s28 = smov 4  }
   0xb   :  { %483 = vperm.xlu1 %3120, %v473_v10   ;;  %58 = vperm.xlu0 %3119, %v48_v11   ;;  %v475_v18 = vld [vmem:[%s4623_s3 + $0x18] sm:$0xff]  ;;  %v474_v19 = vld [vmem:[%s4623_s3 + $0x10] sm:$0xff] }
   0xc   :  { %2780 = vmatmul.mubr.msk.f32.gmra.mrb[4].mxu0 %vm71_vm1, %v45_v12  ;;  %2786 = vmatmul.mubr.msk.f32.gmra.mrb[4].mxu1 %vm71_vm1, %v45_v12  ;;  %v515_v20 = vld [vmem:[%s4624_s4 + $0x18] sm:$0xff]  ;;  %v514_v21 = vld [vmem:[%s4624_s4 + $0x10] sm:$0xff] }
   0xd   :  { %179 = vmatprep.mubr.f32.mxu0 %v4633_v5  ;;  %268 = vmatprep.mubr.f32.mxu1 %v4633_v5 }
   0xf   :  { %68 = vperm.xlu1 %3120, %v50_v13   ;;  %63 = vperm.xlu0 %3119, %v49_v14  }
  0x10   :  { %2781 = vmatmul.mubr.msk.f32.gmra.mrb[6].mxu0 %vm71_vm1, %v46_v15  ;;  %2787 = vmatmul.mubr.msk.f32.gmra.mrb[6].mxu1 %vm71_vm1, %v46_v15 }
  0x11   :  { %779 = vmatprep.mubr.f32.mxu0 %v4633_v5  ;;  %868 = vmatprep.mubr.f32.mxu1 %v4633_v5 }
  0x13   :  { %523 = vperm.xlu1 %3120, %v513_v16   ;;  %518 = vperm.xlu0 %3119, %v512_v17  }
  0x17   :  { %493 = vperm.xlu1 %3120, %v475_v18   ;;  %488 = vperm.xlu0 %3119, %v474_v19  }
  0x1b   :  { %533 = vperm.xlu1 %3120, %v515_v20   ;;  %528 = vperm.xlu0 %3119, %v514_v21  }
  0x86   :  { %v3289_v22 = vpop.permute.xlu1 %478  ;;  %v54_v23 = vpop.permute.xlu0 %53 }
  0x8a   :  { %v484_v24 = vpop.permute.xlu1 %483  ;;  %v59_v25 = vpop.permute.xlu0 %58 }
  0x8e   :  { %v69_v26 = vpop.permute.xlu1 %68  ;;  %v64_v27 = vpop.permute.xlu0 %63 }
  0x92   :  { %v3295_v34 = vpop.permute.xlu1 %523  ;;  %v3297_v35 = vpop.permute.xlu0 %518 }
  0x96   :  { %v494_v56 = vpop.permute.xlu1 %493  ;;  %v489_v8 = vpop.permute.xlu0 %488 }
  0xd7   :  { %v163_v28 = vpop.f32.mrb[0].mxu0  ;;  %v252_v29 = vpop.f32.mrb[0].mxu1 }
  0xd8   :  { %v3291_v30 = vadd.f32 %v163_v28, %v54_v23  ;;  %v3293_v31 = vadd.f32 %v252_v29, %v54_v23  ;;  %v165_v32 = vpop.f32.mrb[1].mxu0  ;;  %v254_v33 = vpop.f32.mrb[1].mxu1 }
  0xd9   :  { %v3318_v55 = vadd.f32 %v165_v32, %v54_v23  ;;  %v3327_v61 = vadd.f32 %v254_v33, %v54_v23  ;;  %v534_v23 = vpop.permute.xlu1 %533  ;;  %v529_v32 = vpop.permute.xlu0 %528 }
  0xda   :  { %v496_v36 = vmul.f32 %v3289_v22, %v3291_v30  ;;  %v498_v37 = vmul.f32 %v3289_v22, %v3293_v31 }
  0xdb   :  { %v169_v38 = vpop.f32.mrb[2].mxu0  ;;  %v258_v39 = vpop.f32.mrb[2].mxu1  ;;  %v497_v13 = vmul.f32 %v3289_v22, %v3318_v55  ;;  %v499_v20 = vmul.f32 %v3289_v22, %v3327_v61 }
  0xdc   :  { %v3303_v40 = vadd.f32 %v169_v38, %v59_v25  ;;  %v3305_v41 = vadd.f32 %v258_v39, %v59_v25  ;;  %v171_v42 = vpop.f32.mrb[3].mxu0  ;;  %v260_v43 = vpop.f32.mrb[3].mxu1  ;;  %v536_v44 = vadd.f32 %v3297_v35, %v496_v36  ;;  %v538_v48 = vadd.f32 %v3297_v35, %v498_v37 }
  0xdd   :  { %v3313_v49 = vadd.f32 %v171_v42, %v59_v25  ;;  %v3320_v57 = vadd.f32 %v260_v43, %v59_v25  ;;  %v537_v22 = vadd.f32 %v3297_v35, %v497_v13  ;;  %v539_v38 = vadd.f32 %v3297_v35, %v499_v20  ;;  %v895_v20 = vld [vmem:[%s4626_s6 + $0x10] sm:$0xff] }
  0xde   :  { %4658 = vst [vmem:[#allocation5_spill] sm:$0xff] %v3305_v41  ;;  %v500_v45 = vmul.f32 %v484_v24, %v3303_v40  ;;  %v502_v46 = vmul.f32 %v484_v24, %v3305_v41  ;;  %v3310_v47 = vmax.f32 %v536_v44, 0.0  ;;  %v3324_v59 = vmax.f32 %v538_v48, 0.0 }
  0xdf   :  { %4659 = vst [vmem:[#allocation6_spill] sm:$0xff] %v3313_v49  ;;  %v175_v50 = vpop.f32.mrb[4].mxu0  ;;  %v264_v51 = vpop.f32.mrb[4].mxu1  ;;  %4660 = vst [vmem:[#allocation7_spill] sm:$0xff] %v3320_v57  ;;  %v501_v62 = vmul.f32 %v484_v24, %v3313_v49  ;;  %v503_v14 = vmul.f32 %v484_v24, %v3320_v57  ;;  %v3395_v35 = vmax.f32 %v539_v38, 0.0  ;;  %v2834_v38 = vld [vmem:[%s4624_s4 + $0x30] sm:$0xff] }
  0xe0   :  { %v177_v52 = vpop.f32.mrb[5].mxu0  ;;  %v266_v53 = vpop.f32.mrb[5].mxu1  ;;  %568 = vrot.lane.b32.xlu0 %v3310_v47, %s3147_s29  ;;  %v540_v54 = vadd.f32 %v3295_v34, %v500_v45  ;;  %v542_v60 = vadd.f32 %v3295_v34, %v502_v46  ;;  %v3330_v63 = vadd.f32 %v175_v50, %v64_v27  ;;  %v3342_v9 = vadd.f32 %v264_v51, %v64_v27 }
  0xe1   :  { %v3332_v2 = vadd.f32 %v177_v52, %v64_v27  ;;  %v3344_v10 = vadd.f32 %v266_v53, %v64_v27  ;;  %v541_v27 = vadd.f32 %v3295_v34, %v501_v62  ;;  %v543_v28 = vadd.f32 %v3295_v34, %v503_v14 }
  0xe2   :  { %v3322_v58 = vmax.f32 %v540_v54, 0.0  ;;  %4661 = vst [vmem:[#allocation8_spill] sm:$0xff] %v3330_v63  ;;  %4665 = vst [vmem:[#allocation12_spill] sm:$0xff] %v3342_v9  ;;  %v3353_v15 = vmax.f32 %v542_v60, 0.0  ;;  %v504_v24 = vmul.f32 %v489_v8, %v3330_v63  ;;  %v506_v25 = vmul.f32 %v489_v8, %v3342_v9 }
  0xe3   :  { %v181_v0 = vpop.f32.mrb[6].mxu0  ;;  %v270_v1 = vpop.f32.mrb[6].mxu1  ;;  %4662 = vst [vmem:[#allocation9_spill] sm:$0xff] %v3332_v2  ;;  %4666 = vst [vmem:[#allocation13_spill] sm:$0xff] %v3344_v10  ;;  %v505_v21 = vmul.f32 %v489_v8, %v3332_v2  ;;  %v3377_v42 = vmax.f32 %v541_v27, 0.0  ;;  %v3379_v34 = vmax.f32 %v537_v22, 0.0 }
  0xe4   :  { %v3334_v3 = vadd.f32 %v181_v0, %v69_v26  ;;  %v3336_v4 = vadd.f32 %v270_v1, %v69_v26  ;;  %v183_v6 = vpop.f32.mrb[7].mxu0  ;;  %v272_v7 = vpop.f32.mrb[7].mxu1  ;;  %570 = vrot.lane.b32.xlu1 %v3322_v58, %s3147_s29  ;;  %584 = vrot.lane.b32.xlu0 %v3324_v59, %s3147_s29  ;;  %v544_v43 = vadd.f32 %v529_v32, %v504_v24  ;;  %v3381_v46 = vmax.f32 %v543_v28, 0.0  ;;  %v936_v24 = vld [vmem:[%s4627_s7 + $0x18] sm:$0xff]  ;;  %v2828_v27 = vld [vmem:[%s4623_s3 + $0x20] sm:$0xff] }
  0xe5   :  { %v3346_v11 = vadd.f32 %v183_v6, %v69_v26  ;;  %v3348_v12 = vadd.f32 %v272_v7, %v69_v26  ;;  %v507_v26 = vmul.f32 %v489_v8, %v3344_v10  ;;  %v545_v39 = vadd.f32 %v529_v32, %v505_v21  ;;  %v896_v21 = vld [vmem:[%s4626_s6 + $0x18] sm:$0xff]  ;;  %v2829_v22 = vld [vmem:[%s4623_s3 + $0x28] sm:$0xff]  ;;  %v995_v28 = vld [vmem:[%s4629_s9 + $0x10] sm:$0xff] }
  0xe6   :  { %4663 = vst [vmem:[#allocation10_spill] sm:$0xff] %v3334_v3  ;;  %4664 = vst [vmem:[#allocation11_spill] sm:$0xff] %v3336_v4  ;;  %v508_v16 = vmul.f32 %v494_v56, %v3334_v3  ;;  %v510_v17 = vmul.f32 %v494_v56, %v3336_v4  ;;  %v546_v44 = vadd.f32 %v529_v32, %v506_v25  ;;  %v3399_v54 = vmax.f32 %v544_v43, 0.0  ;;  %v993_v25 = vld [vmem:[%s4629_s9] sm:$0xff] }
  0xe7   :  { %4667 = vst [vmem:[#allocation14_spill] sm:$0xff] %v3346_v11  ;;  %4668 = vst [vmem:[#allocation15_spill] sm:$0xff] %v3348_v12  ;;  %v509_v18 = vmul.f32 %v494_v56, %v3346_v11  ;;  %v511_v19 = vmul.f32 %v494_v56, %v3348_v12  ;;  %v547_v45 = vadd.f32 %v529_v32, %v507_v26  ;;  %v3397_v53 = vmax.f32 %v545_v39, 0.0  ;;  %v994_v26 = vld [vmem:[%s4629_s9 + $0x8] sm:$0xff]  ;;  %v2832_v32 = vld [vmem:[%s4624_s4 + $0x20] sm:$0xff] }
  0xe8   :  { %586 = vrot.lane.b32.xlu1 %v3353_v15, %s3147_s29  ;;  %633 = vrot.lane.b32.xlu0 %v3310_v47, %s3148_s30  ;;  %v548_v33 = vadd.f32 %v534_v23, %v508_v16  ;;  %v550_v36 = vadd.f32 %v534_v23, %v510_v17  ;;  %v3401_v56 = vmax.f32 %v546_v44, 0.0  ;;  %v893_v16 = vld [vmem:[%s4626_s6] sm:$0xff]  ;;  %v894_v17 = vld [vmem:[%s4626_s6 + $0x8] sm:$0xff]  ;;  %v275_v43 = vlaneseq }
  0xe9   :  { %v549_v29 = vadd.f32 %v534_v23, %v509_v18  ;;  %v551_v37 = vadd.f32 %v534_v23, %v511_v19  ;;  %v3403_v60 = vmax.f32 %v547_v45, 0.0  ;;  %v933_v18 = vld [vmem:[%s4627_s7] sm:$0xff]  ;;  %v934_v19 = vld [vmem:[%s4627_s7 + $0x8] sm:$0xff]  ;;  %v935_v23 = vld [vmem:[%s4627_s7 + $0x10] sm:$0xff] }
  0xea   :  { %v3385_v50 = vmax.f32 %v548_v33, 0.0  ;;  %v3387_v51 = vmax.f32 %v550_v36, 0.0  ;;  %v2833_v33 = vld [vmem:[%s4624_s4 + $0x28] sm:$0xff]  ;;  %v2830_v36 = vld [vmem:[%s4623_s3 + $0x30] sm:$0xff]  ;;  %v2835_v39 = vld [vmem:[%s4624_s4 + $0x38] sm:$0xff]  ;;  %v3527_v45 = vand.u32 127, %v275_v43 }
  0xeb   :  { %v3383_v48 = vmax.f32 %v549_v29, 0.0  ;;  %v3389_v52 = vmax.f32 %v551_v37, 0.0  ;;  %v996_v29 = vld [vmem:[%s4629_s9 + $0x18] sm:$0xff] }
  0xec   :  { %635 = vrot.lane.b32.xlu1 %v3322_v58, %s3148_s30  ;;  %649 = vrot.lane.b32.xlu0 %v3324_v59, %s3148_s30  ;;  %v2831_v37 = vld [vmem:[%s4623_s3 + $0x38] sm:$0xff]  ;;  %vm600_vm3 = vcmp.lt.s32.totalorder %v3527_v45, 1  ;;  %vm665_vm9 = vcmp.lt.s32.totalorder %v3527_v45, 127  ;;  %vm1354_vm15 = vcmp.lt.s32.totalorder %v3527_v45, 2 }
  0xf0   :  { %651 = vrot.lane.b32.xlu1 %v3353_v15, %s3148_s30  ;;  %576 = vrot.lane.b32.xlu0 %v3379_v34, %s3147_s29 }
  0xf4   :  { %578 = vrot.lane.b32.xlu1 %v3377_v42, %s3147_s29  ;;  %592 = vrot.lane.b32.xlu0 %v3395_v35, %s3147_s29 }
  0xf8   :  { %594 = vrot.lane.b32.xlu1 %v3381_v46, %s3147_s29  ;;  %641 = vrot.lane.b32.xlu0 %v3379_v34, %s3148_s30 }
  0xfc   :  { %643 = vrot.lane.b32.xlu1 %v3377_v42, %s3148_s30  ;;  %657 = vrot.lane.b32.xlu0 %v3395_v35, %s3148_s30 }
 0x100   :  { %659 = vrot.lane.b32.xlu1 %v3381_v46, %s3148_s30  ;;  %572 = vrot.lane.b32.xlu0 %v3399_v54, %s3147_s29 }
 0x104   :  { %574 = vrot.lane.b32.xlu1 %v3385_v50, %s3147_s29  ;;  %588 = vrot.lane.b32.xlu0 %v3401_v56, %s3147_s29 }
 0x108   :  { %590 = vrot.lane.b32.xlu1 %v3387_v51, %s3147_s29  ;;  %580 = vrot.lane.b32.xlu0 %v3397_v53, %s3147_s29 }
 0x10c   :  { %582 = vrot.lane.b32.xlu1 %v3383_v48, %s3147_s29  ;;  %596 = vrot.lane.b32.xlu0 %v3403_v60, %s3147_s29 }
 0x110   :  { %598 = vrot.lane.b32.xlu1 %v3389_v52, %s3147_s29  ;;  %637 = vrot.lane.b32.xlu0 %v3399_v54, %s3148_s30  ;;  %s3152_s29 = smov 124  }
 0x114   :  { %639 = vrot.lane.b32.xlu1 %v3385_v50, %s3148_s30  ;;  %645 = vrot.lane.b32.xlu0 %v3397_v53, %s3148_s30 }
 0x118   :  { %655 = vrot.lane.b32.xlu1 %v3387_v51, %s3148_s30  ;;  %653 = vrot.lane.b32.xlu0 %v3401_v56, %s3148_s30 }
 0x11c   :  { %647 = vrot.lane.b32.xlu1 %v3383_v48, %s3148_s30  ;;  %661 = vrot.lane.b32.xlu0 %v3403_v60, %s3148_s30 }
 0x120   :  { %663 = vrot.lane.b32.xlu1 %v3389_v52, %s3148_s30  ;;  %899 = vperm.xlu0 %3119, %v893_v16  }
 0x124   :  { %904 = vperm.xlu1 %3120, %v894_v17   ;;  %939 = vperm.xlu0 %3119, %v933_v18   ;;  %v277_v18 = vadd.s32 128, %v3527_v45 }
 0x128   :  { %944 = vperm.xlu1 %3120, %v934_v19   ;;  %909 = vperm.xlu0 %3119, %v895_v20  }
 0x12c   :  { %914 = vperm.xlu1 %3120, %v896_v21   ;;  %949 = vperm.xlu0 %3119, %v935_v23   ;;  %v3532_v21 = vand.u32 127, %v277_v18  ;;  %v279_v23 = vadd.s32 384, %v3527_v45 }
 0x12e   :  { %4669 = vst [vmem:[#allocation16_spill] sm:$0xff] %v3532_v21 }
 0x130   :  { %954 = vperm.xlu1 %3120, %v936_v24   ;;  %999 = vperm.xlu0 %3119, %v993_v25   ;;  %v278_v24 = vadd.s32 256, %v3527_v45 }
 0x134   :  { %1004 = vperm.xlu1 %3120, %v994_v26   ;;  %1231 = vperm.xlu0 %3119, %v2828_v27   ;;  %v329_v27 = vadd.s32 4294967295, %v3532_v21 }
 0x136   :  { %vm333_vm2 = vcmp.ge.s32.totalorder %v329_v27, 0 }
 0x138   :  { %1236 = vperm.xlu1 %3120, %v2829_v22   ;;  %1009 = vperm.xlu0 %3119, %v995_v28   ;;  %v3541_v22 = vand.u32 127, %v279_v23  ;;  %v3543_v28 = vand.u32 127, %v278_v24 }
 0x13c   :  { %1014 = vperm.xlu1 %3120, %v996_v29   ;;  %1272 = vperm.xlu0 %3119, %v2832_v32  }
 0x140   :  { %1277 = vperm.xlu1 %3120, %v2833_v33   ;;  %1241 = vperm.xlu0 %3119, %v2830_v36   ;;  %v328_v33 = vadd.s32 4294967295, %v3527_v45  ;;  %v331_v36 = vadd.s32 4294967295, %v3541_v22 }
 0x142   :  { %vm332_vm4 = vcmp.ge.s32.totalorder %v328_v33, 0  ;;  %vm335_vm5 = vcmp.ge.s32.totalorder %v331_v36, 0 }
 0x143   :  { %v2788_v13 = vsel %vm332_vm4, 1.0, %v4633_v5  ;;  %v2791_v8 = vsel %vm335_vm5, 1.0, %v4633_v5  ;;  %vm1419_vm5 = vcmp.lt.s32.totalorder %v3527_v45, 126 }
 0x144   :  { %1246 = vperm.xlu1 %3120, %v2831_v37   ;;  %1282 = vperm.xlu0 %3119, %v2834_v38   ;;  %v330_v37 = vadd.s32 4294967295, %v3543_v28  ;;  %v2789_v38 = vsel %vm333_vm2, 1.0, %v4633_v5 }
 0x146   :  { %vm334_vm6 = vcmp.ge.s32.totalorder %v330_v37, 0 }
 0x147   :  { %v2790_v36 = vsel %vm334_vm6, 1.0, %v4633_v5 }
 0x148   :  { %1287 = vperm.xlu1 %3120, %v2835_v39  }
 0x152   :  { %v569_v44 = vpop.permute.xlu0 %568 }
 0x156   :  { %v571_v16 = vpop.permute.xlu1 %570  ;;  %v585_v17 = vpop.permute.xlu0 %584 }
 0x15a   :  { %v587_v19 = vpop.permute.xlu1 %586  ;;  %v3530_v20 = vpop.permute.xlu0 %633 }
 0x15e   :  { %v3536_v25 = vpop.permute.xlu1 %635  ;;  %v3538_v26 = vpop.permute.xlu0 %649 }
 0x162   :  { %v3545_v29 = vpop.permute.xlu1 %651  ;;  %v577_v32 = vpop.permute.xlu0 %576 }
 0x163   :  { %v609_v39 = vsel %vm600_vm3, %v569_v44, %v577_v32 }
 0x164   :  { %v618_v24 = vmul.f32 %v2789_v38, %v609_v39 }
 0x166   :  { %v579_v43 = vpop.permute.xlu1 %578  ;;  %v593_v18 = vpop.permute.xlu0 %592 }
 0x167   :  { %v610_v23 = vsel %vm600_vm3, %v571_v16, %v579_v43  ;;  %v606_v27 = vsel %vm600_vm3, %v579_v43, %v587_v19  ;;  %v601_v7 = vsel %vm600_vm3, %v585_v17, %v593_v18  ;;  %v613_v33 = vsel %vm600_vm3, %v593_v18, %v569_v44 }
 0x168   :  { %v622_v14 = vmul.f32 %v2789_v38, %v610_v23  ;;  %v605_v43 = vsel %vm600_vm3, %v577_v32, %v585_v17  ;;  %v623_v23 = vmul.f32 %v2790_v36, %v606_v27  ;;  %v617_v62 = vmul.f32 %v2788_v13, %v613_v33 }
 0x169   :  { %v620_v12 = vmul.f32 %v2791_v8, %v601_v7  ;;  %v619_v18 = vmul.f32 %v2790_v36, %v605_v43 }
 0x16a   :  { %v595_v37 = vpop.permute.xlu1 %594  ;;  %v3565_v6 = vpop.permute.xlu0 %641  ;;  %v2916_v39 = vpack.c.bf16 %v622_v14, %v618_v24 }
 0x16b   :  { %v602_v1 = vsel %vm600_vm3, %v587_v19, %v595_v37  ;;  %v614_v0 = vsel %vm600_vm3, %v595_v37, %v571_v16  ;;  %v2942_v17 = vpack.c.bf16 %v623_v23, %v619_v18  ;;  %v352_v23 = vadd.s32 1, %v3527_v45 }
 0x16c   :  { %v621_v4 = vmul.f32 %v2788_v13, %v614_v0  ;;  %v624_v44 = vmul.f32 %v2791_v8, %v602_v1  ;;  %2917 = vmatprep.subr.bf16.mxu0 %v2916_v39 }
 0x16d   :  { %vm360_vm7 = vcmp.lt.s32.totalorder %v352_v23, 128 }
 0x16e   :  { %v2918_v5 = vpack.c.bf16 %v621_v4, %v617_v62  ;;  %v3573_v11 = vpop.permute.xlu1 %643  ;;  %v3575_v14 = vpop.permute.xlu0 %657  ;;  %v2940_v24 = vpack.c.bf16 %v624_v44, %v620_v12  ;;  %v353_v44 = vadd.s32 1, %v3532_v21 }
 0x170   :  { %2919 = vmatpush1.bf16.msra.mxu0 %v2918_v5  ;;  %2941 = vmatprep.subr.bf16.mxu1 %v2940_v24  ;;  %vm361_vm8 = vcmp.lt.s32.totalorder %v353_v44, 128 }
 0x171   :  { %2943 = vmatpush1.bf16.msra.mxu1 %v2942_v17 }
 0x172   :  { %v660_v19 = vpop.permute.xlu1 %659  ;;  %v573_v32 = vpop.permute.xlu0 %572 }
 0x176   :  { %v575_v27 = vpop.permute.xlu1 %574  ;;  %v589_v16 = vpop.permute.xlu0 %588 }
 0x17a   :  { %v591_v33 = vpop.permute.xlu1 %590  ;;  %v581_v7 = vpop.permute.xlu0 %580 }
 0x17b   :  { %v611_v0 = vsel %vm600_vm3, %v573_v32, %v581_v7  ;;  %v607_v18 = vsel %vm600_vm3, %v581_v7, %v589_v16 }
 0x17c   :  { %v626_v37 = vmul.f32 %v2789_v38, %v611_v0  ;;  %v627_v2 = vmul.f32 %v2790_v36, %v607_v18  ;;  %v678_v18 = vsel %vm665_vm9, %v3575_v14, %v3530_v20 }
 0x17e   :  { %v583_v1 = vpop.permute.xlu1 %582  ;;  %v597_v4 = vpop.permute.xlu0 %596 }
 0x17f   :  { %v612_v62 = vsel %vm600_vm3, %v575_v27, %v583_v1  ;;  %v608_v5 = vsel %vm600_vm3, %v583_v1, %v591_v33  ;;  %v603_v39 = vsel %vm600_vm3, %v589_v16, %v597_v4  ;;  %v615_v43 = vsel %vm600_vm3, %v597_v4, %v573_v32 }
 0x180   :  { %v630_v12 = vmul.f32 %v2789_v38, %v612_v62  ;;  %v355_v1 = vadd.s32 1, %v3541_v22  ;;  %v631_v38 = vmul.f32 %v2790_v36, %v608_v5  ;;  %v625_v4 = vmul.f32 %v2788_v13, %v615_v43 }
 0x181   :  { %v628_v3 = vmul.f32 %v2791_v8, %v603_v39  ;;  %v354_v16 = vadd.s32 1, %v3543_v28  ;;  %v4672_v43 = vpack.c.bf16 %v3381_v46, %v3395_v35  ;;  %v667_v46 = vsel %vm665_vm9, %v3545_v29, %v660_v19 }
 0x182   :  { %v599_v24 = vpop.permute.xlu1 %598  ;;  %v3591_v17 = vpop.permute.xlu0 %637  ;;  %v2920_v0 = vpack.c.bf16 %v630_v12, %v626_v37  ;;  %vm363_vm10 = vcmp.lt.s32.totalorder %v355_v1, 128 }
 0x183   :  { %v604_v62 = vsel %vm600_vm3, %v591_v33, %v599_v24  ;;  %v616_v32 = vsel %vm600_vm3, %v599_v24, %v575_v27  ;;  %v2946_v33 = vpack.c.bf16 %v631_v38, %v627_v2  ;;  %vm362_vm11 = vcmp.lt.s32.totalorder %v354_v16, 128 }
 0x184   :  { %v629_v10 = vmul.f32 %v2788_v13, %v616_v32  ;;  %v632_v9 = vmul.f32 %v2791_v8, %v604_v62  ;;  %2921 = vmatprep.subr.bf16.mxu0 %v2920_v0  ;;  %v671_v8 = vsel %vm665_vm9, %v3573_v11, %v3545_v29  ;;  %v4670_v13 = vmov 0.0  }
 0x185   :  { %v2792_v36 = vsel %vm360_vm7, 1.0, %v4670_v13  ;;  %v2793_v2 = vsel %vm361_vm8, 1.0, %v4670_v13  ;;  %v2795_v27 = vsel %vm363_vm10, 1.0, %v4670_v13  ;;  %v4673_v24 = vpack.c.bf16 %v3322_v58, %v3310_v47 }
 0x186   :  { %v2922_v7 = vpack.c.bf16 %v629_v10, %v625_v4  ;;  %v3599_v37 = vpop.permute.xlu1 %639  ;;  %v646_v12 = vpop.permute.xlu0 %645  ;;  %v2944_v5 = vpack.c.bf16 %v632_v9, %v628_v3  ;;  %v679_v10 = vsel %vm665_vm9, %v660_v19, %v3536_v25  ;;  %v4671_v3 = vpack.c.bf16 %v3377_v42, %v3379_v34 }
 0x187   :  { %v670_v9 = vsel %vm665_vm9, %v3565_v6, %v3538_v26  ;;  %v674_v42 = vsel %vm665_vm9, %v3530_v20, %v3565_v6  ;;  %v675_v34 = vsel %vm665_vm9, %v3536_v25, %v3573_v11  ;;  %v687_v44 = vmul.f32 %v2793_v2, %v671_v8 }
 0x188   :  { %2923 = vmatpush1.bf16.msra.mxu0 %v2922_v7  ;;  %2945 = vmatprep.subr.bf16.mxu1 %v2944_v5  ;;  %v689_v35 = vmul.f32 %v2795_v27, %v679_v10  ;;  %v683_v6 = vmul.f32 %v2793_v2, %v670_v9  ;;  %v2794_v0 = vsel %vm362_vm11, 1.0, %v4670_v13  ;;  %v4674_v25 = vpack.c.bf16 %v3383_v48, %v3397_v53 }
 0x189   :  { %2925 = vmatprep.subr.bf16.mxu0 %v4671_v3  ;;  %2947 = vmatpush1.bf16.msra.mxu1 %v2946_v33  ;;  %v4675_v20 = vpack.c.bf16 %v3353_v15, %v3324_v59  ;;  %v682_v29 = vmul.f32 %v2792_v36, %v674_v42  ;;  %v686_v19 = vmul.f32 %v2792_v36, %v675_v34 }
 0x18a   :  { %v656_v39 = vpop.permute.xlu1 %655  ;;  %2949 = vmatprep.subr.bf16.mxu1 %v4672_v43  ;;  %v654_v23 = vpop.permute.xlu0 %653  ;;  %v666_v47 = vsel %vm665_vm9, %v3538_v26, %v3575_v14  ;;  %v685_v58 = vmul.f32 %v2795_v27, %v678_v18  ;;  %v4676_v38 = vpack.c.bf16 %v3389_v52, %v3403_v60  ;;  %v688_v48 = vmul.f32 %v2794_v0, %v667_v46 }
 0x18b   :  { %v672_v11 = vsel %vm665_vm9, %v646_v12, %v654_v23  ;;  %v2932_v15 = vpack.c.bf16 %v687_v44, %v683_v6  ;;  %v676_v26 = vsel %vm665_vm9, %v3591_v17, %v646_v12  ;;  %v4677_v52 = vpack.c.bf16 %v3385_v50, %v3399_v54 }
 0x18c   :  { %2927 = vmatpush1.bf16.msra.mxu0 %v4673_v24  ;;  %v691_v14 = vmul.f32 %v2793_v2, %v672_v11  ;;  %v2956_v60 = vpack.c.bf16 %v689_v35, %v685_v58  ;;  %v684_v4 = vmul.f32 %v2794_v0, %v666_v47  ;;  %v4678_v5 = vpack.c.bf16 %v3387_v51, %v3401_v56 }
 0x18d   :  { %2929 = vmatprep.subr.bf16.mxu0 %v4674_v25  ;;  %2951 = vmatpush1.bf16.msra.mxu1 %v4675_v20  ;;  %v2934_v12 = vpack.c.bf16 %v686_v19, %v682_v29  ;;  %v690_v10 = vmul.f32 %v2792_v36, %v676_v26 }
 0x18e   :  { %v648_v1 = vpop.permute.xlu1 %647  ;;  %2953 = vmatprep.subr.bf16.mxu1 %v4676_v38  ;;  %v662_v62 = vpop.permute.xlu0 %661  ;;  %v2958_v54 = vpack.c.bf16 %v688_v48, %v684_v4 }
 0x18f   :  { %v673_v53 = vsel %vm665_vm9, %v648_v1, %v656_v39  ;;  %v677_v59 = vsel %vm665_vm9, %v3599_v37, %v648_v1  ;;  %v668_v16 = vsel %vm665_vm9, %v654_v23, %v662_v62  ;;  %v680_v7 = vsel %vm665_vm9, %v662_v62, %v3591_v17 }
 0x190   :  { %v695_v32 = vmul.f32 %v2793_v2, %v673_v53  ;;  %2931 = vmatpush1.bf16.msra.mxu0 %v4677_v52  ;;  %v694_v33 = vmul.f32 %v2792_v36, %v677_v59  ;;  %v692_v17 = vmul.f32 %v2794_v0, %v668_v16  ;;  %v693_v9 = vmul.f32 %v2795_v27, %v680_v7  ;;  %v698_v36 = vld [vmem:[%s4625_s5] sm:$0xff] }
 0x191   :  { %2933 = vmatprep.subr.bf16.mxu0 %v2932_v15  ;;  %2955 = vmatpush1.bf16.msra.mxu1 %v4678_v5 }
 0x192   :  { %v664_v8 = vpop.permute.xlu1 %663  ;;  %2957 = vmatprep.subr.bf16.mxu1 %v2956_v60  ;;  %v2936_v50 = vpack.c.bf16 %v695_v32, %v691_v14  ;;  %v2938_v51 = vpack.c.bf16 %v694_v33, %v690_v10 }
 0x193   :  { %v669_v3 = vsel %vm665_vm9, %v656_v39, %v664_v8  ;;  %v681_v2 = vsel %vm665_vm9, %v664_v8, %v3599_v37  ;;  %v699_v37 = vld [vmem:[%s4625_s5 + $0x8] sm:$0xff]  ;;  %v701_v39 = vld [vmem:[%s4625_s5 + $0x18] sm:$0xff]  ;;  %vm2111_vm9 = vcmp.lt.s32.totalorder %v3527_v45, 4 }
 0x194   :  { %v696_v43 = vmul.f32 %v2794_v0, %v669_v3  ;;  %v697_v23 = vmul.f32 %v2795_v27, %v681_v2  ;;  %2935 = vmatpush1.bf16.msra.mxu0 %v2934_v12  ;;  %v700_v27 = vld [vmem:[%s4625_s5 + $0x10] sm:$0xff] }
 0x195   :  { %2937 = vmatprep.subr.bf16.mxu0 %v2936_v50  ;;  %2959 = vmatpush1.bf16.msra.mxu1 %v2958_v54 }
 0x196   :  { %v2962_v56 = vpack.c.bf16 %v696_v43, %v692_v17  ;;  %v2960_v42 = vpack.c.bf16 %v697_v23, %v693_v9 }
 0x198   :  { %2939 = vmatpush1.bf16.msra.mxu0 %v2938_v51  ;;  %2961 = vmatprep.subr.bf16.mxu1 %v2960_v42 }
 0x199   :  { %2963 = vmatpush1.bf16.msra.mxu1 %v2962_v56 }
 0x19b   :  { %2812 = vmatmul.mubr.msk.f32.vlgmr.msra.gmra.mrb[8].mxu0 %vm702_vm12, %v698_v36 }
 0x19c   :  { %2816 = vmatmul.mubr.msk.f32.vlgmr.msra.gmra.mrb[8].mxu1 %vm702_vm12, %v698_v36  ;;  %785 = vmatprep.mubr.f32.mxu0 %v4670_v13 }
 0x19d   :  { %874 = vmatprep.mubr.f32.mxu1 %v4670_v13 }
 0x19f   :  { %2813 = vmatmul.mubr.msk.f32.gmra.mrb[10].mxu0 %vm702_vm12, %v699_v37  ;;  %v900_v34 = vpop.permute.xlu0 %899 }
 0x1a0   :  { %2817 = vmatmul.mubr.msk.f32.gmra.mrb[10].mxu1 %vm702_vm12, %v699_v37  ;;  %791 = vmatprep.mubr.f32.mxu0 %v4670_v13 }
 0x1a1   :  { %880 = vmatprep.mubr.f32.mxu1 %v4670_v13 }
 0x1a3   :  { %2814 = vmatmul.mubr.msk.f32.gmra.mrb[12].mxu0 %vm702_vm12, %v700_v27  ;;  %v905_v44 = vpop.permute.xlu1 %904  ;;  %v940_v18 = vpop.permute.xlu0 %939 }
 0x1a4   :  { %2818 = vmatmul.mubr.msk.f32.gmra.mrb[12].mxu1 %vm702_vm12, %v700_v27  ;;  %797 = vmatprep.mubr.f32.mxu0 %v4670_v13 }
 0x1a5   :  { %886 = vmatprep.mubr.f32.mxu1 %v4670_v13 }
 0x1a7   :  { %2815 = vmatmul.mubr.msk.f32.gmra.mrb[14].mxu0 %vm702_vm12, %v701_v39  ;;  %v945_v0 = vpop.permute.xlu1 %944  ;;  %v910_v53 = vpop.permute.xlu0 %909 }
 0x1a8   :  { %2819 = vmatmul.mubr.msk.f32.gmra.mrb[14].mxu1 %vm702_vm12, %v701_v39  ;;  %1094 = vmatprep.mubr.f32.mxu0 %v4670_v13 }
 0x1a9   :  { %1183 = vmatprep.mubr.f32.mxu1 %v4670_v13 }
 0x1ab   :  { %v915_v60 = vpop.permute.xlu1 %914  ;;  %v950_v37 = vpop.permute.xlu0 %949 }
 0x26e   :  { %v781_v46 = vpop.f32.mrb[8].mxu0 }
 0x26f   :  { %v917_v35 = vmul.f32 %v900_v34, %v781_v46  ;;  %v783_v24 = vpop.f32.mrb[9].mxu0  ;;  %v870_v6 = vpop.f32.mrb[8].mxu1 }
 0x270   :  { %v918_v11 = vmul.f32 %v900_v34, %v783_v24  ;;  %v919_v25 = vmul.f32 %v900_v34, %v870_v6  ;;  %v872_v20 = vpop.f32.mrb[9].mxu1  ;;  %v955_v6 = vpop.permute.xlu1 %954 }
 0x271   :  { %v920_v29 = vmul.f32 %v900_v34, %v872_v20  ;;  %v957_v19 = vadd.f32 %v940_v18, %v917_v35 }
 0x272   :  { %v958_v47 = vadd.f32 %v940_v18, %v918_v11  ;;  %v787_v58 = vpop.f32.mrb[10].mxu0  ;;  %v959_v1 = vadd.f32 %v940_v18, %v919_v25 }
 0x273   :  { %v921_v38 = vmul.f32 %v905_v44, %v787_v58  ;;  %v789_v62 = vpop.f32.mrb[11].mxu0  ;;  %v876_v48 = vpop.f32.mrb[10].mxu1  ;;  %v960_v14 = vadd.f32 %v940_v18, %v920_v29  ;;  %v973_v4 = vmax.f32 %v957_v19, 0.0 }
 0x274   :  { %v922_v59 = vmul.f32 %v905_v44, %v789_v62  ;;  %v923_v15 = vmul.f32 %v905_v44, %v876_v48  ;;  %v878_v26 = vpop.f32.mrb[11].mxu1  ;;  %v974_v16 = vmax.f32 %v958_v47, 0.0  ;;  %v975_v33 = vmax.f32 %v959_v1, 0.0 }
 0x275   :  { %v961_v32 = vadd.f32 %v945_v0, %v921_v38  ;;  %v924_v52 = vmul.f32 %v905_v44, %v878_v26  ;;  %v976_v51 = vmax.f32 %v960_v14, 0.0 }
 0x276   :  { %v962_v7 = vadd.f32 %v945_v0, %v922_v59  ;;  %v963_v5 = vadd.f32 %v945_v0, %v923_v15  ;;  %v793_v12 = vpop.f32.mrb[12].mxu0 }
 0x277   :  { %v977_v8 = vmax.f32 %v961_v32, 0.0  ;;  %v964_v50 = vadd.f32 %v945_v0, %v924_v52  ;;  %v925_v54 = vmul.f32 %v910_v53, %v793_v12  ;;  %v795_v10 = vpop.f32.mrb[13].mxu0  ;;  %v882_v3 = vpop.f32.mrb[12].mxu1  ;;  %v990_v12 = vld [vmem:[%s4628_s8 + $0x8] sm:$0xff] }
 0x278   :  { %v978_v2 = vmax.f32 %v962_v7, 0.0  ;;  %v979_v17 = vmax.f32 %v963_v5, 0.0  ;;  %v926_v9 = vmul.f32 %v910_v53, %v795_v10  ;;  %v927_v43 = vmul.f32 %v910_v53, %v882_v3  ;;  %v884_v23 = vpop.f32.mrb[13].mxu1 }
 0x279   :  { %v2966_v56 = vpack.c.bf16 %v977_v8, %v973_v4  ;;  %v980_v42 = vmax.f32 %v964_v50, 0.0  ;;  %v928_v36 = vmul.f32 %v910_v53, %v884_v23  ;;  %v965_v44 = vadd.f32 %v950_v37, %v925_v54  ;;  %v992_v8 = vld [vmem:[%s4628_s8 + $0x18] sm:$0xff]  ;;  %v1000_v50 = vpop.permute.xlu0 %999  ;;  %v1005_v54 = vpop.permute.xlu1 %1004 }
 0x27a   :  { %v2974_v27 = vpack.c.bf16 %v979_v17, %v975_v33  ;;  %v799_v39 = vpop.f32.mrb[14].mxu0  ;;  %v2964_v34 = vpack.c.bf16 %v978_v2, %v974_v16  ;;  %v966_v0 = vadd.f32 %v950_v37, %v926_v9  ;;  %v967_v11 = vadd.f32 %v950_v37, %v927_v43  ;;  %v991_v33 = vld [vmem:[%s4628_s8 + $0x10] sm:$0xff] }
 0x27b   :  { %v929_v18 = vmul.f32 %v915_v60, %v799_v39  ;;  %v801_v46 = vpop.f32.mrb[15].mxu0  ;;  %v888_v35 = vpop.f32.mrb[14].mxu1  ;;  %v2972_v24 = vpack.c.bf16 %v980_v42, %v976_v51  ;;  %v968_v19 = vadd.f32 %v950_v37, %v928_v36  ;;  %v981_v62 = vmax.f32 %v965_v44, 0.0 }
 0x27c   :  { %v930_v25 = vmul.f32 %v915_v60, %v801_v46  ;;  %v931_v20 = vmul.f32 %v915_v60, %v888_v35  ;;  %v890_v29 = vpop.f32.mrb[15].mxu1  ;;  %2965 = vmatprep.subr.bf16.mxu0 %v2964_v34  ;;  %v982_v59 = vmax.f32 %v966_v0, 0.0  ;;  %v983_v15 = vmax.f32 %v967_v11, 0.0 }
 0x27d   :  { %v969_v47 = vadd.f32 %v955_v6, %v929_v18  ;;  %v932_v58 = vmul.f32 %v915_v60, %v890_v29  ;;  %2967 = vmatpush1.bf16.msra.mxu0 %v2966_v56  ;;  %2973 = vmatprep.subr.bf16.mxu1 %v2972_v24  ;;  %v984_v32 = vmax.f32 %v968_v19, 0.0  ;;  %v989_v60 = vld [vmem:[%s4628_s8] sm:$0xff]  ;;  %v1232_v10 = vpop.permute.xlu0 %1231  ;;  %v1237_v3 = vpop.permute.xlu1 %1236 }
 0x27e   :  { %v970_v1 = vadd.f32 %v955_v6, %v930_v25  ;;  %v971_v38 = vadd.f32 %v955_v6, %v931_v20  ;;  %2975 = vmatpush1.bf16.msra.mxu1 %v2974_v27 }
 0x27f   :  { %v985_v48 = vmax.f32 %v969_v47, 0.0  ;;  %v972_v53 = vadd.f32 %v955_v6, %v932_v58 }
 0x280   :  { %v986_v26 = vmax.f32 %v970_v1, 0.0  ;;  %v987_v14 = vmax.f32 %v971_v38, 0.0 }
 0x281   :  { %v2970_v52 = vpack.c.bf16 %v985_v48, %v981_v62  ;;  %v988_v4 = vmax.f32 %v972_v53, 0.0  ;;  %v1010_v2 = vpop.permute.xlu0 %1009  ;;  %v1015_v17 = vpop.permute.xlu1 %1014 }
 0x282   :  { %v2978_v16 = vpack.c.bf16 %v987_v14, %v983_v15  ;;  %v2968_v7 = vpack.c.bf16 %v986_v26, %v982_v59 }
 0x283   :  { %v2976_v5 = vpack.c.bf16 %v988_v4, %v984_v32 }
 0x284   :  { %2969 = vmatprep.subr.bf16.mxu0 %v2968_v7 }
 0x285   :  { %2971 = vmatpush1.bf16.msra.mxu0 %v2970_v52  ;;  %2977 = vmatprep.subr.bf16.mxu1 %v2976_v5  ;;  %v3741_v37 = vpop.permute.xlu0 %1272  ;;  %v1278_v35 = vpop.permute.xlu1 %1277 }
 0x286   :  { %2979 = vmatpush1.bf16.msra.mxu1 %v2978_v16 }
 0x288   :  { %2820 = vmatmul.mubr.msk.f32.vlgmr.msra.gmra.mrb[16].mxu0 %vm1017_vm13, %v989_v60 }
 0x289   :  { %2824 = vmatmul.mubr.msk.f32.vlgmr.msra.gmra.mrb[16].mxu1 %vm1017_vm13, %v989_v60  ;;  %1100 = vmatprep.mubr.f32.mxu0 %v4670_v13  ;;  %v1247_v59 = vpop.permute.xlu1 %1246 }
 0x28a   :  { %1189 = vmatprep.mubr.f32.mxu1 %v4670_v13 }
 0x28c   :  { %2821 = vmatmul.mubr.msk.f32.gmra.mrb[18].mxu0 %vm1017_vm13, %v990_v12 }
 0x28d   :  { %2825 = vmatmul.mubr.msk.f32.gmra.mrb[18].mxu1 %vm1017_vm13, %v990_v12  ;;  %1106 = vmatprep.mubr.f32.mxu0 %v4670_v13 }
 0x28e   :  { %1195 = vmatprep.mubr.f32.mxu1 %v4670_v13 }
 0x290   :  { %2822 = vmatmul.mubr.msk.f32.gmra.mrb[20].mxu0 %vm1017_vm13, %v991_v33 }
 0x291   :  { %2826 = vmatmul.mubr.msk.f32.gmra.mrb[20].mxu1 %vm1017_vm13, %v991_v33  ;;  %1112 = vmatprep.mubr.f32.mxu0 %v4670_v13 }
 0x292   :  { %1201 = vmatprep.mubr.f32.mxu1 %v4670_v13 }
 0x294   :  { %2823 = vmatmul.mubr.msk.f32.gmra.mrb[22].mxu0 %vm1017_vm13, %v992_v8 }
 0x295   :  { %2827 = vmatmul.mubr.msk.f32.gmra.mrb[22].mxu1 %vm1017_vm13, %v992_v8  ;;  %1533 = vmatprep.mubr.f32.mxu0 %v4670_v13 }
 0x296   :  { %1622 = vmatprep.mubr.f32.mxu1 %v4670_v13 }
 0x35b   :  { %v1096_v9 = vpop.f32.mrb[16].mxu0 }
 0x35c   :  { %v3736_v43 = vadd.f32 %v1096_v9, %v1000_v50  ;;  %v1098_v23 = vpop.f32.mrb[17].mxu0  ;;  %v1185_v51 = vpop.f32.mrb[16].mxu1 }
 0x35d   :  { %v3738_v56 = vadd.f32 %v1185_v51, %v1000_v50  ;;  %v1187_v42 = vpop.f32.mrb[17].mxu1  ;;  %v3754_v19 = vadd.f32 %v1098_v23, %v1000_v50 }
 0x35e   :  { %v1249_v36 = vmul.f32 %v1232_v10, %v3736_v43  ;;  %v3767_v52 = vadd.f32 %v1187_v42, %v1000_v50  ;;  %v1242_v50 = vpop.permute.xlu0 %1241 }
 0x35f   :  { %v1251_v27 = vmul.f32 %v1232_v10, %v3738_v56  ;;  %v1102_v39 = vpop.f32.mrb[18].mxu0  ;;  %v1250_v32 = vmul.f32 %v1232_v10, %v3754_v19 }
 0x360   :  { %v3744_v34 = vadd.f32 %v1102_v39, %v1005_v54  ;;  %v1104_v44 = vpop.f32.mrb[19].mxu0  ;;  %v1191_v18 = vpop.f32.mrb[18].mxu1  ;;  %v1290_v46 = vadd.f32 %v3741_v37, %v1249_v36  ;;  %v1252_v39 = vmul.f32 %v1232_v10, %v3767_v52 }
 0x361   :  { %v3747_v24 = vadd.f32 %v1191_v18, %v1005_v54  ;;  %v1193_v6 = vpop.f32.mrb[19].mxu1  ;;  %v1292_v25 = vadd.f32 %v3741_v37, %v1251_v27  ;;  %v3762_v15 = vadd.f32 %v1104_v44, %v1005_v54 }
 0x362   :  { %4679 = vst [vmem:[#allocation17_spill] sm:$0xff] %v3744_v34  ;;  %v1253_v0 = vmul.f32 %v1237_v3, %v3744_v34  ;;  %v3750_v11 = vmax.f32 %v1290_v46, 0.0  ;;  %v3764_v26 = vadd.f32 %v1193_v6, %v1005_v54 }
 0x363   :  { %4680 = vst [vmem:[#allocation18_spill] sm:$0xff] %v3747_v24  ;;  %v1255_v20 = vmul.f32 %v1237_v3, %v3747_v24  ;;  %v1108_v29 = vpop.f32.mrb[20].mxu0  ;;  %v3760_v48 = vmax.f32 %v1292_v25, 0.0  ;;  %4681 = vst [vmem:[#allocation19_spill] sm:$0xff] %v3762_v15  ;;  %v1254_v42 = vmul.f32 %v1237_v3, %v3762_v15 }
 0x364   :  { %v1110_v47 = vpop.f32.mrb[21].mxu0  ;;  %v1197_v58 = vpop.f32.mrb[20].mxu1  ;;  %1322 = vrot.lane.b32.xlu0 %v3750_v11, %s3149_s21  ;;  %v1294_v1 = vadd.f32 %v1278_v35, %v1253_v0  ;;  %4682 = vst [vmem:[#allocation20_spill] sm:$0xff] %v3764_v26  ;;  %v3769_v4 = vadd.f32 %v1108_v29, %v1010_v2  ;;  %v1256_v36 = vmul.f32 %v1237_v3, %v3764_v26 }
 0x365   :  { %v1199_v38 = vpop.f32.mrb[21].mxu1  ;;  %v1296_v53 = vadd.f32 %v1278_v35, %v1255_v20  ;;  %v3775_v5 = vadd.f32 %v1110_v47, %v1010_v2  ;;  %v3783_v54 = vadd.f32 %v1197_v58, %v1010_v2  ;;  %v1288_v3 = vpop.permute.xlu1 %1287  ;;  %v1291_v0 = vadd.f32 %v3741_v37, %v1250_v32 }
 0x366   :  { %v3758_v62 = vmax.f32 %v1294_v1, 0.0  ;;  %4683 = vst [vmem:[#allocation21_spill] sm:$0xff] %v3769_v4  ;;  %v3785_v9 = vadd.f32 %v1199_v38, %v1010_v2  ;;  %v1257_v46 = vmul.f32 %v1242_v50, %v3769_v4  ;;  %v1295_v25 = vadd.f32 %v1278_v35, %v1254_v42  ;;  %v1283_v47 = vpop.permute.xlu0 %1282 }
 0x367   :  { %v1114_v14 = vpop.f32.mrb[22].mxu0  ;;  %4684 = vst [vmem:[#allocation22_spill] sm:$0xff] %v3775_v5  ;;  %4688 = vst [vmem:[#allocation26_spill] sm:$0xff] %v3783_v54  ;;  %v3789_v51 = vmax.f32 %v1296_v53, 0.0  ;;  %v1258_v2 = vmul.f32 %v1242_v50, %v3775_v5  ;;  %v1259_v10 = vmul.f32 %v1242_v50, %v3783_v54  ;;  %v1297_v20 = vadd.f32 %v1278_v35, %v1256_v36 }
 0x368   :  { %v1116_v16 = vpop.f32.mrb[23].mxu0  ;;  %v1203_v7 = vpop.f32.mrb[22].mxu1  ;;  %1324 = vrot.lane.b32.xlu1 %v3758_v62, %s3149_s21  ;;  %1338 = vrot.lane.b32.xlu0 %v3760_v48, %s3149_s21  ;;  %v3777_v60 = vadd.f32 %v1114_v14, %v1015_v17  ;;  %4689 = vst [vmem:[#allocation27_spill] sm:$0xff] %v3785_v9  ;;  %v1260_v6 = vmul.f32 %v1242_v50, %v3785_v9  ;;  %v3812_v14 = vmax.f32 %v1291_v0, 0.0  ;;  %v3814_v35 = vmax.f32 %v1295_v25, 0.0 }
 0x369   :  { %v3779_v12 = vadd.f32 %v1116_v16, %v1015_v17  ;;  %v3781_v33 = vadd.f32 %v1203_v7, %v1015_v17  ;;  %v1205_v8 = vpop.f32.mrb[23].mxu1  ;;  %v1293_v58 = vadd.f32 %v3741_v37, %v1252_v39  ;;  %v1299_v53 = vadd.f32 %v1283_v47, %v1258_v2 }
 0x36a   :  { %4685 = vst [vmem:[#allocation23_spill] sm:$0xff] %v3777_v60  ;;  %v3787_v23 = vadd.f32 %v1205_v8, %v1015_v17  ;;  %v1261_v17 = vmul.f32 %v1247_v59, %v3777_v60  ;;  %v1298_v16 = vadd.f32 %v1283_v47, %v1257_v46  ;;  %v1300_v32 = vadd.f32 %v1283_v47, %v1259_v10 }
 0x36b   :  { %4686 = vst [vmem:[#allocation24_spill] sm:$0xff] %v3779_v12  ;;  %4687 = vst [vmem:[#allocation25_spill] sm:$0xff] %v3781_v33  ;;  %v1262_v27 = vmul.f32 %v1247_v59, %v3779_v12  ;;  %v1263_v44 = vmul.f32 %v1247_v59, %v3781_v33  ;;  %v1301_v7 = vadd.f32 %v1283_v47, %v1260_v6  ;;  %v3816_v8 = vmax.f32 %v1297_v20, 0.0  ;;  %v2849_v47 = vld [vmem:[%s4626_s6 + $0x28] sm:$0xff] }
 0x36c   :  { %4690 = vst [vmem:[#allocation28_spill] sm:$0xff] %v3787_v23  ;;  %1340 = vrot.lane.b32.xlu1 %v3789_v51, %s3149_s21  ;;  %1387 = vrot.lane.b32.xlu0 %v3750_v11, %s3150_s22  ;;  %v1264_v18 = vmul.f32 %v1247_v59, %v3787_v23  ;;  %v1302_v1 = vadd.f32 %v1288_v3, %v1261_v17  ;;  %v3826_v42 = vmax.f32 %v1293_v58, 0.0  ;;  %v3832_v39 = vmax.f32 %v1299_v53, 0.0  ;;  %v2852_v58 = vld [vmem:[%s4627_s7 + $0x20] sm:$0xff]  ;;  %v2851_v53 = vld [vmem:[%s4626_s6 + $0x38] sm:$0xff] }
 0x36d   :  { %v1303_v29 = vadd.f32 %v1288_v3, %v1262_v27  ;;  %v1304_v38 = vadd.f32 %v1288_v3, %v1263_v44  ;;  %v3834_v2 = vmax.f32 %v1298_v16, 0.0  ;;  %v3836_v17 = vmax.f32 %v1300_v32, 0.0  ;;  %v2855_v16 = vld [vmem:[%s4627_s7 + $0x38] sm:$0xff]  ;;  %v2860_v32 = vld [vmem:[%s4629_s9 + $0x20] sm:$0xff] }
 0x36e   :  { %v1305_v59 = vadd.f32 %v1288_v3, %v1264_v18  ;;  %v3828_v36 = vmax.f32 %v1302_v1, 0.0  ;;  %v3838_v44 = vmax.f32 %v1301_v7, 0.0  ;;  %v2853_v1 = vld [vmem:[%s4627_s7 + $0x28] sm:$0xff]  ;;  %v377_v20 = vadd.s32 4294967294, %v3532_v21 }
 0x36f   :  { %v3818_v50 = vmax.f32 %v1303_v29, 0.0  ;;  %v3830_v27 = vmax.f32 %v1304_v38, 0.0  ;;  %v2848_v29 = vld [vmem:[%s4626_s6 + $0x20] sm:$0xff]  ;;  %v2850_v38 = vld [vmem:[%s4626_s6 + $0x30] sm:$0xff]  ;;  %v2861_v7 = vld [vmem:[%s4629_s9 + $0x28] sm:$0xff]  ;;  %v378_v0 = vadd.s32 4294967294, %v3543_v28 }
 0x370   :  { %1389 = vrot.lane.b32.xlu1 %v3758_v62, %s3150_s22  ;;  %1403 = vrot.lane.b32.xlu0 %v3760_v48, %s3150_s22  ;;  %v3824_v37 = vmax.f32 %v1305_v59, 0.0  ;;  %v2854_v59 = vld [vmem:[%s4627_s7 + $0x30] sm:$0xff]  ;;  %vm381_vm14 = vcmp.ge.s32.totalorder %v377_v20, 0 }
 0x371   :  { %v2797_v6 = vsel %vm381_vm14, 1.0, %v4670_v13  ;;  %vm382_vm2 = vcmp.ge.s32.totalorder %v378_v0, 0 }
 0x372   :  { %v2798_v0 = vsel %vm382_vm2, 1.0, %v4670_v13 }
 0x374   :  { %1405 = vrot.lane.b32.xlu1 %v3789_v51, %s3150_s22  ;;  %1330 = vrot.lane.b32.xlu0 %v3812_v14, %s3149_s21 }
 0x378   :  { %1332 = vrot.lane.b32.xlu1 %v3814_v35, %s3149_s21  ;;  %1346 = vrot.lane.b32.xlu0 %v3826_v42, %s3149_s21 }
 0x37c   :  { %1348 = vrot.lane.b32.xlu1 %v3816_v8, %s3149_s21  ;;  %1395 = vrot.lane.b32.xlu0 %v3812_v14, %s3150_s22 }
 0x380   :  { %1397 = vrot.lane.b32.xlu1 %v3814_v35, %s3150_s22  ;;  %1411 = vrot.lane.b32.xlu0 %v3826_v42, %s3150_s22 }
 0x384   :  { %1413 = vrot.lane.b32.xlu1 %v3816_v8, %s3150_s22  ;;  %1326 = vrot.lane.b32.xlu0 %v3834_v2, %s3149_s21 }
 0x388   :  { %1328 = vrot.lane.b32.xlu1 %v3828_v36, %s3149_s21  ;;  %1342 = vrot.lane.b32.xlu0 %v3836_v17, %s3149_s21 }
 0x38c   :  { %1344 = vrot.lane.b32.xlu1 %v3830_v27, %s3149_s21  ;;  %1334 = vrot.lane.b32.xlu0 %v3832_v39, %s3149_s21 }
 0x390   :  { %1336 = vrot.lane.b32.xlu1 %v3818_v50, %s3149_s21  ;;  %1350 = vrot.lane.b32.xlu0 %v3838_v44, %s3149_s21 }
 0x394   :  { %1352 = vrot.lane.b32.xlu1 %v3824_v37, %s3149_s21  ;;  %1391 = vrot.lane.b32.xlu0 %v3834_v2, %s3150_s22 }
 0x398   :  { %1393 = vrot.lane.b32.xlu1 %v3828_v36, %s3150_s22  ;;  %1399 = vrot.lane.b32.xlu0 %v3832_v39, %s3150_s22 }
 0x39c   :  { %1409 = vrot.lane.b32.xlu1 %v3830_v27, %s3150_s22  ;;  %1407 = vrot.lane.b32.xlu0 %v3836_v17, %s3150_s22 }
 0x3a0   :  { %1401 = vrot.lane.b32.xlu1 %v3818_v50, %s3150_s22  ;;  %1415 = vrot.lane.b32.xlu0 %v3838_v44, %s3150_s22 }
 0x3a4   :  { %1417 = vrot.lane.b32.xlu1 %v3824_v37, %s3150_s22  ;;  %1654 = vperm.xlu0 %3119, %v2848_v29   ;;  %v2872_v29 = vld [vmem:[%s4623_s3 + $0x40] sm:$0xff] }
 0x3a8   :  { %1659 = vperm.xlu1 %3120, %v2849_v47   ;;  %1695 = vperm.xlu0 %3119, %v2852_v58   ;;  %v2873_v47 = vld [vmem:[%s4623_s3 + $0x48] sm:$0xff]  ;;  %v2862_v58 = vld [vmem:[%s4629_s9 + $0x30] sm:$0xff] }
 0x3ac   :  { %1700 = vperm.xlu1 %3120, %v2853_v1   ;;  %1664 = vperm.xlu0 %3119, %v2850_v38   ;;  %v2863_v1 = vld [vmem:[%s4629_s9 + $0x38] sm:$0xff]  ;;  %v2876_v38 = vld [vmem:[%s4624_s4 + $0x40] sm:$0xff] }
 0x3b0   :  { %1669 = vperm.xlu1 %3120, %v2851_v53   ;;  %1705 = vperm.xlu0 %3119, %v2854_v59   ;;  %v2877_v53 = vld [vmem:[%s4624_s4 + $0x48] sm:$0xff]  ;;  %v2874_v59 = vld [vmem:[%s4623_s3 + $0x50] sm:$0xff] }
 0x3b4   :  { %1710 = vperm.xlu1 %3120, %v2855_v16   ;;  %1757 = vperm.xlu0 %3119, %v2860_v32   ;;  %v2875_v16 = vld [vmem:[%s4623_s3 + $0x58] sm:$0xff]  ;;  %v2878_v32 = vld [vmem:[%s4624_s4 + $0x50] sm:$0xff] }
 0x3b8   :  { %1762 = vperm.xlu1 %3120, %v2861_v7   ;;  %1988 = vperm.xlu0 %3119, %v2872_v29   ;;  %v2879_v7 = vld [vmem:[%s4624_s4 + $0x58] sm:$0xff] }
 0x3bc   :  { %1993 = vperm.xlu1 %3120, %v2873_v47   ;;  %1767 = vperm.xlu0 %3119, %v2862_v58  }
 0x3c0   :  { %1772 = vperm.xlu1 %3120, %v2863_v1   ;;  %2029 = vperm.xlu0 %3119, %v2876_v38  }
 0x3c4   :  { %2034 = vperm.xlu1 %3120, %v2877_v53   ;;  %1998 = vperm.xlu0 %3119, %v2874_v59  }
 0x3c8   :  { %2003 = vperm.xlu1 %3120, %v2875_v16   ;;  %2039 = vperm.xlu0 %3119, %v2878_v32   ;;  %v376_v32 = vadd.s32 4294967294, %v3527_v45 }
 0x3ca   :  { %vm380_vm0 = vcmp.ge.s32.totalorder %v376_v32, 0 }
 0x3cb   :  { %v2796_v12 = vsel %vm380_vm0, 1.0, %v4670_v13 }
 0x3cc   :  { %2044 = vperm.xlu1 %3120, %v2879_v7   ;;  %v379_v7 = vadd.s32 4294967294, %v3541_v22 }
 0x3ce   :  { %vm383_vm1 = vcmp.ge.s32.totalorder %v379_v7, 0 }
 0x3cf   :  { %v2799_v60 = vsel %vm383_vm1, 1.0, %v4670_v13  ;;  %vm2176_vm1 = vcmp.lt.s32.totalorder %v3527_v45, 124 }
 0x3d6   :  { %v1323_v29 = vpop.permute.xlu0 %1322 }
 0x3da   :  { %v1325_v47 = vpop.permute.xlu1 %1324  ;;  %v1339_v58 = vpop.permute.xlu0 %1338 }
 0x3de   :  { %v1341_v1 = vpop.permute.xlu1 %1340  ;;  %v3962_v38 = vpop.permute.xlu0 %1387 }
 0x3e2   :  { %v3964_v53 = vpop.permute.xlu1 %1389  ;;  %v3966_v59 = vpop.permute.xlu0 %1403 }
 0x3e6   :  { %v3969_v25 = vpop.permute.xlu1 %1405  ;;  %v1331_v16 = vpop.permute.xlu0 %1330 }
 0x3e7   :  { %v1363_v10 = vsel %vm1354_vm15, %v1323_v29, %v1331_v16 }
 0x3e8   :  { %v1372_v18 = vmul.f32 %v2797_v6, %v1363_v10 }
 0x3ea   :  { %v1333_v46 = vpop.permute.xlu1 %1332  ;;  %v1347_v3 = vpop.permute.xlu0 %1346 }
 0x3eb   :  { %v1364_v20 = vsel %vm1354_vm15, %v1325_v47, %v1333_v46  ;;  %v1360_v23 = vsel %vm1354_vm15, %v1333_v46, %v1341_v1  ;;  %v1355_v9 = vsel %vm1354_vm15, %v1339_v58, %v1347_v3  ;;  %v1367_v32 = vsel %vm1354_vm15, %v1347_v3, %v1323_v29 }
 0x3ec   :  { %v1376_v33 = vmul.f32 %v2797_v6, %v1364_v20  ;;  %v1359_v46 = vsel %vm1354_vm15, %v1331_v16, %v1339_v58  ;;  %v1377_v20 = vmul.f32 %v2798_v0, %v1360_v23  ;;  %v1371_v63 = vmul.f32 %v2796_v12, %v1367_v32 }
 0x3ed   :  { %v1374_v26 = vmul.f32 %v2799_v60, %v1355_v9  ;;  %v1373_v29 = vmul.f32 %v2798_v0, %v1359_v46 }
 0x3ee   :  { %v1349_v7 = vpop.permute.xlu1 %1348  ;;  %v3989_v54 = vpop.permute.xlu0 %1395  ;;  %v2980_v10 = vpack.c.bf16 %v1376_v33, %v1372_v18 }
 0x3ef   :  { %v1356_v5 = vsel %vm1354_vm15, %v1341_v1, %v1349_v7  ;;  %v1368_v4 = vsel %vm1354_vm15, %v1349_v7, %v1325_v47  ;;  %v3006_v58 = vpack.c.bf16 %v1377_v20, %v1373_v29  ;;  %v400_v20 = vadd.s32 2, %v3527_v45 }
 0x3f0   :  { %v1375_v57 = vmul.f32 %v2796_v12, %v1368_v4  ;;  %v1378_v3 = vmul.f32 %v2799_v60, %v1356_v5  ;;  %2981 = vmatprep.subr.bf16.mxu0 %v2980_v10 }
 0x3f1   :  { %vm408_vm3 = vcmp.lt.s32.totalorder %v400_v20, 128 }
 0x3f2   :  { %v2982_v24 = vpack.c.bf16 %v1375_v57, %v1371_v63  ;;  %v3997_v41 = vpop.permute.xlu1 %1397  ;;  %v3999_v33 = vpop.permute.xlu0 %1411  ;;  %v3004_v18 = vpack.c.bf16 %v1378_v3, %v1374_v26  ;;  %v401_v3 = vadd.s32 2, %v3532_v21 }
 0x3f4   :  { %2983 = vmatpush1.bf16.msra.mxu0 %v2982_v24  ;;  %3005 = vmatprep.subr.bf16.mxu1 %v3004_v18  ;;  %vm409_vm4 = vcmp.lt.s32.totalorder %v401_v3, 128  ;;  %v1432_v3 = vsel %vm1419_vm5, %v3999_v33, %v3962_v38 }
 0x3f5   :  { %3007 = vmatpush1.bf16.msra.mxu1 %v3006_v58 }
 0x3f6   :  { %v1414_v23 = vpop.permute.xlu1 %1413  ;;  %v1327_v1 = vpop.permute.xlu0 %1326 }
 0x3fa   :  { %v1329_v16 = vpop.permute.xlu1 %1328  ;;  %v1343_v47 = vpop.permute.xlu0 %1342 }
 0x3fe   :  { %v1345_v32 = vpop.permute.xlu1 %1344  ;;  %v1335_v9 = vpop.permute.xlu0 %1334 }
 0x3ff   :  { %v1365_v4 = vsel %vm1354_vm15, %v1327_v1, %v1335_v9  ;;  %v1361_v29 = vsel %vm1354_vm15, %v1335_v9, %v1343_v47 }
 0x400   :  { %v1380_v7 = vmul.f32 %v2797_v6, %v1365_v4  ;;  %v1381_v34 = vmul.f32 %v2798_v0, %v1361_v29  ;;  %v4693_v29 = vpack.c.bf16 %v3758_v62, %v3750_v11  ;;  %v1420_v11 = vsel %vm1419_vm5, %v3966_v59, %v3999_v33 }
 0x402   :  { %v1337_v5 = vpop.permute.xlu1 %1336  ;;  %v1351_v57 = vpop.permute.xlu0 %1350 }
 0x403   :  { %v1366_v63 = vsel %vm1354_vm15, %v1329_v16, %v1337_v5  ;;  %v1362_v24 = vsel %vm1354_vm15, %v1337_v5, %v1345_v32  ;;  %v1357_v10 = vsel %vm1354_vm15, %v1343_v47, %v1351_v57  ;;  %v1369_v46 = vsel %vm1354_vm15, %v1351_v57, %v1327_v1 }
 0x404   :  { %v1384_v26 = vmul.f32 %v2797_v6, %v1366_v63  ;;  %v403_v5 = vadd.s32 2, %v3541_v22  ;;  %v1385_v6 = vmul.f32 %v2798_v0, %v1362_v24  ;;  %v1379_v57 = vmul.f32 %v2796_v12, %v1369_v46 }
 0x405   :  { %v1382_v15 = vmul.f32 %v2799_v60, %v1357_v10  ;;  %v402_v47 = vadd.s32 2, %v3543_v28  ;;  %v4692_v10 = vpack.c.bf16 %v3816_v8, %v3826_v42  ;;  %v1421_v8 = vsel %vm1419_vm5, %v3969_v25, %v1414_v23 }
 0x406   :  { %v1353_v18 = vpop.permute.xlu1 %1352  ;;  %v4015_v58 = vpop.permute.xlu0 %1391  ;;  %v2984_v4 = vpack.c.bf16 %v1384_v26, %v1380_v7  ;;  %vm411_vm6 = vcmp.lt.s32.totalorder %v403_v5, 128  ;;  %v4696_v5 = vpack.c.bf16 %v3824_v37, %v3838_v44  ;;  %v4697_v37 = vpack.c.bf16 %v3828_v36, %v3834_v2 }
 0x407   :  { %v1358_v63 = vsel %vm1354_vm15, %v1345_v32, %v1353_v18  ;;  %v1370_v1 = vsel %vm1354_vm15, %v1353_v18, %v1329_v16  ;;  %v3010_v32 = vpack.c.bf16 %v1385_v6, %v1381_v34  ;;  %v2801_v34 = vsel %vm409_vm4, 1.0, %v4670_v13 }
 0x408   :  { %v1383_v49 = vmul.f32 %v2796_v12, %v1370_v1  ;;  %v1386_v21 = vmul.f32 %v2799_v60, %v1358_v63  ;;  %2985 = vmatprep.subr.bf16.mxu0 %v2984_v4  ;;  %v1425_v60 = vsel %vm1419_vm5, %v3997_v41, %v3969_v25  ;;  %v2800_v12 = vsel %vm408_vm3, 1.0, %v4670_v13 }
 0x409   :  { %vm410_vm7 = vcmp.lt.s32.totalorder %v402_v47, 128  ;;  %v2803_v0 = vsel %vm411_vm6, 1.0, %v4670_v13  ;;  %v1441_v20 = vmul.f32 %v2801_v34, %v1425_v60 }
 0x40a   :  { %v2986_v9 = vpack.c.bf16 %v1383_v49, %v1379_v57  ;;  %v4023_v7 = vpop.permute.xlu1 %1393  ;;  %v1400_v26 = vpop.permute.xlu0 %1399  ;;  %v3008_v24 = vpack.c.bf16 %v1386_v21, %v1382_v15  ;;  %v1433_v49 = vsel %vm1419_vm5, %v1414_v23, %v3964_v53  ;;  %v4691_v21 = vpack.c.bf16 %v3814_v35, %v3812_v14 }
 0x40b   :  { %v1424_v15 = vsel %vm1419_vm5, %v3989_v54, %v3966_v59  ;;  %v1428_v14 = vsel %vm1419_vm5, %v3962_v38, %v3989_v54  ;;  %v1429_v35 = vsel %vm1419_vm5, %v3964_v53, %v3997_v41  ;;  %v1443_v42 = vmul.f32 %v2803_v0, %v1433_v49 }
 0x40c   :  { %2987 = vmatpush1.bf16.msra.mxu0 %v2986_v9  ;;  %3009 = vmatprep.subr.bf16.mxu1 %v3008_v24  ;;  %v1437_v54 = vmul.f32 %v2801_v34, %v1424_v15  ;;  %v2802_v18 = vsel %vm410_vm7, 1.0, %v4670_v13  ;;  %v4694_v53 = vpack.c.bf16 %v3818_v50, %v3832_v39  ;;  %v4695_v38 = vpack.c.bf16 %v3789_v51, %v3760_v48 }
 0x40d   :  { %2989 = vmatprep.subr.bf16.mxu0 %v4691_v21  ;;  %3011 = vmatpush1.bf16.msra.mxu1 %v3010_v32  ;;  %v1436_v25 = vmul.f32 %v2800_v12, %v1428_v14  ;;  %v1440_v23 = vmul.f32 %v2800_v12, %v1429_v35  ;;  %v1439_v62 = vmul.f32 %v2803_v0, %v1432_v3 }
 0x40e   :  { %v1410_v16 = vpop.permute.xlu1 %1409  ;;  %3013 = vmatprep.subr.bf16.mxu1 %v4692_v10  ;;  %v1408_v46 = vpop.permute.xlu0 %1407  ;;  %v1442_v50 = vmul.f32 %v2802_v18, %v1421_v8  ;;  %v2996_v51 = vpack.c.bf16 %v1441_v20, %v1437_v54  ;;  %v1430_v59 = vsel %vm1419_vm5, %v4015_v58, %v1400_v26  ;;  %v1438_v1 = vmul.f32 %v2802_v18, %v1420_v11 }
 0x40f   :  { %v1426_v41 = vsel %vm1419_vm5, %v1400_v26, %v1408_v46  ;;  %v3020_v44 = vpack.c.bf16 %v1443_v42, %v1439_v62  ;;  %v4698_v9 = vpack.c.bf16 %v3830_v27, %v3836_v17  ;;  %v2998_v26 = vpack.c.bf16 %v1440_v23, %v1436_v25 }
 0x410   :  { %2991 = vmatpush1.bf16.msra.mxu0 %v4693_v29  ;;  %v1445_v33 = vmul.f32 %v2801_v34, %v1426_v41  ;;  %v3022_v2 = vpack.c.bf16 %v1442_v50, %v1438_v1  ;;  %v1444_v60 = vmul.f32 %v2800_v12, %v1430_v59 }
 0x411   :  { %2993 = vmatprep.subr.bf16.mxu0 %v4694_v53  ;;  %3015 = vmatpush1.bf16.msra.mxu1 %v4695_v38 }
 0x412   :  { %v1402_v4 = vpop.permute.xlu1 %1401  ;;  %3017 = vmatprep.subr.bf16.mxu1 %v4696_v5  ;;  %v1416_v6 = vpop.permute.xlu0 %1415 }
 0x413   :  { %v1427_v39 = vsel %vm1419_vm5, %v1402_v4, %v1410_v16  ;;  %v1431_v48 = vsel %vm1419_vm5, %v4023_v7, %v1402_v4  ;;  %v1422_v57 = vsel %vm1419_vm5, %v1408_v46, %v1416_v6  ;;  %v1434_v47 = vsel %vm1419_vm5, %v1416_v6, %v4015_v58 }
 0x414   :  { %v1449_v63 = vmul.f32 %v2801_v34, %v1427_v39  ;;  %2995 = vmatpush1.bf16.msra.mxu0 %v4697_v37  ;;  %v1448_v24 = vmul.f32 %v2800_v12, %v1431_v48  ;;  %v1446_v58 = vmul.f32 %v2802_v18, %v1422_v57  ;;  %v1447_v34 = vmul.f32 %v2803_v0, %v1434_v47  ;;  %v2836_v12 = vld [vmem:[%s4625_s5 + $0x20] sm:$0xff] }
 0x415   :  { %2997 = vmatprep.subr.bf16.mxu0 %v2996_v51  ;;  %3019 = vmatpush1.bf16.msra.mxu1 %v4698_v9 }
 0x416   :  { %v1418_v32 = vpop.permute.xlu1 %1417  ;;  %3021 = vmatprep.subr.bf16.mxu1 %v3020_v44  ;;  %v3000_v36 = vpack.c.bf16 %v1449_v63, %v1445_v33  ;;  %v3002_v27 = vpack.c.bf16 %v1448_v24, %v1444_v60 }
 0x417   :  { %v1423_v49 = vsel %vm1419_vm5, %v1410_v16, %v1418_v32  ;;  %v1435_v21 = vsel %vm1419_vm5, %v1418_v32, %v4023_v7  ;;  %v2837_v7 = vld [vmem:[%s4625_s5 + $0x28] sm:$0xff]  ;;  %v2839_v16 = vld [vmem:[%s4625_s5 + $0x38] sm:$0xff] }
 0x418   :  { %v1450_v15 = vmul.f32 %v2802_v18, %v1423_v49  ;;  %v1451_v10 = vmul.f32 %v2803_v0, %v1435_v21  ;;  %2999 = vmatpush1.bf16.msra.mxu0 %v2998_v26  ;;  %v2838_v0 = vld [vmem:[%s4625_s5 + $0x30] sm:$0xff] }
 0x419   :  { %3001 = vmatprep.subr.bf16.mxu0 %v3000_v36  ;;  %3023 = vmatpush1.bf16.msra.mxu1 %v3022_v2 }
 0x41a   :  { %v3026_v17 = vpack.c.bf16 %v1450_v15, %v1446_v58  ;;  %v3024_v46 = vpack.c.bf16 %v1451_v10, %v1447_v34 }
 0x41c   :  { %3003 = vmatpush1.bf16.msra.mxu0 %v3002_v27  ;;  %3025 = vmatprep.subr.bf16.mxu1 %v3024_v46 }
 0x41d   :  { %3027 = vmatpush1.bf16.msra.mxu1 %v3026_v17 }
 0x41f   :  { %2840 = vmatmul.mubr.msk.f32.vlgmr.msra.gmra.mrb[24].mxu0 %vm702_vm12, %v2836_v12 }
 0x420   :  { %2844 = vmatmul.mubr.msk.f32.vlgmr.msra.gmra.mrb[24].mxu1 %vm702_vm12, %v2836_v12  ;;  %1539 = vmatprep.mubr.f32.mxu0 %v4670_v13 }
 0x421   :  { %1628 = vmatprep.mubr.f32.mxu1 %v4670_v13 }
 0x423   :  { %2841 = vmatmul.mubr.msk.f32.gmra.mrb[26].mxu0 %vm702_vm12, %v2837_v7  ;;  %v1655_v14 = vpop.permute.xlu0 %1654 }
 0x424   :  { %2845 = vmatmul.mubr.msk.f32.gmra.mrb[26].mxu1 %vm702_vm12, %v2837_v7  ;;  %1545 = vmatprep.mubr.f32.mxu0 %v4670_v13 }
 0x425   :  { %1634 = vmatprep.mubr.f32.mxu1 %v4670_v13 }
 0x427   :  { %2842 = vmatmul.mubr.msk.f32.gmra.mrb[28].mxu0 %vm702_vm12, %v2838_v0  ;;  %v1660_v35 = vpop.permute.xlu1 %1659  ;;  %v1696_v20 = vpop.permute.xlu0 %1695 }
 0x428   :  { %2846 = vmatmul.mubr.msk.f32.gmra.mrb[28].mxu1 %vm702_vm12, %v2838_v0  ;;  %1551 = vmatprep.mubr.f32.mxu0 %v4670_v13 }
 0x429   :  { %1640 = vmatprep.mubr.f32.mxu1 %v4670_v13 }
 0x42b   :  { %2843 = vmatmul.mubr.msk.f32.gmra.mrb[30].mxu0 %vm702_vm12, %v2839_v16  ;;  %v1701_v54 = vpop.permute.xlu1 %1700  ;;  %v1665_v50 = vpop.permute.xlu0 %1664 }
 0x42c   :  { %2847 = vmatmul.mubr.msk.f32.gmra.mrb[30].mxu1 %vm702_vm12, %v2839_v16  ;;  %1851 = vmatprep.mubr.f32.mxu0 %v4670_v13 }
 0x42d   :  { %1940 = vmatprep.mubr.f32.mxu1 %v4670_v13 }
 0x42f   :  { %v1670_v37 = vpop.permute.xlu1 %1669  ;;  %v1706_v12 = vpop.permute.xlu0 %1705 }
 0x4f2   :  { %v1535_v3 = vpop.f32.mrb[24].mxu0 }
 0x4f3   :  { %v1672_v8 = vmul.f32 %v1655_v14, %v1535_v3  ;;  %v1537_v42 = vpop.f32.mrb[25].mxu0  ;;  %v1624_v29 = vpop.f32.mrb[24].mxu1 }
 0x4f4   :  { %v1673_v18 = vmul.f32 %v1655_v14, %v1537_v42  ;;  %v1674_v41 = vmul.f32 %v1655_v14, %v1624_v29  ;;  %v1626_v53 = vpop.f32.mrb[25].mxu1  ;;  %v1711_v42 = vpop.permute.xlu1 %1710 }
 0x4f5   :  { %v1675_v38 = vmul.f32 %v1655_v14, %v1626_v53  ;;  %v1713_v25 = vadd.f32 %v1696_v20, %v1672_v8 }
 0x4f6   :  { %v1714_v23 = vadd.f32 %v1696_v20, %v1673_v18  ;;  %v1541_v11 = vpop.f32.mrb[26].mxu0  ;;  %v1715_v62 = vadd.f32 %v1696_v20, %v1674_v41 }
 0x4f7   :  { %v1676_v4 = vmul.f32 %v1660_v35, %v1541_v11  ;;  %v1543_v5 = vpop.f32.mrb[27].mxu0  ;;  %v1630_v6 = vpop.f32.mrb[26].mxu1  ;;  %v1716_v59 = vadd.f32 %v1696_v20, %v1675_v38  ;;  %v1729_v44 = vmax.f32 %v1713_v25, 0.0 }
 0x4f8   :  { %v1677_v39 = vmul.f32 %v1660_v35, %v1543_v5  ;;  %v1678_v48 = vmul.f32 %v1660_v35, %v1630_v6  ;;  %v1632_v51 = vpop.f32.mrb[27].mxu1  ;;  %v1730_v1 = vmax.f32 %v1714_v23, 0.0  ;;  %v1731_v26 = vmax.f32 %v1715_v62, 0.0 }
 0x4f9   :  { %v1717_v33 = vadd.f32 %v1701_v54, %v1676_v4  ;;  %v1679_v63 = vmul.f32 %v1660_v35, %v1632_v51  ;;  %v1732_v10 = vmax.f32 %v1716_v59, 0.0 }
 0x4fa   :  { %v1718_v57 = vadd.f32 %v1701_v54, %v1677_v39  ;;  %v1719_v47 = vadd.f32 %v1701_v54, %v1678_v48  ;;  %v1547_v9 = vpop.f32.mrb[28].mxu0 }
 0x4fb   :  { %v1733_v24 = vmax.f32 %v1717_v33, 0.0  ;;  %v1720_v32 = vadd.f32 %v1701_v54, %v1679_v63  ;;  %v1680_v36 = vmul.f32 %v1665_v50, %v1547_v9  ;;  %v1549_v2 = vpop.f32.mrb[29].mxu0  ;;  %v1636_v60 = vpop.f32.mrb[28].mxu1  ;;  %v2858_v9 = vld [vmem:[%s4628_s8 + $0x30] sm:$0xff] }
 0x4fc   :  { %v1734_v49 = vmax.f32 %v1718_v57, 0.0  ;;  %v1735_v21 = vmax.f32 %v1719_v47, 0.0  ;;  %v1681_v58 = vmul.f32 %v1665_v50, %v1549_v2  ;;  %v1682_v34 = vmul.f32 %v1665_v50, %v1636_v60  ;;  %v1638_v15 = vpop.f32.mrb[29].mxu1  ;;  %v2857_v47 = vld [vmem:[%s4628_s8 + $0x28] sm:$0xff] }
 0x4fd   :  { %v3030_v27 = vpack.c.bf16 %v1733_v24, %v1729_v44  ;;  %v1736_v17 = vmax.f32 %v1720_v32, 0.0  ;;  %v1683_v46 = vmul.f32 %v1665_v50, %v1638_v15  ;;  %v1721_v14 = vadd.f32 %v1706_v12, %v1680_v36  ;;  %v1758_v24 = vpop.permute.xlu0 %1757  ;;  %v1763_v32 = vpop.permute.xlu1 %1762 }
 0x4fe   :  { %v3038_v7 = vpack.c.bf16 %v1735_v21, %v1731_v26  ;;  %v1553_v0 = vpop.f32.mrb[30].mxu0  ;;  %v3028_v16 = vpack.c.bf16 %v1734_v49, %v1730_v1  ;;  %v1722_v29 = vadd.f32 %v1706_v12, %v1681_v58  ;;  %v1723_v54 = vadd.f32 %v1706_v12, %v1682_v34  ;;  %v2859_v26 = vld [vmem:[%s4628_s8 + $0x38] sm:$0xff] }
 0x4ff   :  { %v1684_v35 = vmul.f32 %v1670_v37, %v1553_v0  ;;  %v1555_v20 = vpop.f32.mrb[31].mxu0  ;;  %v1642_v3 = vpop.f32.mrb[30].mxu1  ;;  %v3036_v8 = vpack.c.bf16 %v1736_v17, %v1732_v10  ;;  %v1724_v38 = vadd.f32 %v1706_v12, %v1683_v46  ;;  %v1737_v4 = vmax.f32 %v1721_v14, 0.0 }
 0x500   :  { %v1685_v18 = vmul.f32 %v1670_v37, %v1555_v20  ;;  %v1686_v41 = vmul.f32 %v1670_v37, %v1642_v3  ;;  %v1644_v53 = vpop.f32.mrb[31].mxu1  ;;  %3029 = vmatprep.subr.bf16.mxu0 %v3028_v16  ;;  %v1738_v50 = vmax.f32 %v1722_v29, 0.0  ;;  %v1739_v39 = vmax.f32 %v1723_v54, 0.0  ;;  %v4699_v16 = vld [vmem:[#allocation17_spill] sm:$0xff] }
 0x501   :  { %v1725_v25 = vadd.f32 %v1711_v42, %v1684_v35  ;;  %v1687_v23 = vmul.f32 %v1670_v37, %v1644_v53  ;;  %3031 = vmatpush1.bf16.msra.mxu0 %v3030_v27  ;;  %3037 = vmatprep.subr.bf16.mxu1 %v3036_v8  ;;  %v1740_v59 = vmax.f32 %v1724_v38, 0.0  ;;  %v2856_v37 = vld [vmem:[%s4628_s8 + $0x20] sm:$0xff]  ;;  %v4160_v36 = vpop.permute.xlu0 %1988  ;;  %v4162_v2 = vpop.permute.xlu1 %1993  ;;  %v1208_v58 = vadd.f32 %v3736_v43, %v3291_v30  ;;  %v4700_v43 = vld [vmem:[#allocation6_spill] sm:$0xff]  ;;  %v4704_v38 = vld [vmem:[#allocation7_spill] sm:$0xff] }
 0x502   :  { %v1726_v11 = vadd.f32 %v1711_v42, %v1685_v18  ;;  %v1727_v62 = vadd.f32 %v1711_v42, %v1686_v41  ;;  %3039 = vmatpush1.bf16.msra.mxu1 %v3038_v7  ;;  %v1209_v34 = vadd.f32 %v3754_v19, %v3318_v55  ;;  %v1210_v17 = vadd.f32 %v3738_v56, %v3293_v31  ;;  %v4701_v19 = vld [vmem:[#allocation19_spill] sm:$0xff]  ;;  %v4702_v8 = vld [vmem:[#allocation5_spill] sm:$0xff] }
 0x503   :  { %v1741_v5 = vmax.f32 %v1725_v25, 0.0  ;;  %v1728_v6 = vadd.f32 %v1711_v42, %v1687_v23  ;;  %v1211_v46 = vadd.f32 %v3767_v52, %v3327_v61  ;;  %v1212_v14 = vadd.f32 %v4699_v16, %v3303_v40  ;;  %v4703_v42 = vld [vmem:[#allocation18_spill] sm:$0xff]  ;;  %v4705_v25 = vld [vmem:[#allocation20_spill] sm:$0xff] }
 0x504   :  { %v1742_v48 = vmax.f32 %v1726_v11, 0.0  ;;  %v1743_v51 = vmax.f32 %v1727_v62, 0.0  ;;  %v1213_v20 = vadd.f32 %v4701_v19, %v4700_v43  ;;  %v1214_v40 = vadd.f32 %v4703_v42, %v4702_v8 }
 0x505   :  { %v3034_v33 = vpack.c.bf16 %v1741_v5, %v1737_v4  ;;  %v1744_v63 = vmax.f32 %v1728_v6, 0.0  ;;  %v1768_v60 = vpop.permute.xlu0 %1767  ;;  %v4164_v49 = vpop.permute.xlu1 %1772  ;;  %v1215_v23 = vadd.f32 %v4705_v25, %v4704_v38 }
 0x506   :  { %v3042_v44 = vpack.c.bf16 %v1743_v51, %v1739_v39  ;;  %v3032_v1 = vpack.c.bf16 %v1742_v48, %v1738_v50  ;;  %v4706_v50 = vld [vmem:[#allocation8_spill] sm:$0xff]  ;;  %v4707_v39 = vld [vmem:[#allocation21_spill] sm:$0xff] }
 0x507   :  { %v3040_v57 = vpack.c.bf16 %v1744_v63, %v1740_v59  ;;  %v1216_v48 = vadd.f32 %v4707_v39, %v4706_v50  ;;  %v4708_v63 = vld [vmem:[#allocation9_spill] sm:$0xff]  ;;  %v4723_v39 = vld [vmem:[#allocation15_spill] sm:$0xff] }
 0x508   :  { %3033 = vmatprep.subr.bf16.mxu0 %v3032_v1 }
 0x509   :  { %3035 = vmatpush1.bf16.msra.mxu0 %v3034_v33  ;;  %3041 = vmatprep.subr.bf16.mxu1 %v3040_v57  ;;  %v4181_v3 = vpop.permute.xlu0 %2029  ;;  %v2035_v11 = vpop.permute.xlu1 %2034  ;;  %v4710_v57 = vld [vmem:[#allocation12_spill] sm:$0xff] }
 0x50a   :  { %3043 = vmatpush1.bf16.msra.mxu1 %v3042_v44  ;;  %v4709_v44 = vld [vmem:[#allocation22_spill] sm:$0xff] }
 0x50b   :  { %v1217_v1 = vadd.f32 %v4709_v44, %v4708_v63 }
 0x50c   :  { %2864 = vmatmul.mubr.msk.f32.vlgmr.msra.gmra.mrb[32].mxu0 %vm1017_vm13, %v2856_v37 }
 0x50d   :  { %2868 = vmatmul.mubr.msk.f32.vlgmr.msra.gmra.mrb[32].mxu1 %vm1017_vm13, %v2856_v37  ;;  %1857 = vmatprep.mubr.f32.mxu0 %v4670_v13  ;;  %v4711_v37 = vld [vmem:[#allocation26_spill] sm:$0xff]  ;;  %v1999_v63 = vpop.permute.xlu0 %1998 }
 0x50e   :  { %1946 = vmatprep.mubr.f32.mxu1 %v4670_v13 }
 0x510   :  { %2865 = vmatmul.mubr.msk.f32.gmra.mrb[34].mxu0 %vm1017_vm13, %v2857_v47 }
 0x511   :  { %2869 = vmatmul.mubr.msk.f32.gmra.mrb[34].mxu1 %vm1017_vm13, %v2857_v47  ;;  %1863 = vmatprep.mubr.f32.mxu0 %v4670_v13  ;;  %v1218_v47 = vadd.f32 %v4711_v37, %v4710_v57 }
 0x512   :  { %1952 = vmatprep.mubr.f32.mxu1 %v4670_v13 }
 0x514   :  { %2866 = vmatmul.mubr.msk.f32.gmra.mrb[36].mxu0 %vm1017_vm13, %v2858_v9 }
 0x515   :  { %2870 = vmatmul.mubr.msk.f32.gmra.mrb[36].mxu1 %vm1017_vm13, %v2858_v9  ;;  %1869 = vmatprep.mubr.f32.mxu0 %v4670_v13  ;;  %v4712_v9 = vld [vmem:[#allocation13_spill] sm:$0xff] }
 0x516   :  { %1958 = vmatprep.mubr.f32.mxu1 %v4670_v13 }
 0x518   :  { %2867 = vmatmul.mubr.msk.f32.gmra.mrb[38].mxu0 %vm1017_vm13, %v2859_v26 }
 0x519   :  { %2871 = vmatmul.mubr.msk.f32.gmra.mrb[38].mxu1 %vm1017_vm13, %v2859_v26  ;;  %2290 = vmatprep.mubr.f32.mxu0 %v4670_v13  ;;  %v4713_v26 = vld [vmem:[#allocation27_spill] sm:$0xff] }
 0x51a   :  { %2379 = vmatprep.mubr.f32.mxu1 %v4670_v13 }
 0x5df   :  { %v1853_v21 = vpop.f32.mrb[32].mxu0 }
 0x5e0   :  { %v1854_v15 = vadd.f32 %v1853_v21, %v1758_v24  ;;  %v1855_v10 = vpop.f32.mrb[33].mxu0  ;;  %v1942_v27 = vpop.f32.mrb[32].mxu1 }
 0x5e1   :  { %v1856_v12 = vadd.f32 %v1855_v10, %v1758_v24  ;;  %v1943_v7 = vadd.f32 %v1942_v27, %v1758_v24  ;;  %v1944_v0 = vpop.f32.mrb[33].mxu1 }
 0x5e2   :  { %v4176_v35 = vadd.f32 %v1854_v15, %v1208_v58  ;;  %v2006_v30 = vmul.f32 %v4160_v36, %v1854_v15  ;;  %v1945_v55 = vadd.f32 %v1944_v0, %v1758_v24  ;;  %v1219_v24 = vadd.f32 %v4713_v26, %v4712_v9 }
 0x5e3   :  { %v4183_v31 = vadd.f32 %v1856_v12, %v1209_v34  ;;  %v4185_v56 = vadd.f32 %v1943_v7, %v1210_v17  ;;  %v2008_v61 = vmul.f32 %v4160_v36, %v1943_v7  ;;  %v1859_v52 = vpop.f32.mrb[34].mxu0  ;;  %v2007_v34 = vmul.f32 %v4160_v36, %v1856_v12 }
 0x5e4   :  { %v2047_v29 = vadd.f32 %v4181_v3, %v2006_v30  ;;  %v4191_v54 = vadd.f32 %v1945_v55, %v1211_v46  ;;  %v1860_v18 = vadd.f32 %v1859_v52, %v1763_v32  ;;  %v1861_v41 = vpop.f32.mrb[35].mxu0  ;;  %v1948_v53 = vpop.f32.mrb[34].mxu1  ;;  %v2009_v52 = vmul.f32 %v4160_v36, %v1945_v55  ;;  %v4717_v36 = vld [vmem:[#allocation14_spill] sm:$0xff] }
 0x5e5   :  { %v2049_v62 = vadd.f32 %v4181_v3, %v2008_v61  ;;  %v1862_v4 = vadd.f32 %v1861_v41, %v1763_v32  ;;  %v1949_v5 = vadd.f32 %v1948_v53, %v1763_v32  ;;  %v1950_v6 = vpop.f32.mrb[35].mxu1  ;;  %v2004_v61 = vpop.permute.xlu1 %2003  ;;  %v2048_v44 = vadd.f32 %v4181_v3, %v2007_v34 }
 0x5e6   :  { %v4198_v51 = vmax.f32 %v2047_v29, 0.0  ;;  %v4200_v59 = vadd.f32 %v1860_v18, %v1212_v14  ;;  %v2010_v33 = vmul.f32 %v4162_v2, %v1860_v18  ;;  %v1951_v0 = vadd.f32 %v1950_v6, %v1763_v32  ;;  %v4714_v18 = vld [vmem:[#allocation10_spill] sm:$0xff]  ;;  %v4715_v32 = vld [vmem:[#allocation23_spill] sm:$0xff] }
 0x5e7   :  { %v4209_v21 = vadd.f32 %v1862_v4, %v1213_v20  ;;  %v1865_v58 = vpop.f32.mrb[36].mxu0  ;;  %v4212_v10 = vadd.f32 %v1949_v5, %v1214_v40  ;;  %v2012_v27 = vmul.f32 %v4162_v2, %v1949_v5  ;;  %v4217_v7 = vmax.f32 %v2049_v62, 0.0 }
 0x5e8   :  { %v2051_v15 = vadd.f32 %v2035_v11, %v2010_v33  ;;  %v1867_v17 = vpop.f32.mrb[37].mxu0  ;;  %v1954_v46 = vpop.f32.mrb[36].mxu1  ;;  %2079 = vrot.lane.b32.xlu0 %v4198_v51, %s3151_s28  ;;  %v1866_v16 = vadd.f32 %v1865_v58, %v1768_v60  ;;  %v2011_v8 = vmul.f32 %v4162_v2, %v1862_v4  ;;  %v4223_v42 = vadd.f32 %v1951_v0, %v1215_v23  ;;  %v4719_v23 = vld [vmem:[#allocation11_spill] sm:$0xff]  ;;  %v4720_v4 = vld [vmem:[#allocation25_spill] sm:$0xff] }
 0x5e9   :  { %v1868_v14 = vadd.f32 %v1867_v17, %v1768_v60  ;;  %v1956_v30 = vpop.f32.mrb[37].mxu1  ;;  %v2053_v12 = vadd.f32 %v2035_v11, %v2012_v27  ;;  %v1955_v19 = vadd.f32 %v1954_v46, %v1768_v60  ;;  %v1220_v41 = vadd.f32 %v4715_v32, %v4714_v18  ;;  %v2045_v46 = vpop.permute.xlu1 %2044 }
 0x5ea   :  { %v4219_v43 = vmax.f32 %v2051_v15, 0.0  ;;  %v1957_v20 = vadd.f32 %v1956_v30, %v1768_v60  ;;  %v4225_v40 = vadd.f32 %v1866_v16, %v1216_v48  ;;  %v2013_v53 = vmul.f32 %v4162_v2, %v1951_v0  ;;  %v4718_v60 = vld [vmem:[#allocation24_spill] sm:$0xff] }
 0x5eb   :  { %v1871_v29 = vpop.f32.mrb[38].mxu0  ;;  %v4230_v38 = vadd.f32 %v1868_v14, %v1217_v1  ;;  %v1221_v55 = vadd.f32 %v4718_v60, %v4717_v36  ;;  %v1222_v5 = vadd.f32 %v4720_v4, %v4719_v23  ;;  %v4240_v6 = vadd.f32 %v1955_v19, %v1218_v47  ;;  %v4724_v48 = vld [vmem:[#allocation28_spill] sm:$0xff] }
 0x5ec   :  { %v1873_v25 = vpop.f32.mrb[39].mxu0  ;;  %v1960_v62 = vpop.f32.mrb[38].mxu1  ;;  %2081 = vrot.lane.b32.xlu1 %v4219_v43, %s3151_s28  ;;  %2095 = vrot.lane.b32.xlu0 %v4217_v7, %s3151_s28  ;;  %v4242_v50 = vadd.f32 %v1957_v20, %v1219_v24  ;;  %v1223_v33 = vadd.f32 %v4724_v48, %v4723_v39  ;;  %v4247_v1 = vmax.f32 %v2053_v12, 0.0  ;;  %v1872_v57 = vadd.f32 %v1871_v29, %v4164_v49 }
 0x5ed   :  { %4716 = vst [vmem:[#allocation17_spill] sm:$0xff] %v4230_v38  ;;  %4721 = vst [vmem:[#allocation6_spill] sm:$0xff] %v4240_v6  ;;  %v1962_v2 = vpop.f32.mrb[39].mxu1  ;;  %v2050_v37 = vadd.f32 %v4181_v3, %v2009_v52  ;;  %v2052_v9 = vadd.f32 %v2035_v11, %v2011_v8  ;;  %v1874_v26 = vadd.f32 %v1873_v25, %v4164_v49  ;;  %v2040_v29 = vpop.permute.xlu0 %2039 }
 0x5ee   :  { %4722 = vst [vmem:[#allocation19_spill] sm:$0xff] %v4242_v50  ;;  %v1961_v47 = vadd.f32 %v1960_v62, %v4164_v49  ;;  %v2054_v24 = vadd.f32 %v2035_v11, %v2013_v53  ;;  %v2014_v58 = vmul.f32 %v1999_v63, %v1866_v16  ;;  %v4253_v15 = vadd.f32 %v1872_v57, %v1220_v41 }
 0x5ef   :  { %v2015_v34 = vmul.f32 %v1999_v63, %v1868_v14  ;;  %v2018_v27 = vmul.f32 %v2004_v61, %v1872_v57  ;;  %v4259_v17 = vadd.f32 %v1874_v26, %v1221_v55  ;;  %v2019_v3 = vmul.f32 %v2004_v61, %v1874_v26 }
 0x5f0   :  { %4725 = vst [vmem:[#allocation5_spill] sm:$0xff] %v4253_v15  ;;  %2097 = vrot.lane.b32.xlu1 %v4247_v1, %s3151_s28  ;;  %2144 = vrot.lane.b32.xlu0 %v4198_v51, %s3152_s29  ;;  %v2017_v0 = vmul.f32 %v1999_v63, %v1957_v20  ;;  %v4261_v30 = vadd.f32 %v1961_v47, %v1222_v5  ;;  %v4264_v12 = vmax.f32 %v2052_v9, 0.0  ;;  %v4266_v18 = vmax.f32 %v2054_v24, 0.0  ;;  %v2892_v24 = vld [vmem:[%s4626_s6 + $0x40] sm:$0xff] }
 0x5f1   :  { %4726 = vst [vmem:[#allocation18_spill] sm:$0xff] %v4259_v17  ;;  %v2020_v11 = vmul.f32 %v2004_v61, %v1961_v47  ;;  %v1963_v16 = vadd.f32 %v1962_v2, %v4164_v49  ;;  %v2016_v52 = vmul.f32 %v1999_v63, %v1955_v19  ;;  %v2060_v8 = vadd.f32 %v2045_v46, %v2019_v3  ;;  %v2894_v3 = vld [vmem:[%s4626_s6 + $0x50] sm:$0xff] }
 0x5f2   :  { %4727 = vst [vmem:[#allocation7_spill] sm:$0xff] %v4261_v30  ;;  %v2059_v32 = vadd.f32 %v2045_v46, %v2018_v27  ;;  %v4274_v20 = vmax.f32 %v2048_v44, 0.0  ;;  %v2056_v49 = vadd.f32 %v2040_v29, %v2015_v34  ;;  %v4276_v25 = vmax.f32 %v2050_v37, 0.0  ;;  %v2896_v34 = vld [vmem:[%s4627_s7 + $0x40] sm:$0xff]  ;;  %v2897_v27 = vld [vmem:[%s4627_s7 + $0x48] sm:$0xff] }
 0x5f3   :  { %v4268_v14 = vadd.f32 %v1963_v16, %v1223_v33  ;;  %v2021_v41 = vmul.f32 %v2004_v61, %v1963_v16  ;;  %v2061_v53 = vadd.f32 %v2045_v46, %v2020_v11  ;;  %v2055_v19 = vadd.f32 %v2040_v29, %v2014_v58  ;;  %v2893_v58 = vld [vmem:[%s4626_s6 + $0x48] sm:$0xff]  ;;  %v2899_v11 = vld [vmem:[%s4627_s7 + $0x58] sm:$0xff]  ;;  %v2904_v16 = vld [vmem:[%s4629_s9 + $0x40] sm:$0xff] }
 0x5f4   :  { %2146 = vrot.lane.b32.xlu1 %v4219_v43, %s3152_s29  ;;  %2160 = vrot.lane.b32.xlu0 %v4217_v7, %s3152_s29  ;;  %v2058_v62 = vadd.f32 %v2040_v29, %v2017_v0  ;;  %v2057_v60 = vadd.f32 %v2040_v29, %v2016_v52  ;;  %v4278_v55 = vmax.f32 %v2060_v8, 0.0  ;;  %v4280_v23 = vmax.f32 %v2059_v32, 0.0  ;;  %v2898_v0 = vld [vmem:[%s4627_s7 + $0x50] sm:$0xff]  ;;  %v2905_v52 = vld [vmem:[%s4629_s9 + $0x48] sm:$0xff] }
 0x5f5   :  { %4728 = vst [vmem:[#allocation20_spill] sm:$0xff] %v4268_v14  ;;  %v2062_v36 = vadd.f32 %v2045_v46, %v2021_v41  ;;  %v4292_v2 = vmax.f32 %v2056_v49, 0.0  ;;  %v4294_v39 = vmax.f32 %v2061_v53, 0.0  ;;  %v4296_v48 = vmax.f32 %v2055_v19, 0.0  ;;  %v2895_v46 = vld [vmem:[%s4626_s6 + $0x58] sm:$0xff]  ;;  %v2906_v8 = vld [vmem:[%s4629_s9 + $0x50] sm:$0xff] }
 0x5f6   :  { %v4298_v33 = vmax.f32 %v2058_v62, 0.0  ;;  %v4300_v63 = vmax.f32 %v2057_v60, 0.0  ;;  %v2907_v29 = vld [vmem:[%s4629_s9 + $0x58] sm:$0xff] }
 0x5f7   :  { %v4282_v61 = vmax.f32 %v2062_v36, 0.0  ;;  %v4729_v60 = vld [vmem:[#allocation16_spill] sm:$0xff] }
 0x5f8   :  { %2162 = vrot.lane.b32.xlu1 %v4247_v1, %s3152_s29  ;;  %2087 = vrot.lane.b32.xlu0 %v4274_v20, %s3151_s28 }
 0x5fc   :  { %2089 = vrot.lane.b32.xlu1 %v4264_v12, %s3151_s28  ;;  %2103 = vrot.lane.b32.xlu0 %v4276_v25, %s3151_s28 }
 0x600   :  { %2105 = vrot.lane.b32.xlu1 %v4266_v18, %s3151_s28  ;;  %2152 = vrot.lane.b32.xlu0 %v4274_v20, %s3152_s29 }
 0x604   :  { %2154 = vrot.lane.b32.xlu1 %v4264_v12, %s3152_s29  ;;  %2168 = vrot.lane.b32.xlu0 %v4276_v25, %s3152_s29 }
 0x608   :  { %2170 = vrot.lane.b32.xlu1 %v4266_v18, %s3152_s29  ;;  %2083 = vrot.lane.b32.xlu0 %v4296_v48, %s3151_s28 }
 0x60c   :  { %2085 = vrot.lane.b32.xlu1 %v4280_v23, %s3151_s28  ;;  %2099 = vrot.lane.b32.xlu0 %v4300_v63, %s3151_s28 }
 0x610   :  { %2101 = vrot.lane.b32.xlu1 %v4294_v39, %s3151_s28  ;;  %2091 = vrot.lane.b32.xlu0 %v4292_v2, %s3151_s28 }
 0x614   :  { %2093 = vrot.lane.b32.xlu1 %v4278_v55, %s3151_s28  ;;  %2107 = vrot.lane.b32.xlu0 %v4298_v33, %s3151_s28 }
 0x618   :  { %2109 = vrot.lane.b32.xlu1 %v4282_v61, %s3151_s28  ;;  %2148 = vrot.lane.b32.xlu0 %v4296_v48, %s3152_s29 }
 0x61c   :  { %2150 = vrot.lane.b32.xlu1 %v4280_v23, %s3152_s29  ;;  %2156 = vrot.lane.b32.xlu0 %v4292_v2, %s3152_s29 }
 0x620   :  { %2166 = vrot.lane.b32.xlu1 %v4294_v39, %s3152_s29  ;;  %2164 = vrot.lane.b32.xlu0 %v4300_v63, %s3152_s29 }
 0x624   :  { %2158 = vrot.lane.b32.xlu1 %v4278_v55, %s3152_s29  ;;  %2172 = vrot.lane.b32.xlu0 %v4298_v33, %s3152_s29 }
 0x628   :  { %2174 = vrot.lane.b32.xlu1 %v4282_v61, %s3152_s29  ;;  %2411 = vperm.xlu0 %3119, %v2892_v24   ;;  %v425_v24 = vadd.s32 4294967292, %v4729_v60 }
 0x62a   :  { %vm429_vm8 = vcmp.ge.s32.totalorder %v425_v24, 0 }
 0x62c   :  { %2416 = vperm.xlu1 %3120, %v2893_v58   ;;  %2452 = vperm.xlu0 %3119, %v2896_v34  }
 0x630   :  { %2457 = vperm.xlu1 %3120, %v2897_v27   ;;  %2421 = vperm.xlu0 %3119, %v2894_v3   ;;  %v424_v27 = vadd.s32 4294967292, %v3527_v45  ;;  %v427_v3 = vadd.s32 4294967292, %v3541_v22 }
 0x632   :  { %vm428_vm10 = vcmp.ge.s32.totalorder %v424_v27, 0  ;;  %vm431_vm11 = vcmp.ge.s32.totalorder %v427_v3, 0 }
 0x633   :  { %v2804_v26 = vsel %vm428_vm10, 1.0, %v4670_v13  ;;  %v2807_v9 = vsel %vm431_vm11, 1.0, %v4670_v13 }
 0x634   :  { %2426 = vperm.xlu1 %3120, %v2895_v46   ;;  %2462 = vperm.xlu0 %3119, %v2898_v0   ;;  %v426_v46 = vadd.s32 4294967292, %v3543_v28  ;;  %v2805_v0 = vsel %vm429_vm8, 1.0, %v4670_v13 }
 0x636   :  { %vm430_vm14 = vcmp.ge.s32.totalorder %v426_v46, 0 }
 0x637   :  { %v2806_v3 = vsel %vm430_vm14, 1.0, %v4670_v13 }
 0x638   :  { %2467 = vperm.xlu1 %3120, %v2899_v11   ;;  %2514 = vperm.xlu0 %3119, %v2904_v16  }
 0x63c   :  { %2519 = vperm.xlu1 %3120, %v2905_v52   ;;  %2524 = vperm.xlu0 %3119, %v2906_v8  }
 0x640   :  { %2529 = vperm.xlu1 %3120, %v2907_v29  }
 0x65a   :  { %v2080_v32 = vpop.permute.xlu0 %2079 }
 0x65e   :  { %v2082_v41 = vpop.permute.xlu1 %2081  ;;  %v2096_v49 = vpop.permute.xlu0 %2095 }
 0x662   :  { %v2098_v53 = vpop.permute.xlu1 %2097  ;;  %v4396_v19 = vpop.permute.xlu0 %2144 }
 0x666   :  { %v4398_v62 = vpop.permute.xlu1 %2146  ;;  %v4400_v36 = vpop.permute.xlu0 %2160 }
 0x66a   :  { %v4403_v58 = vpop.permute.xlu1 %2162  ;;  %v2088_v34 = vpop.permute.xlu0 %2087 }
 0x66b   :  { %v2120_v11 = vsel %vm2111_vm9, %v2080_v32, %v2088_v34 }
 0x66c   :  { %v2129_v29 = vmul.f32 %v2805_v0, %v2120_v11 }
 0x66e   :  { %v2090_v16 = vpop.permute.xlu1 %2089  ;;  %v2104_v52 = vpop.permute.xlu0 %2103 }
 0x66f   :  { %v2121_v8 = vsel %vm2111_vm9, %v2082_v41, %v2090_v16  ;;  %v2117_v24 = vsel %vm2111_vm9, %v2090_v16, %v2098_v53  ;;  %v2112_v37 = vsel %vm2111_vm9, %v2096_v49, %v2104_v52  ;;  %v2124_v27 = vsel %vm2111_vm9, %v2104_v52, %v2080_v32 }
 0x670   :  { %v2133_v47 = vmul.f32 %v2805_v0, %v2121_v8  ;;  %v2116_v16 = vsel %vm2111_vm9, %v2088_v34, %v2096_v49  ;;  %v2134_v8 = vmul.f32 %v2806_v3, %v2117_v24  ;;  %v2128_v4 = vmul.f32 %v2804_v26, %v2124_v27 }
 0x671   :  { %v2131_v14 = vmul.f32 %v2807_v9, %v2112_v37  ;;  %v2130_v52 = vmul.f32 %v2806_v3, %v2116_v16 }
 0x672   :  { %v2106_v46 = vpop.permute.xlu1 %2105  ;;  %v4423_v57 = vpop.permute.xlu0 %2152  ;;  %v3044_v11 = vpack.c.bf16 %v2133_v47, %v2129_v29 }
 0x673   :  { %v2113_v44 = vsel %vm2111_vm9, %v2098_v53, %v2106_v46  ;;  %v2125_v5 = vsel %vm2111_vm9, %v2106_v46, %v2082_v41  ;;  %v3070_v49 = vpack.c.bf16 %v2134_v8, %v2130_v52  ;;  %v448_v8 = vadd.s32 4, %v3527_v45  ;;  %v2881_v45 = vld [vmem:[%s4625_s5 + $0x48] sm:$0xff] }
 0x674   :  { %v2132_v30 = vmul.f32 %v2804_v26, %v2125_v5  ;;  %v2135_v32 = vmul.f32 %v2807_v9, %v2113_v44  ;;  %3045 = vmatprep.subr.bf16.mxu0 %v3044_v11 }
 0x675   :  { %vm456_vm15 = vcmp.lt.s32.totalorder %v448_v8, 128 }
 0x676   :  { %v3046_v17 = vpack.c.bf16 %v2132_v30, %v2128_v4  ;;  %v4431_v15 = vpop.permute.xlu1 %2154  ;;  %v4433_v47 = vpop.permute.xlu0 %2168  ;;  %v3068_v29 = vpack.c.bf16 %v2135_v32, %v2131_v14  ;;  %v449_v32 = vadd.s32 4, %v4729_v60 }
 0x677   :  { %v2189_v8 = vsel %vm2176_vm1, %v4433_v47, %v4396_v19 }
 0x678   :  { %3047 = vmatpush1.bf16.msra.mxu0 %v3046_v17  ;;  %3069 = vmatprep.subr.bf16.mxu1 %v3068_v29  ;;  %vm457_vm0 = vcmp.lt.s32.totalorder %v449_v32, 128  ;;  %v4732_v32 = vpack.c.bf16 %v4219_v43, %v4198_v51  ;;  %v2177_v51 = vsel %vm2176_vm1, %v4400_v36, %v4433_v47 }
 0x679   :  { %3071 = vmatpush1.bf16.msra.mxu1 %v3070_v49 }
 0x67a   :  { %v2171_v53 = vpop.permute.xlu1 %2170  ;;  %v2084_v34 = vpop.permute.xlu0 %2083 }
 0x67e   :  { %v2086_v24 = vpop.permute.xlu1 %2085  ;;  %v2100_v41 = vpop.permute.xlu0 %2099 }
 0x682   :  { %v2102_v27 = vpop.permute.xlu1 %2101  ;;  %v2092_v37 = vpop.permute.xlu0 %2091 }
 0x683   :  { %v2122_v5 = vsel %vm2111_vm9, %v2084_v34, %v2092_v37  ;;  %v2118_v52 = vsel %vm2111_vm9, %v2092_v37, %v2100_v41 }
 0x684   :  { %v2137_v46 = vmul.f32 %v2805_v0, %v2122_v5  ;;  %v2138_v38 = vmul.f32 %v2806_v3, %v2118_v52 }
 0x686   :  { %v2094_v44 = vpop.permute.xlu1 %2093  ;;  %v2108_v30 = vpop.permute.xlu0 %2107 }
 0x687   :  { %v2123_v4 = vsel %vm2111_vm9, %v2086_v24, %v2094_v44  ;;  %v2119_v17 = vsel %vm2111_vm9, %v2094_v44, %v2102_v27  ;;  %v2114_v11 = vsel %vm2111_vm9, %v2100_v41, %v2108_v30  ;;  %v2126_v16 = vsel %vm2111_vm9, %v2108_v30, %v2084_v34 }
 0x688   :  { %v2141_v14 = vmul.f32 %v2805_v0, %v2123_v4  ;;  %v451_v44 = vadd.s32 4, %v3541_v22  ;;  %v2142_v0 = vmul.f32 %v2806_v3, %v2119_v17  ;;  %v2136_v30 = vmul.f32 %v2804_v26, %v2126_v16 }
 0x689   :  { %v2139_v50 = vmul.f32 %v2807_v9, %v2114_v11  ;;  %v450_v41 = vadd.s32 4, %v3543_v28  ;;  %v2190_v28 = vsel %vm2176_vm1, %v2171_v53, %v4398_v62 }
 0x68a   :  { %v2110_v29 = vpop.permute.xlu1 %2109  ;;  %v4449_v49 = vpop.permute.xlu0 %2148  ;;  %v3048_v5 = vpack.c.bf16 %v2141_v14, %v2137_v46  ;;  %vm459_vm2 = vcmp.lt.s32.totalorder %v451_v44, 128  ;;  %v4731_v14 = vpack.c.bf16 %v4266_v18, %v4276_v25  ;;  %v2178_v18 = vsel %vm2176_vm1, %v4403_v58, %v2171_v53 }
 0x68b   :  { %v2115_v4 = vsel %vm2111_vm9, %v2102_v27, %v2110_v29  ;;  %v2127_v34 = vsel %vm2111_vm9, %v2110_v29, %v2086_v24  ;;  %v3074_v27 = vpack.c.bf16 %v2142_v0, %v2138_v38  ;;  %v2809_v38 = vsel %vm457_vm0, 1.0, %v4670_v13 }
 0x68c   :  { %v2140_v6 = vmul.f32 %v2804_v26, %v2127_v34  ;;  %v2143_v60 = vmul.f32 %v2807_v9, %v2115_v4  ;;  %3049 = vmatprep.subr.bf16.mxu0 %v3048_v5  ;;  %v2182_v9 = vsel %vm2176_vm1, %v4431_v15, %v4403_v58  ;;  %v2808_v26 = vsel %vm456_vm15, 1.0, %v4670_v13 }
 0x68d   :  { %vm458_vm3 = vcmp.lt.s32.totalorder %v450_v41, 128  ;;  %v2811_v3 = vsel %vm459_vm2, 1.0, %v4670_v13  ;;  %v2198_v16 = vmul.f32 %v2809_v38, %v2182_v9  ;;  %v4735_v5 = vpack.c.bf16 %v4282_v61, %v4298_v33 }
 0x68e   :  { %v3050_v37 = vpack.c.bf16 %v2140_v6, %v2136_v30  ;;  %v4457_v46 = vpop.permute.xlu1 %2150  ;;  %v2157_v22 = vpop.permute.xlu0 %2156  ;;  %v3072_v17 = vpack.c.bf16 %v2143_v60, %v2139_v50  ;;  %v4730_v6 = vpack.c.bf16 %v4264_v12, %v4274_v20  ;;  %v2181_v50 = vsel %vm2176_vm1, %v4423_v57, %v4400_v36 }
 0x68f   :  { %v2185_v12 = vsel %vm2176_vm1, %v4396_v19, %v4423_v57  ;;  %v2186_v20 = vsel %vm2176_vm1, %v4398_v62, %v4431_v15  ;;  %v2200_v25 = vmul.f32 %v2811_v3, %v2190_v28  ;;  %v2194_v57 = vmul.f32 %v2809_v38, %v2181_v50 }
 0x690   :  { %3051 = vmatpush1.bf16.msra.mxu0 %v3050_v37  ;;  %3073 = vmatprep.subr.bf16.mxu1 %v3072_v17  ;;  %v2810_v52 = vsel %vm458_vm3, 1.0, %v4670_v13  ;;  %v4733_v62 = vpack.c.bf16 %v4278_v55, %v4292_v2  ;;  %v4734_v19 = vpack.c.bf16 %v4247_v1, %v4217_v7  ;;  %v2193_v58 = vmul.f32 %v2808_v26, %v2185_v12 }
 0x691   :  { %3053 = vmatprep.subr.bf16.mxu0 %v4730_v6  ;;  %3075 = vmatpush1.bf16.msra.mxu1 %v3074_v27  ;;  %v2197_v53 = vmul.f32 %v2808_v26, %v2186_v20  ;;  %v2196_v43 = vmul.f32 %v2811_v3, %v2189_v8  ;;  %v2199_v55 = vmul.f32 %v2810_v52, %v2178_v18 }
 0x692   :  { %v2167_v24 = vpop.permute.xlu1 %2166  ;;  %3077 = vmatprep.subr.bf16.mxu1 %v4731_v14  ;;  %v2165_v11 = vpop.permute.xlu0 %2164  ;;  %v3060_v1 = vpack.c.bf16 %v2198_v16, %v2194_v57  ;;  %v2187_v36 = vsel %vm2176_vm1, %v4449_v49, %v2157_v22  ;;  %v4736_v61 = vpack.c.bf16 %v4280_v23, %v4296_v48  ;;  %v2195_v4 = vmul.f32 %v2810_v52, %v2177_v51 }
 0x693   :  { %v2183_v15 = vsel %vm2176_vm1, %v2157_v22, %v2165_v11  ;;  %v3084_v33 = vpack.c.bf16 %v2200_v25, %v2196_v43  ;;  %v4737_v60 = vpack.c.bf16 %v4294_v39, %v4300_v63  ;;  %v3062_v41 = vpack.c.bf16 %v2197_v53, %v2193_v58 }
 0x694   :  { %3055 = vmatpush1.bf16.msra.mxu0 %v4732_v32  ;;  %v2202_v47 = vmul.f32 %v2809_v38, %v2183_v15  ;;  %v3086_v48 = vpack.c.bf16 %v2199_v55, %v2195_v4  ;;  %v2201_v17 = vmul.f32 %v2808_v26, %v2187_v36 }
 0x695   :  { %3057 = vmatprep.subr.bf16.mxu0 %v4733_v62  ;;  %3079 = vmatpush1.bf16.msra.mxu1 %v4734_v19 }
 0x696   :  { %v2159_v29 = vpop.permute.xlu1 %2158  ;;  %3081 = vmatprep.subr.bf16.mxu1 %v4735_v5  ;;  %v2173_v44 = vpop.permute.xlu0 %2172 }
 0x697   :  { %v2184_v2 = vsel %vm2176_vm1, %v2159_v29, %v2167_v24  ;;  %v2188_v7 = vsel %vm2176_vm1, %v4457_v46, %v2159_v29  ;;  %v2179_v34 = vsel %vm2176_vm1, %v2165_v11, %v2173_v44  ;;  %v2191_v30 = vsel %vm2176_vm1, %v2173_v44, %v4449_v49 }
 0x698   :  { %v2206_v0 = vmul.f32 %v2809_v38, %v2184_v2  ;;  %3059 = vmatpush1.bf16.msra.mxu0 %v4736_v61  ;;  %v2205_v37 = vmul.f32 %v2808_v26, %v2188_v7  ;;  %v2203_v49 = vmul.f32 %v2810_v52, %v2179_v34  ;;  %v2204_v28 = vmul.f32 %v2811_v3, %v2191_v30  ;;  %v2880_v26 = vld [vmem:[%s4625_s5 + $0x40] sm:$0xff] }
 0x699   :  { %3061 = vmatprep.subr.bf16.mxu0 %v3060_v1  ;;  %3083 = vmatpush1.bf16.msra.mxu1 %v4737_v60 }
 0x69a   :  { %v2175_v22 = vpop.permute.xlu1 %2174  ;;  %3085 = vmatprep.subr.bf16.mxu1 %v3084_v33  ;;  %v3064_v23 = vpack.c.bf16 %v2206_v0, %v2202_v47  ;;  %v3066_v39 = vpack.c.bf16 %v2205_v37, %v2201_v17 }
 0x69b   :  { %v2180_v27 = vsel %vm2176_vm1, %v2167_v24, %v2175_v22  ;;  %v2192_v9 = vsel %vm2176_vm1, %v2175_v22, %v4457_v46  ;;  %v2882_v46 = vld [vmem:[%s4625_s5 + $0x50] sm:$0xff] }
 0x69c   :  { %v2207_v6 = vmul.f32 %v2810_v52, %v2180_v27  ;;  %v2208_v38 = vmul.f32 %v2811_v3, %v2192_v9  ;;  %3063 = vmatpush1.bf16.msra.mxu0 %v3062_v41  ;;  %v2883_v3 = vld [vmem:[%s4625_s5 + $0x58] sm:$0xff] }
 0x69d   :  { %3065 = vmatprep.subr.bf16.mxu0 %v3064_v23  ;;  %3087 = vmatpush1.bf16.msra.mxu1 %v3086_v48 }
 0x69e   :  { %v3090_v63 = vpack.c.bf16 %v2207_v6, %v2203_v49  ;;  %v3088_v50 = vpack.c.bf16 %v2208_v38, %v2204_v28 }
 0x6a0   :  { %3067 = vmatpush1.bf16.msra.mxu0 %v3066_v39  ;;  %3089 = vmatprep.subr.bf16.mxu1 %v3088_v50 }
 0x6a1   :  { %3091 = vmatpush1.bf16.msra.mxu1 %v3090_v63 }
 0x6a3   :  { %2884 = vmatmul.mubr.msk.f32.vlgmr.msra.gmra.mrb[40].mxu0 %vm702_vm12, %v2880_v26 }
 0x6a4   :  { %2888 = vmatmul.mubr.msk.f32.vlgmr.msra.gmra.mrb[40].mxu1 %vm702_vm12, %v2880_v26  ;;  %2296 = vmatprep.mubr.f32.mxu0 %v4670_v13 }
 0x6a5   :  { %2385 = vmatprep.mubr.f32.mxu1 %v4670_v13 }
 0x6a7   :  { %2885 = vmatmul.mubr.msk.f32.gmra.mrb[42].mxu0 %vm702_vm12, %v2881_v45  ;;  %v2412_v24 = vpop.permute.xlu0 %2411 }
 0x6a8   :  { %2889 = vmatmul.mubr.msk.f32.gmra.mrb[42].mxu1 %vm702_vm12, %v2881_v45  ;;  %2302 = vmatprep.mubr.f32.mxu0 %v4670_v13 }
 0x6a9   :  { %2391 = vmatprep.mubr.f32.mxu1 %v4670_v13 }
 0x6ab   :  { %2886 = vmatmul.mubr.msk.f32.gmra.mrb[44].mxu0 %vm702_vm12, %v2882_v46  ;;  %v2417_v14 = vpop.permute.xlu1 %2416  ;;  %v2453_v11 = vpop.permute.xlu0 %2452 }
 0x6ac   :  { %2890 = vmatmul.mubr.msk.f32.gmra.mrb[44].mxu1 %vm702_vm12, %v2882_v46  ;;  %2308 = vmatprep.mubr.f32.mxu0 %v4670_v13 }
 0x6ad   :  { %2397 = vmatprep.mubr.f32.mxu1 %v4670_v13 }
 0x6af   :  { %2887 = vmatmul.mubr.msk.f32.gmra.mrb[46].mxu0 %vm702_vm12, %v2883_v3  ;;  %v2458_v18 = vpop.permute.xlu1 %2457  ;;  %v2422_v29 = vpop.permute.xlu0 %2421 }
 0x6b0   :  { %2891 = vmatmul.mubr.msk.f32.gmra.mrb[46].mxu1 %vm702_vm12, %v2883_v3  ;;  %2608 = vmatprep.mubr.f32.mxu0 %v4670_v13 }
 0x6b1   :  { %2697 = vmatprep.mubr.f32.mxu1 %v4670_v13 }
 0x6b3   :  { %v2427_v36 = vpop.permute.xlu1 %2426  ;;  %v2463_v39 = vpop.permute.xlu0 %2462 }
 0x776   :  { %v2292_v12 = vpop.f32.mrb[40].mxu0 }
 0x777   :  { %v2429_v20 = vmul.f32 %v2412_v24, %v2292_v12  ;;  %v2294_v16 = vpop.f32.mrb[41].mxu0  ;;  %v2381_v8 = vpop.f32.mrb[40].mxu1 }
 0x778   :  { %v2430_v25 = vmul.f32 %v2412_v24, %v2294_v16  ;;  %v2431_v32 = vmul.f32 %v2412_v24, %v2381_v8  ;;  %v2383_v57 = vpop.f32.mrb[41].mxu1 }
 0x779   :  { %v2432_v52 = vmul.f32 %v2412_v24, %v2383_v57  ;;  %v2470_v15 = vadd.f32 %v2453_v11, %v2429_v20 }
 0x77a   :  { %v2471_v62 = vadd.f32 %v2453_v11, %v2430_v25  ;;  %v2298_v19 = vpop.f32.mrb[42].mxu0  ;;  %v2472_v58 = vadd.f32 %v2453_v11, %v2431_v32 }
 0x77b   :  { %v2433_v53 = vmul.f32 %v2417_v14, %v2298_v19  ;;  %v2300_v51 = vpop.f32.mrb[43].mxu0  ;;  %v2387_v43 = vpop.f32.mrb[42].mxu1  ;;  %v2473_v2 = vadd.f32 %v2453_v11, %v2432_v52  ;;  %v2486_v47 = vmax.f32 %v2470_v15, 0.0 }
 0x77c   :  { %v2434_v5 = vmul.f32 %v2417_v14, %v2300_v51  ;;  %v2435_v44 = vmul.f32 %v2417_v14, %v2387_v43  ;;  %v2389_v55 = vpop.f32.mrb[43].mxu1  ;;  %v2487_v0 = vmax.f32 %v2471_v62, 0.0  ;;  %v2488_v34 = vmax.f32 %v2472_v58, 0.0  ;;  %v2468_v11 = vpop.permute.xlu1 %2467 }
 0x77d   :  { %v2474_v7 = vadd.f32 %v2458_v18, %v2433_v53  ;;  %v2436_v1 = vmul.f32 %v2417_v14, %v2389_v55  ;;  %v2489_v49 = vmax.f32 %v2473_v2, 0.0 }
 0x77e   :  { %v2475_v61 = vadd.f32 %v2458_v18, %v2434_v5  ;;  %v2476_v33 = vadd.f32 %v2458_v18, %v2435_v44  ;;  %v2304_v4 = vpop.f32.mrb[44].mxu0 }
 0x77f   :  { %v2490_v30 = vmax.f32 %v2474_v7, 0.0  ;;  %v2477_v60 = vadd.f32 %v2458_v18, %v2436_v1  ;;  %v2437_v41 = vmul.f32 %v2422_v29, %v2304_v4  ;;  %v2306_v37 = vpop.f32.mrb[45].mxu0  ;;  %v2393_v22 = vpop.f32.mrb[44].mxu1 }
 0x780   :  { %v2491_v23 = vmax.f32 %v2475_v61, 0.0  ;;  %v2492_v48 = vmax.f32 %v2476_v33, 0.0  ;;  %v2438_v17 = vmul.f32 %v2422_v29, %v2306_v37  ;;  %v2439_v27 = vmul.f32 %v2422_v29, %v2393_v22  ;;  %v2395_v9 = vpop.f32.mrb[45].mxu1  ;;  %v2903_v61 = vld [vmem:[%s4628_s8 + $0x58] sm:$0xff]  ;;  %v2515_v33 = vpop.permute.xlu0 %2514 }
 0x781   :  { %v3094_v28 = vpack.c.bf16 %v2490_v30, %v2486_v47  ;;  %v2493_v6 = vmax.f32 %v2477_v60, 0.0  ;;  %v2440_v38 = vmul.f32 %v2422_v29, %v2395_v9  ;;  %v2478_v45 = vadd.f32 %v2463_v39, %v2437_v41  ;;  %v2901_v47 = vld [vmem:[%s4628_s8 + $0x48] sm:$0xff] }
 0x782   :  { %v3102_v63 = vpack.c.bf16 %v2492_v48, %v2488_v34  ;;  %v2310_v50 = vpop.f32.mrb[46].mxu0  ;;  %v3092_v26 = vpack.c.bf16 %v2491_v23, %v2487_v0  ;;  %v2479_v12 = vadd.f32 %v2463_v39, %v2438_v17  ;;  %v2480_v20 = vadd.f32 %v2463_v39, %v2439_v27  ;;  %v2902_v0 = vld [vmem:[%s4628_s8 + $0x50] sm:$0xff]  ;;  %v2520_v17 = vpop.permute.xlu1 %2519 }
 0x783   :  { %v2441_v46 = vmul.f32 %v2427_v36, %v2310_v50  ;;  %v2312_v3 = vpop.f32.mrb[47].mxu0  ;;  %v2399_v24 = vpop.f32.mrb[46].mxu1  ;;  %v3100_v14 = vpack.c.bf16 %v2493_v6, %v2489_v49  ;;  %v2481_v25 = vadd.f32 %v2463_v39, %v2440_v38  ;;  %v2494_v62 = vmax.f32 %v2478_v45, 0.0 }
 0x784   :  { %v2442_v16 = vmul.f32 %v2427_v36, %v2312_v3  ;;  %v2443_v8 = vmul.f32 %v2427_v36, %v2399_v24  ;;  %v2401_v18 = vpop.f32.mrb[47].mxu1  ;;  %3093 = vmatprep.subr.bf16.mxu0 %v3092_v26  ;;  %v2495_v53 = vmax.f32 %v2479_v12, 0.0  ;;  %v2496_v51 = vmax.f32 %v2480_v20, 0.0  ;;  %v2525_v45 = vpop.permute.xlu0 %2524 }
 0x785   :  { %v2482_v32 = vadd.f32 %v2468_v11, %v2441_v46  ;;  %v2444_v57 = vmul.f32 %v2427_v36, %v2401_v18  ;;  %3095 = vmatpush1.bf16.msra.mxu0 %v3094_v28  ;;  %3101 = vmatprep.subr.bf16.mxu1 %v3100_v14  ;;  %v2497_v5 = vmax.f32 %v2481_v25, 0.0  ;;  %v2900_v36 = vld [vmem:[%s4628_s8 + $0x40] sm:$0xff]  ;;  %s3153_s8 = smov [#allocation2]  }
 0x786   :  { %v2483_v52 = vadd.f32 %v2468_v11, %v2442_v16  ;;  %v2484_v15 = vadd.f32 %v2468_v11, %v2443_v8  ;;  %3103 = vmatpush1.bf16.msra.mxu1 %v3102_v63  ;;  %v2530_v8 = vpop.permute.xlu1 %2529  ;;  %s2762_s19 = sshll.u32 %s3153_s8, 4  ;;  %s2763_s19 = int_to_ptr.vmem [resolvable:$true] %s2762_s19 }
 0x787   :  { %v2498_v19 = vmax.f32 %v2482_v32, 0.0  ;;  %v2485_v58 = vadd.f32 %v2468_v11, %v2444_v57  ;;  %s3121_s20 = scalar_lea.vmem %s2763_s19, 2048  ;;  %p3126_p1 = scmp.lt.s32.totalorder %s2763_s19, %s2763_s19 }
 0x788   :  { %v2499_v43 = vmax.f32 %v2483_v52, 0.0  ;;  %v2500_v29 = vmax.f32 %v2484_v15, 0.0  ;;  %p3122_p0 = scmp.ne.s32.totalorder %s2763_s19, %s3121_s20  ;;  %p3127_p2 = scmp.lt.s32.totalorder %s3121_s20, %s3121_s20 }
 0x789   :  { %v3098_v44 = vpack.c.bf16 %v2498_v19, %v2494_v62  ;;  %v2501_v55 = vmax.f32 %v2485_v58, 0.0 }
 0x78a   :  { %v3106_v2 = vpack.c.bf16 %v2500_v29, %v2496_v51  ;;  %v3096_v7 = vpack.c.bf16 %v2499_v43, %v2495_v53  ;;  %v4742_v29 = vld [vmem:[#allocation18_spill] sm:$0xff]  ;;  %p3128_p3 = por %p3127_p2, %p3126_p1 }
 0x78b   :  { %v3104_v1 = vpack.c.bf16 %v2501_v55, %v2497_v5 }
 0x78c   :  { %3097 = vmatprep.subr.bf16.mxu0 %v3096_v7  ;;  %p3129_p4 = pnand %p3128_p3, %p3122_p0 }
 0x78d   :  { %3099 = vmatpush1.bf16.msra.mxu0 %v3098_v44  ;;  %3105 = vmatprep.subr.bf16.mxu1 %v3104_v1  ;;  %v4743_v44 = vld [vmem:[#allocation7_spill] sm:$0xff] }
 0x78e   :  { %3107 = vmatpush1.bf16.msra.mxu1 %v3106_v2  ;;  %v4744_v2 = vld [vmem:[#allocation20_spill] sm:$0xff] }
 0x790   :  { %2908 = vmatmul.mubr.msk.f32.vlgmr.msra.gmra.mrb[48].mxu0 %vm1017_vm13, %v2900_v36 }
 0x791   :  { %2912 = vmatmul.mubr.msk.f32.vlgmr.msra.gmra.mrb[48].mxu1 %vm1017_vm13, %v2900_v36  ;;  %2614 = vmatprep.mubr.f32.mxu0 %v4670_v13 }
 0x792   :  { %2703 = vmatprep.mubr.f32.mxu1 %v4670_v13 }
 0x794   :  { %2909 = vmatmul.mubr.msk.f32.gmra.mrb[50].mxu0 %vm1017_vm13, %v2901_v47 }
 0x795   :  { %2913 = vmatmul.mubr.msk.f32.gmra.mrb[50].mxu1 %vm1017_vm13, %v2901_v47  ;;  %2620 = vmatprep.mubr.f32.mxu0 %v4670_v13 }
 0x796   :  { %2709 = vmatprep.mubr.f32.mxu1 %v4670_v13 }
 0x798   :  { %2910 = vmatmul.mubr.msk.f32.gmra.mrb[52].mxu0 %vm1017_vm13, %v2902_v0 }
 0x799   :  { %2914 = vmatmul.mubr.msk.f32.gmra.mrb[52].mxu1 %vm1017_vm13, %v2902_v0  ;;  %2626 = vmatprep.mubr.f32.mxu0 %v4670_v13 }
 0x79a   :  { %2715 = vmatprep.mubr.f32.mxu1 %v4670_v13 }
 0x79c   :  { %2911 = vmatmul.mubr.msk.f32.gmra.mrb[54].mxu0 %vm1017_vm13, %v2903_v61 }
 0x79d   :  { %2915 = vmatmul.mubr.msk.f32.gmra.mrb[54].mxu1 %vm1017_vm13, %v2903_v61 }
 0x863   :  { %v2610_v4 = vpop.f32.mrb[48].mxu0 }
 0x864   :  { %v2611_v34 = vadd.f32 %v2610_v4, %v2515_v33  ;;  %v2612_v30 = vpop.f32.mrb[49].mxu0  ;;  %v2699_v60 = vpop.f32.mrb[48].mxu1 }
 0x865   :  { %v2613_v41 = vadd.f32 %v2612_v30, %v2515_v33  ;;  %v2700_v37 = vadd.f32 %v2699_v60, %v2515_v33  ;;  %v2701_v22 = vpop.f32.mrb[49].mxu1 }
 0x866   :  { %v2722_v23 = vadd.f32 %v2611_v34, %v4176_v35  ;;  %v2702_v48 = vadd.f32 %v2701_v22, %v2515_v33 }
 0x867   :  { %v2723_v27 = vadd.f32 %v2613_v41, %v4183_v31  ;;  %v2724_v13 = vadd.f32 %v2700_v37, %v4185_v56  ;;  %v2616_v9 = vpop.f32.mrb[50].mxu0 }
 0x868   :  { %2738 = vst [vmem:[#allocation2] sm:$0xff] %v2722_v23  ;;  %v2725_v49 = vadd.f32 %v2702_v48, %v4191_v54  ;;  %v2617_v28 = vadd.f32 %v2616_v9, %v2520_v17  ;;  %v2618_v6 = vpop.f32.mrb[51].mxu0  ;;  %v2705_v38 = vpop.f32.mrb[50].mxu1 }
 0x869   :  { %2743 = vst [vmem:[#allocation2 + $0x20] sm:$0xff] %v2723_v27  ;;  %2748 = vst [vmem:[#allocation2 + $0x40] sm:$0xff] %v2724_v13  ;;  %v2619_v39 = vadd.f32 %v2618_v6, %v2520_v17  ;;  %v2706_v63 = vadd.f32 %v2705_v38, %v2520_v17  ;;  %v2707_v50 = vpop.f32.mrb[51].mxu1 }
 0x86a   :  { %2753 = vst [vmem:[#allocation2 + $0x60] sm:$0xff] %v2725_v49  ;;  %v2726_v35 = vadd.f32 %v2617_v28, %v4200_v59  ;;  %v2708_v26 = vadd.f32 %v2707_v50, %v2520_v17 }
 0x86b   :  { %v2727_v31 = vadd.f32 %v2619_v39, %v4209_v21  ;;  %v2728_v56 = vadd.f32 %v2706_v63, %v4212_v10  ;;  %v2622_v46 = vpop.f32.mrb[52].mxu0  ;;  %v4738_v21 = vld [vmem:[#allocation17_spill] sm:$0xff]  ;;  %v4739_v10 = vld [vmem:[#allocation6_spill] sm:$0xff] }
 0x86c   :  { %2739 = vst [vmem:[#allocation2 + $0x8] sm:$0xff] %v2726_v35  ;;  %v2729_v54 = vadd.f32 %v2708_v26, %v4223_v42  ;;  %v2623_v3 = vadd.f32 %v2622_v46, %v2525_v45  ;;  %v2624_v24 = vpop.f32.mrb[53].mxu0  ;;  %v2711_v14 = vpop.f32.mrb[52].mxu1  ;;  %v4740_v42 = vld [vmem:[#allocation19_spill] sm:$0xff] }
 0x86d   :  { %2744 = vst [vmem:[#allocation2 + $0x28] sm:$0xff] %v2727_v31  ;;  %2749 = vst [vmem:[#allocation2 + $0x48] sm:$0xff] %v2728_v56  ;;  %v2625_v11 = vadd.f32 %v2624_v24, %v2525_v45  ;;  %v2712_v12 = vadd.f32 %v2711_v14, %v2525_v45  ;;  %v2713_v20 = vpop.f32.mrb[53].mxu1 }
 0x86e   :  { %2754 = vst [vmem:[#allocation2 + $0x68] sm:$0xff] %v2729_v54  ;;  %v2730_v59 = vadd.f32 %v2623_v3, %v4225_v40  ;;  %v2714_v16 = vadd.f32 %v2713_v20, %v2525_v45  ;;  %v4741_v40 = vld [vmem:[#allocation5_spill] sm:$0xff] }
 0x86f   :  { %v2731_v18 = vadd.f32 %v2625_v11, %v4738_v21  ;;  %v2732_v25 = vadd.f32 %v2712_v12, %v4739_v10  ;;  %v2628_v32 = vpop.f32.mrb[54].mxu0 }
 0x870   :  { %2740 = vst [vmem:[#allocation2 + $0x10] sm:$0xff] %v2730_v59  ;;  %v2733_v57 = vadd.f32 %v2714_v16, %v4740_v42  ;;  %v2629_v52 = vadd.f32 %v2628_v32, %v2530_v8  ;;  %v2630_v15 = vpop.f32.mrb[55].mxu0  ;;  %v2717_v62 = vpop.f32.mrb[54].mxu1 }
 0x871   :  { %2745 = vst [vmem:[#allocation2 + $0x30] sm:$0xff] %v2731_v18  ;;  %2750 = vst [vmem:[#allocation2 + $0x50] sm:$0xff] %v2732_v25  ;;  %v2631_v19 = vadd.f32 %v2630_v15, %v2530_v8  ;;  %v2718_v58 = vadd.f32 %v2717_v62, %v2530_v8  ;;  %v2719_v53 = vpop.f32.mrb[55].mxu1 }
 0x872   :  { %2755 = vst [vmem:[#allocation2 + $0x70] sm:$0xff] %v2733_v57  ;;  %v2734_v51 = vadd.f32 %v2629_v52, %v4741_v40  ;;  %v2720_v43 = vadd.f32 %v2719_v53, %v2530_v8 }
 0x873   :  { %v2735_v5 = vadd.f32 %v2631_v19, %v4742_v29  ;;  %v2736_v55 = vadd.f32 %v2718_v58, %v4743_v44 }
 0x874   :  { %2741 = vst [vmem:[#allocation2 + $0x18] sm:$0xff] %v2734_v51  ;;  %v2737_v7 = vadd.f32 %v2720_v43, %v4744_v2 }
 0x875   :  { %2746 = vst [vmem:[#allocation2 + $0x38] sm:$0xff] %v2735_v5  ;;  %2751 = vst [vmem:[#allocation2 + $0x58] sm:$0xff] %v2736_v55 }
 0x876   :  { %2756 = vst [vmem:[#allocation2 + $0x78] sm:$0xff] %v2737_v7 }
 0x877   :  { %3132 = shalt.err (!%p3129_p4)
}
 0x878   :  { %s3133_s2 = scalar_lea.hbm %s4630_s10, 2048 }
 0x879   :  { %p3134_p5 = scmp.ne.s32.totalorder %s4630_s10, %s3133_s2  ;;  %p3137_p6 = scmp.lt.u32.totalorder %s3133_s2, %s4630_s10 }
 0x87b   :  { %p3139_p7 = pnand %p3137_p6, %p3134_p5 }
 0x87d   :  { %3142 = shalt.err (!%p3139_p7)
}
 0x87e   :  { %s3154_s6 = smov 128   ;;  %s3155_s25 = smov 8  }
 0x87f   :  { %2768 = dma.vmem_to_hbm [thread:$0]  %s2763_s19, 2048, %s4630_s10, [#allocation3], %s3154_s6, %s3154_s6, %s3155_s25  }
 0x880   :  { %3143 = dma.done.wait [#allocation3], 2048  }
 0x881   :  { %3144 = vsyncadd [#allocation3], 4294965248 }
 0x882   :  { %2772 = vsyncpa [#allocation3], 1 }

</bundles_post_ra>
